<compile_context>
chip_gen: v5e
topology: v5e:2x2
jax: 0.10.0
libtpu: 0.0.40
codegen_flags: <defaults>
</compile_context>

<pallas_src>
import math

import jax
import jax.numpy as jnp
from jax.experimental import pallas as pl
from jax.experimental.pallas import tpu as pltpu

DIL = 2  # MultiScaleConvBlock default dilation (branch == 'all')


# ----------------------------------------------------------------------------
# small helpers
# ----------------------------------------------------------------------------
def _full_spec(shape):
    """Full-extent block for grid=(1,) — satisfies the (8,128) rule via the
    full-array escape, so tiny K/N dims are never zero-padded to 128."""
    return pl.BlockSpec(shape, lambda i: (0,) * len(shape))


def _ds(start, size, stride):
    """Static slice helper; only emits a strided slice when stride > 1."""
    return pl.ds(start, size) if stride == 1 else pl.ds(start, size, stride)


def xavier_uniform(key, shape, fan_in, fan_out):
    a = math.sqrt(6.0 / (fan_in + fan_out))
    return jax.random.uniform(key, shape, jnp.float32, -a, a)


def fold_bn(w_tap, gamma, beta, mean, var, eps=1e-5):
    """Fold eval-mode BatchNorm into tap-major conv weights (9, Cin, Cout)."""
    scale = gamma / jnp.sqrt(var + eps)
    shift = beta - mean * scale
    return w_tap * scale[None, None, :], shift


def im2col(x_nhwc, k, stride, dilation, padding):
    """(N,H,W,C) -> (N*OH*OW, k*k*C), K ordered (kh, kw, c).  Wrapper-side XLA
    glue, used ONLY for the first conv layer (input comes from HBM anyway)."""
    n, h, w, c = x_nhwc.shape
    xp = jnp.pad(x_nhwc, ((0, 0), (padding, padding), (padding, padding), (0, 0)))
    oh = (h + 2 * padding - dilation * (k - 1) - 1) // stride + 1
    ow = (w + 2 * padding - dilation * (k - 1) - 1) // stride + 1
    taps = []
    for kh in range(k):
        for kw in range(k):
            taps.append(jax.lax.slice(
                xp,
                (0, kh * dilation, kw * dilation, 0),
                (n, kh * dilation + (oh - 1) * stride + 1,
                 kw * dilation + (ow - 1) * stride + 1, c),
                (1, stride, stride, 1)))
    patches = jnp.stack(taps, axis=3)                    # (N, OH, OW, 9, C)
    return patches.reshape(n * oh * ow, k * k * c)


# ----------------------------------------------------------------------------
# parameters (Xavier-uniform, zero bias, eval-mode BN folded into weights)
# ----------------------------------------------------------------------------
def build_params(key, cfg):
    keys = iter(jax.random.split(key, 64))
    conv = []
    in_ch = 1
    out_ch = cfg["n_filters"]
    for _ in range(cfg["layers"]):
        b_ch = out_ch // 2 + out_ch % 2
        w_taps, shifts = [], []
        for _ in range(2):                               # two parallel branches
            w = xavier_uniform(next(keys), (b_ch, in_ch, 3, 3),
                               fan_in=in_ch * 9, fan_out=b_ch * 9)
            # (Cout,Cin,kh,kw) -> tap-major (9, Cin, Cout)
            w_tap = jnp.transpose(w, (2, 3, 1, 0)).reshape(9, in_ch, b_ch)
            ones = jnp.ones((b_ch,), jnp.float32)
            zeros = jnp.zeros((b_ch,), jnp.float32)
            w_tap, shift = fold_bn(w_tap, ones, zeros, zeros, ones)
            w_taps.append(w_tap)
            shifts.append(shift)
        conv.append({"w1": w_taps[0], "w2": w_taps[1],
                     "b": jnp.concatenate(shifts).reshape(1, 2 * b_ch)})
        in_ch = 2 * b_ch
        out_ch *= 2

    fc = []
    in_f = in_ch
    for _ in range(cfg["fc_layers"]):
        w = xavier_uniform(next(keys), (in_f, cfg["hidden_dim"]),
                           in_f, cfg["hidden_dim"])
        fc.append((w, jnp.zeros((1, cfg["hidden_dim"]), jnp.float32)))
        in_f = cfg["hidden_dim"]
    w_out = xavier_uniform(next(keys), (in_f, cfg["embed_dim"]),
                           in_f, cfg["embed_dim"])
    b_out = jnp.zeros((1, cfg["embed_dim"]), jnp.float32)
    return {"conv": conv, "fc": fc, "out": (w_out, b_out)}


# ----------------------------------------------------------------------------
# the fused kernel (whole network, one invocation, grid=(1,))
# ----------------------------------------------------------------------------
def _make_kernel(plan, n, n_fc, n_in, compute_dtype):
    L = len(plan)

    def kernel(*refs):
        ins = refs[:n_in]
        o_ref = refs[n_in]
        canvases = refs[n_in + 1:]

        it = iter(ins)
        pat1, pat2 = next(it), next(it)                  # layer-0 patches
        w0_1, w0_2, b0 = next(it), next(it), next(it)
        inner = [(next(it), next(it), next(it)) for _ in range(L - 1)]
        pool = next(it)
        fcs = [(next(it), next(it)) for _ in range(n_fc)]
        w_out, b_out = next(it), next(it)

        # ---- layer 0: two branch GEMMs on wrapper-built im2col patches ----
        y1 = jnp.dot(pat1[...], w0_1[...], preferred_element_type=jnp.float32)
        y2 = jnp.dot(pat2[...], w0_2[...], preferred_element_type=jnp.float32)
        y = jnp.maximum(jnp.concatenate([y1, y2], axis=-1) + b0[...], 0.0)

        # ---- layers 1..L-1: fused im2col = 9 shifted matmul-accumulates per
        #      branch, windows read straight from the VMEM canvas ----
        for li in range(1, L):
            p = plan[li]
            cv = canvases[li - 1]
            mp, s = p["pad"], p["stride"]
            cin, bch = p["cin"], p["bch"]
            ih, iw, oh, ow = p["ih"], p["iw"], p["oh"], p["ow"]
            m = n * oh * ow

            cv[...] = jnp.zeros(cv.shape, compute_dtype)
            cv[:, mp:mp + ih, mp:mp + iw, :] = (
                y.reshape(n, ih, iw, cin).astype(compute_dtype))

            w1_ref, w2_ref, b_ref = inner[li - 1]
            outs = []
            for w_ref, pad_b, d_b in ((w1_ref, 1, 1), (w2_ref, DIL, DIL)):
                base = mp - pad_b
                acc = jnp.zeros((m, bch), jnp.float32)
                for kh in range(3):
                    for kw in range(3):
                        win = cv[:, _ds(base + kh * d_b, oh, s),
                                 _ds(base + kw * d_b, ow, s), :]
                        acc = acc + jnp.dot(
                            win.reshape(m, cin), w_ref[3 * kh + kw],
                            preferred_element_type=jnp.float32)
                outs.append(acc)
            y = jnp.maximum(jnp.concatenate(outs, axis=-1) + b_ref[...], 0.0)

        # ---- GlobalAvgPool (as an MXU matmul) + FC stack + output Linear ----
        h = jnp.dot(pool[...], y, preferred_element_type=jnp.float32)
        for w_ref, bb_ref in fcs:
            h = jnp.maximum(
                jnp.dot(h, w_ref[...], preferred_element_type=jnp.float32)
                + bb_ref[...], 0.0)
        o_ref[...] = (jnp.dot(h, w_out[...], preferred_element_type=jnp.float32)
                      + b_out[...])

    return kernel


def make_forward(cfg, compute_dtype=jnp.float32):
    """branch == 'all', 2D mode, eval-mode BN.  Returns a jitted forward."""
    L = cfg["layers"]
    n_fc = cfg["fc_layers"]
    stride_cfg = cfg["stride"]

    @jax.jit
    def forward(params, x_nchw):
        n, _, h, w = x_nchw.shape
        x = jnp.transpose(x_nchw, (0, 2, 3, 1)).astype(compute_dtype)  # NHWC

        # static per-layer plan (trace time)
        plan, oh, ow, in_ch = [], h, w, x.shape[-1]
        for i in range(L):
            s = 1 if i == 0 else stride_cfg
            b_ch = params["conv"][i]["w1"].shape[-1]
            oh_o, ow_o = (oh - 1) // s + 1, (ow - 1) // s + 1
            plan.append(dict(stride=s, cin=in_ch, bch=b_ch, ih=oh, iw=ow,
                             oh=oh_o, ow=ow_o, pad=max(1, DIL)))
            oh, ow, in_ch = oh_o, ow_o, 2 * b_ch

        # wrapper-side im2col for the FIRST layer only (tiny, XLA-fused)
        p0 = plan[0]
        pat1 = im2col(x, 3, p0["stride"], 1, 1)
        pat2 = im2col(x, 3, p0["stride"], DIL, DIL)
        w0_1 = params["conv"][0]["w1"].reshape(9 * p0["cin"], p0["bch"])
        w0_2 = params["conv"][0]["w2"].reshape(9 * p0["cin"], p0["bch"])

        # GlobalAvgPool as a matmul: (N, N*OH_L*OW_L) block-averaging matrix
        last = plan[-1]
        hw_last = last["oh"] * last["ow"]
        pool = (jnp.repeat(jnp.eye(n, dtype=jnp.float32), hw_last, axis=1)
                / float(hw_last))

        operands = [pat1.astype(compute_dtype), pat2.astype(compute_dtype),
                    w0_1.astype(compute_dtype), w0_2.astype(compute_dtype),
                    params["conv"][0]["b"]]
        for i in range(1, L):
            operands += [params["conv"][i]["w1"].astype(compute_dtype),
                         params["conv"][i]["w2"].astype(compute_dtype),
                         params["conv"][i]["b"]]
        operands.append(pool)
        for w_fc, b_fc in params["fc"]:
            operands += [w_fc, b_fc]
        operands += [params["out"][0], params["out"][1]]
        n_in = len(operands)
        embed = params["out"][0].shape[1]

        # one padded VMEM canvas per inner conv layer (a few hundred KB total)
        scratch = [pltpu.VMEM((n, plan[i]["ih"] + 2 * plan[i]["pad"],
                               plan[i]["iw"] + 2 * plan[i]["pad"],
                               plan[i]["cin"]), compute_dtype)
                   for i in range(1, L)]

        kernel = _make_kernel(plan, n, n_fc, n_in, compute_dtype)

        return pl.pallas_call(
            kernel,
            out_shape=jax.ShapeDtypeStruct((n, embed), jnp.float32),
            grid=(1,),
            in_specs=[_full_spec(op.shape) for op in operands],
            out_specs=_full_spec((n, embed)),
            scratch_shapes=scratch,
            compiler_params=pltpu.CompilerParams(
                dimension_semantics=("arbitrary",)),
        )(*operands)

    return forward


# ----------------------------------------------------------------------------
# pure-JAX (XLA) reference with the same folded-BN parameters
# ----------------------------------------------------------------------------
def reference_forward(params, x_nchw, cfg):
    hi = jax.lax.Precision.HIGHEST
    x = x_nchw
    for i, blk in enumerate(params["conv"]):
        s = 1 if i == 0 else cfg["stride"]
        outs = []
        for w_tap, pad, d in ((blk["w1"], 1, 1), (blk["w2"], DIL, DIL)):
            cin, bch = w_tap.shape[1], w_tap.shape[2]
            w_oihw = jnp.transpose(w_tap.reshape(3, 3, cin, bch), (3, 2, 0, 1))
            outs.append(jax.lax.conv_general_dilated(
                x, w_oihw, window_strides=(s, s),
                padding=((pad, pad), (pad, pad)), rhs_dilation=(d, d),
                dimension_numbers=("NCHW", "OIHW", "NCHW"), precision=hi))
        x = jnp.maximum(jnp.concatenate(outs, axis=1)
                        + blk["b"].reshape(1, -1, 1, 1), 0.0)
    h = jnp.mean(x, axis=(2, 3))
    for w, b in params["fc"]:
        h = jnp.maximum(jnp.dot(h, w, precision=hi) + b, 0.0)
    return jnp.dot(h, params["out"][0], precision=hi) + params["out"][1]


# ----------------------------------------------------------------------------
if __name__ == "__main__":
    cfg = {
        "n_filters": 4,
        "layers": 2,
        "stride": 2,
        "branch": "all",
        "activation": "relu",
        "hidden_dim": 32,
        "embed_dim": 8,
        "fc_layers": 2,
    }
    key = jax.random.PRNGKey(0)
    k_par, k_in = jax.random.split(key)
    params = build_params(k_par, cfg)
    forward = make_forward(cfg)                 # f32; bf16 available for larger configs

    # PyTorch-style NCHW input: batch=2, 1 channel (module fixes in_channels=1), 16x16
    x = jax.random.normal(k_in, (2, 1, 16, 16), jnp.float32)

    out = jax.block_until_ready(forward(params, x))
    assert out.shape == (2, cfg["embed_dim"])
    assert bool(jnp.all(jnp.isfinite(out)))

    ref = reference_forward(params, x, cfg)
    err = float(jnp.max(jnp.abs(out - ref)))
    assert err < 5e-3, f"mismatch vs reference: {err}"

    print("KERNEL_OK")
</pallas_src>

<mosaic_0001>
module attributes {stable_mosaic.version = 11 : i64} {
  func.func @kernel(%arg0: i32, %arg1: memref<512x9xf32, #tpu.memory_space<vmem>>, %arg2: memref<512x9xf32, #tpu.memory_space<vmem>>, %arg3: memref<9x2xf32, #tpu.memory_space<vmem>>, %arg4: memref<9x2xf32, #tpu.memory_space<vmem>>, %arg5: memref<1x4xf32, #tpu.memory_space<vmem>>, %arg6: memref<9x4x4xf32, #tpu.memory_space<vmem>>, %arg7: memref<9x4x4xf32, #tpu.memory_space<vmem>>, %arg8: memref<1x8xf32, #tpu.memory_space<vmem>>, %arg9: memref<2x128xf32, #tpu.memory_space<vmem>>, %arg10: memref<8x32xf32, #tpu.memory_space<vmem>>, %arg11: memref<1x32xf32, #tpu.memory_space<vmem>>, %arg12: memref<32x32xf32, #tpu.memory_space<vmem>>, %arg13: memref<1x32xf32, #tpu.memory_space<vmem>>, %arg14: memref<32x8xf32, #tpu.memory_space<vmem>>, %arg15: memref<1x8xf32, #tpu.memory_space<vmem>>, %arg16: memref<2x8xf32, #tpu.memory_space<vmem>>, %arg17: memref<2x20x20x4xf32, #tpu.memory_space<vmem>>) attributes {dimension_semantics = [#tpu.dimension_semantics<arbitrary>], iteration_bounds = array<i64: 1>, scalar_prefetch = 0 : i64, scratch_operands = 1 : i64, tpu.core_type = #tpu.core_type<tc>, window_params = [{pipeline_mode = #tpu.pipeline_mode<synchronous>, transform_indices = @transform_0, window_bounds = array<i64: 512, 9>}, {pipeline_mode = #tpu.pipeline_mode<synchronous>, transform_indices = @transform_1, window_bounds = array<i64: 512, 9>}, {pipeline_mode = #tpu.pipeline_mode<synchronous>, transform_indices = @transform_2, window_bounds = array<i64: 9, 2>}, {pipeline_mode = #tpu.pipeline_mode<synchronous>, transform_indices = @transform_3, window_bounds = array<i64: 9, 2>}, {pipeline_mode = #tpu.pipeline_mode<synchronous>, transform_indices = @transform_4, window_bounds = array<i64: 1, 4>}, {pipeline_mode = #tpu.pipeline_mode<synchronous>, transform_indices = @transform_5, window_bounds = array<i64: 9, 4, 4>}, {pipeline_mode = #tpu.pipeline_mode<synchronous>, transform_indices = @transform_6, window_bounds = array<i64: 9, 4, 4>}, {pipeline_mode = #tpu.pipeline_mode<synchronous>, transform_indices = @transform_7, window_bounds = array<i64: 1, 8>}, {pipeline_mode = #tpu.pipeline_mode<synchronous>, transform_indices = @transform_8, window_bounds = array<i64: 2, 128>}, {pipeline_mode = #tpu.pipeline_mode<synchronous>, transform_indices = @transform_9, window_bounds = array<i64: 8, 32>}, {pipeline_mode = #tpu.pipeline_mode<synchronous>, transform_indices = @transform_10, window_bounds = array<i64: 1, 32>}, {pipeline_mode = #tpu.pipeline_mode<synchronous>, transform_indices = @transform_11, window_bounds = array<i64: 32, 32>}, {pipeline_mode = #tpu.pipeline_mode<synchronous>, transform_indices = @transform_12, window_bounds = array<i64: 1, 32>}, {pipeline_mode = #tpu.pipeline_mode<synchronous>, transform_indices = @transform_13, window_bounds = array<i64: 32, 8>}, {pipeline_mode = #tpu.pipeline_mode<synchronous>, transform_indices = @transform_14, window_bounds = array<i64: 1, 8>}, {pipeline_mode = #tpu.pipeline_mode<synchronous>, transform_indices = @transform_15, window_bounds = array<i64: 2, 8>}]} {
    %c0 = arith.constant 0 : index
    %c0_0 = arith.constant 0 : index
    %0 = vector.load %arg1[%c0, %c0_0] : memref<512x9xf32, #tpu.memory_space<vmem>>, vector<512x9xf32>
    %c0_1 = arith.constant 0 : index
    %c0_2 = arith.constant 0 : index
    %1 = vector.load %arg3[%c0_1, %c0_2] : memref<9x2xf32, #tpu.memory_space<vmem>>, vector<9x2xf32>
    %cst = arith.constant dense<0.000000e+00> : vector<512x2xf32>
    %2 = tpu.matmul %0, %1, %cst {dimension_numbers = #tpu.dot_dimension_numbers<[1], [0], [0], [1], [0, 0, 1, 1], [], []>} : vector<512x9xf32>, vector<9x2xf32>, vector<512x2xf32> -> vector<512x2xf32>
    %c0_3 = arith.constant 0 : index
    %c0_4 = arith.constant 0 : index
    %3 = vector.load %arg2[%c0_3, %c0_4] : memref<512x9xf32, #tpu.memory_space<vmem>>, vector<512x9xf32>
    %c0_5 = arith.constant 0 : index
    %c0_6 = arith.constant 0 : index
    %4 = vector.load %arg4[%c0_5, %c0_6] : memref<9x2xf32, #tpu.memory_space<vmem>>, vector<9x2xf32>
    %cst_7 = arith.constant dense<0.000000e+00> : vector<512x2xf32>
    %5 = tpu.matmul %3, %4, %cst_7 {dimension_numbers = #tpu.dot_dimension_numbers<[1], [0], [0], [1], [0, 0, 1, 1], [], []>} : vector<512x9xf32>, vector<9x2xf32>, vector<512x2xf32> -> vector<512x2xf32>
    %6 = tpu.concatenate %2, %5 in 1 : vector<512x2xf32>, vector<512x2xf32> -> vector<512x4xf32>
    %c0_8 = arith.constant 0 : index
    %c0_9 = arith.constant 0 : index
    %7 = vector.load %arg5[%c0_8, %c0_9] : memref<1x4xf32, #tpu.memory_space<vmem>>, vector<1x4xf32>
    %8 = vector.broadcast %7 : vector<1x4xf32> to vector<512x4xf32>
    %9 = arith.addf %6, %8 : vector<512x4xf32>
    %cst_10 = arith.constant 0.000000e+00 : f32
    %10 = vector.broadcast %cst_10 : f32 to vector<512x4xf32>
    %11 = arith.maximumf %9, %10 : vector<512x4xf32>
    %cst_11 = arith.constant 0.000000e+00 : f32
    %12 = vector.broadcast %cst_11 : f32 to vector<2x20x20x4xf32>
    %c0_12 = arith.constant 0 : index
    %c0_13 = arith.constant 0 : index
    %c0_14 = arith.constant 0 : index
    %c0_15 = arith.constant 0 : index
    %13 = vector.load %arg17[%c0_12, %c0_13, %c0_14, %c0_15] : memref<2x20x20x4xf32, #tpu.memory_space<vmem>>, vector<2x20x20x4xf32>
    tpu.vector_store %arg17[%c0_12, %c0_13, %c0_14, %c0_15], %12 {strides = array<i32>} : memref<2x20x20x4xf32, #tpu.memory_space<vmem>>, vector<2x20x20x4xf32>,
    %14 = vector.shape_cast %11 : vector<512x4xf32> to vector<2x16x16x4xf32>
    %c0_16 = arith.constant 0 : index
    %c2 = arith.constant 2 : index
    %c2_17 = arith.constant 2 : index
    %c0_18 = arith.constant 0 : index
    %15 = vector.load %arg17[%c0_16, %c2, %c2_17, %c0_18] : memref<2x20x20x4xf32, #tpu.memory_space<vmem>>, vector<2x16x16x4xf32>
    tpu.vector_store %arg17[%c0_16, %c2, %c2_17, %c0_18], %14 {strides = array<i32>} : memref<2x20x20x4xf32, #tpu.memory_space<vmem>>, vector<2x16x16x4xf32>,
    %cst_19 = arith.constant 0.000000e+00 : f32
    %16 = vector.broadcast %cst_19 : f32 to vector<128x4xf32>
    %c0_20 = arith.constant 0 : index
    %c1 = arith.constant 1 : index
    %c1_21 = arith.constant 1 : index
    %c0_22 = arith.constant 0 : index
    %17 = tpu.strided_load %arg17[%c0_20, %c1, %c1_21, %c0_22] {strides = array<i32: 1, 2, 2, 1>} : memref<2x20x20x4xf32, #tpu.memory_space<vmem>>, vector<2x8x8x4xf32>
    %18 = vector.shape_cast %17 : vector<2x8x8x4xf32> to vector<128x4xf32>
    %c0_23 = arith.constant 0 : index
    %c0_24 = arith.constant 0 : index
    %c0_25 = arith.constant 0 : index
    %19 = vector.load %arg6[%c0_23, %c0_24, %c0_25] : memref<9x4x4xf32, #tpu.memory_space<vmem>>, vector<1x4x4xf32>
    %20 = vector.shape_cast %19 : vector<1x4x4xf32> to vector<4x4xf32>
    %cst_26 = arith.constant dense<0.000000e+00> : vector<128x4xf32>
    %21 = tpu.matmul %18, %20, %cst_26 {dimension_numbers = #tpu.dot_dimension_numbers<[1], [0], [0], [1], [0, 0, 1, 1], [], []>} : vector<128x4xf32>, vector<4x4xf32>, vector<128x4xf32> -> vector<128x4xf32>
    %22 = arith.addf %16, %21 : vector<128x4xf32>
    %c0_27 = arith.constant 0 : index
    %c1_28 = arith.constant 1 : index
    %c2_29 = arith.constant 2 : index
    %c0_30 = arith.constant 0 : index
    %23 = tpu.strided_load %arg17[%c0_27, %c1_28, %c2_29, %c0_30] {strides = array<i32: 1, 2, 2, 1>} : memref<2x20x20x4xf32, #tpu.memory_space<vmem>>, vector<2x8x8x4xf32>
    %24 = vector.shape_cast %23 : vector<2x8x8x4xf32> to vector<128x4xf32>
    %c1_31 = arith.constant 1 : index
    %c0_32 = arith.constant 0 : index
    %c0_33 = arith.constant 0 : index
    %25 = vector.load %arg6[%c1_31, %c0_32, %c0_33] : memref<9x4x4xf32, #tpu.memory_space<vmem>>, vector<1x4x4xf32>
    %26 = vector.shape_cast %25 : vector<1x4x4xf32> to vector<4x4xf32>
    %cst_34 = arith.constant dense<0.000000e+00> : vector<128x4xf32>
    %27 = tpu.matmul %24, %26, %cst_34 {dimension_numbers = #tpu.dot_dimension_numbers<[1], [0], [0], [1], [0, 0, 1, 1], [], []>} : vector<128x4xf32>, vector<4x4xf32>, vector<128x4xf32> -> vector<128x4xf32>
    %28 = arith.addf %22, %27 : vector<128x4xf32>
    %c0_35 = arith.constant 0 : index
    %c1_36 = arith.constant 1 : index
    %c3 = arith.constant 3 : index
    %c0_37 = arith.constant 0 : index
    %29 = tpu.strided_load %arg17[%c0_35, %c1_36, %c3, %c0_37] {strides = array<i32: 1, 2, 2, 1>} : memref<2x20x20x4xf32, #tpu.memory_space<vmem>>, vector<2x8x8x4xf32>
    %30 = vector.shape_cast %29 : vector<2x8x8x4xf32> to vector<128x4xf32>
    %c2_38 = arith.constant 2 : index
    %c0_39 = arith.constant 0 : index
    %c0_40 = arith.constant 0 : index
    %31 = vector.load %arg6[%c2_38, %c0_39, %c0_40] : memref<9x4x4xf32, #tpu.memory_space<vmem>>, vector<1x4x4xf32>
    %32 = vector.shape_cast %31 : vector<1x4x4xf32> to vector<4x4xf32>
    %cst_41 = arith.constant dense<0.000000e+00> : vector<128x4xf32>
    %33 = tpu.matmul %30, %32, %cst_41 {dimension_numbers = #tpu.dot_dimension_numbers<[1], [0], [0], [1], [0, 0, 1, 1], [], []>} : vector<128x4xf32>, vector<4x4xf32>, vector<128x4xf32> -> vector<128x4xf32>
    %34 = arith.addf %28, %33 : vector<128x4xf32>
    %c0_42 = arith.constant 0 : index
    %c2_43 = arith.constant 2 : index
    %c1_44 = arith.constant 1 : index
    %c0_45 = arith.constant 0 : index
    %35 = tpu.strided_load %arg17[%c0_42, %c2_43, %c1_44, %c0_45] {strides = array<i32: 1, 2, 2, 1>} : memref<2x20x20x4xf32, #tpu.memory_space<vmem>>, vector<2x8x8x4xf32>
    %36 = vector.shape_cast %35 : vector<2x8x8x4xf32> to vector<128x4xf32>
    %c3_46 = arith.constant 3 : index
    %c0_47 = arith.constant 0 : index
    %c0_48 = arith.constant 0 : index
    %37 = vector.load %arg6[%c3_46, %c0_47, %c0_48] : memref<9x4x4xf32, #tpu.memory_space<vmem>>, vector<1x4x4xf32>
    %38 = vector.shape_cast %37 : vector<1x4x4xf32> to vector<4x4xf32>
    %cst_49 = arith.constant dense<0.000000e+00> : vector<128x4xf32>
    %39 = tpu.matmul %36, %38, %cst_49 {dimension_numbers = #tpu.dot_dimension_numbers<[1], [0], [0], [1], [0, 0, 1, 1], [], []>} : vector<128x4xf32>, vector<4x4xf32>, vector<128x4xf32> -> vector<128x4xf32>
    %40 = arith.addf %34, %39 : vector<128x4xf32>
    %c0_50 = arith.constant 0 : index
    %c2_51 = arith.constant 2 : index
    %c2_52 = arith.constant 2 : index
    %c0_53 = arith.constant 0 : index
    %41 = tpu.strided_load %arg17[%c0_50, %c2_51, %c2_52, %c0_53] {strides = array<i32: 1, 2, 2, 1>} : memref<2x20x20x4xf32, #tpu.memory_space<vmem>>, vector<2x8x8x4xf32>
    %42 = vector.shape_cast %41 : vector<2x8x8x4xf32> to vector<128x4xf32>
    %c4 = arith.constant 4 : index
    %c0_54 = arith.constant 0 : index
    %c0_55 = arith.constant 0 : index
    %43 = vector.load %arg6[%c4, %c0_54, %c0_55] : memref<9x4x4xf32, #tpu.memory_space<vmem>>, vector<1x4x4xf32>
    %44 = vector.shape_cast %43 : vector<1x4x4xf32> to vector<4x4xf32>
    %cst_56 = arith.constant dense<0.000000e+00> : vector<128x4xf32>
    %45 = tpu.matmul %42, %44, %cst_56 {dimension_numbers = #tpu.dot_dimension_numbers<[1], [0], [0], [1], [0, 0, 1, 1], [], []>} : vector<128x4xf32>, vector<4x4xf32>, vector<128x4xf32> -> vector<128x4xf32>
    %46 = arith.addf %40, %45 : vector<128x4xf32>
    %c0_57 = arith.constant 0 : index
    %c2_58 = arith.constant 2 : index
    %c3_59 = arith.constant 3 : index
    %c0_60 = arith.constant 0 : index
    %47 = tpu.strided_load %arg17[%c0_57, %c2_58, %c3_59, %c0_60] {strides = array<i32: 1, 2, 2, 1>} : memref<2x20x20x4xf32, #tpu.memory_space<vmem>>, vector<2x8x8x4xf32>
    %48 = vector.shape_cast %47 : vector<2x8x8x4xf32> to vector<128x4xf32>
    %c5 = arith.constant 5 : index
    %c0_61 = arith.constant 0 : index
    %c0_62 = arith.constant 0 : index
    %49 = vector.load %arg6[%c5, %c0_61, %c0_62] : memref<9x4x4xf32, #tpu.memory_space<vmem>>, vector<1x4x4xf32>
    %50 = vector.shape_cast %49 : vector<1x4x4xf32> to vector<4x4xf32>
    %cst_63 = arith.constant dense<0.000000e+00> : vector<128x4xf32>
    %51 = tpu.matmul %48, %50, %cst_63 {dimension_numbers = #tpu.dot_dimension_numbers<[1], [0], [0], [1], [0, 0, 1, 1], [], []>} : vector<128x4xf32>, vector<4x4xf32>, vector<128x4xf32> -> vector<128x4xf32>
    %52 = arith.addf %46, %51 : vector<128x4xf32>
    %c0_64 = arith.constant 0 : index
    %c3_65 = arith.constant 3 : index
    %c1_66 = arith.constant 1 : index
    %c0_67 = arith.constant 0 : index
    %53 = tpu.strided_load %arg17[%c0_64, %c3_65, %c1_66, %c0_67] {strides = array<i32: 1, 2, 2, 1>} : memref<2x20x20x4xf32, #tpu.memory_space<vmem>>, vector<2x8x8x4xf32>
    %54 = vector.shape_cast %53 : vector<2x8x8x4xf32> to vector<128x4xf32>
    %c6 = arith.constant 6 : index
    %c0_68 = arith.constant 0 : index
    %c0_69 = arith.constant 0 : index
    %55 = vector.load %arg6[%c6, %c0_68, %c0_69] : memref<9x4x4xf32, #tpu.memory_space<vmem>>, vector<1x4x4xf32>
    %56 = vector.shape_cast %55 : vector<1x4x4xf32> to vector<4x4xf32>
    %cst_70 = arith.constant dense<0.000000e+00> : vector<128x4xf32>
    %57 = tpu.matmul %54, %56, %cst_70 {dimension_numbers = #tpu.dot_dimension_numbers<[1], [0], [0], [1], [0, 0, 1, 1], [], []>} : vector<128x4xf32>, vector<4x4xf32>, vector<128x4xf32> -> vector<128x4xf32>
    %58 = arith.addf %52, %57 : vector<128x4xf32>
    %c0_71 = arith.constant 0 : index
    %c3_72 = arith.constant 3 : index
    %c2_73 = arith.constant 2 : index
    %c0_74 = arith.constant 0 : index
    %59 = tpu.strided_load %arg17[%c0_71, %c3_72, %c2_73, %c0_74] {strides = array<i32: 1, 2, 2, 1>} : memref<2x20x20x4xf32, #tpu.memory_space<vmem>>, vector<2x8x8x4xf32>
    %60 = vector.shape_cast %59 : vector<2x8x8x4xf32> to vector<128x4xf32>
    %c7 = arith.constant 7 : index
    %c0_75 = arith.constant 0 : index
    %c0_76 = arith.constant 0 : index
    %61 = vector.load %arg6[%c7, %c0_75, %c0_76] : memref<9x4x4xf32, #tpu.memory_space<vmem>>, vector<1x4x4xf32>
    %62 = vector.shape_cast %61 : vector<1x4x4xf32> to vector<4x4xf32>
    %cst_77 = arith.constant dense<0.000000e+00> : vector<128x4xf32>
    %63 = tpu.matmul %60, %62, %cst_77 {dimension_numbers = #tpu.dot_dimension_numbers<[1], [0], [0], [1], [0, 0, 1, 1], [], []>} : vector<128x4xf32>, vector<4x4xf32>, vector<128x4xf32> -> vector<128x4xf32>
    %64 = arith.addf %58, %63 : vector<128x4xf32>
    %c0_78 = arith.constant 0 : index
    %c3_79 = arith.constant 3 : index
    %c3_80 = arith.constant 3 : index
    %c0_81 = arith.constant 0 : index
    %65 = tpu.strided_load %arg17[%c0_78, %c3_79, %c3_80, %c0_81] {strides = array<i32: 1, 2, 2, 1>} : memref<2x20x20x4xf32, #tpu.memory_space<vmem>>, vector<2x8x8x4xf32>
    %66 = vector.shape_cast %65 : vector<2x8x8x4xf32> to vector<128x4xf32>
    %c8 = arith.constant 8 : index
    %c0_82 = arith.constant 0 : index
    %c0_83 = arith.constant 0 : index
    %67 = vector.load %arg6[%c8, %c0_82, %c0_83] : memref<9x4x4xf32, #tpu.memory_space<vmem>>, vector<1x4x4xf32>
    %68 = vector.shape_cast %67 : vector<1x4x4xf32> to vector<4x4xf32>
    %cst_84 = arith.constant dense<0.000000e+00> : vector<128x4xf32>
    %69 = tpu.matmul %66, %68, %cst_84 {dimension_numbers = #tpu.dot_dimension_numbers<[1], [0], [0], [1], [0, 0, 1, 1], [], []>} : vector<128x4xf32>, vector<4x4xf32>, vector<128x4xf32> -> vector<128x4xf32>
    %70 = arith.addf %64, %69 : vector<128x4xf32>
    %cst_85 = arith.constant 0.000000e+00 : f32
    %71 = vector.broadcast %cst_85 : f32 to vector<128x4xf32>
    %c0_86 = arith.constant 0 : index
    %c0_87 = arith.constant 0 : index
    %c0_88 = arith.constant 0 : index
    %c0_89 = arith.constant 0 : index
    %72 = tpu.strided_load %arg17[%c0_86, %c0_87, %c0_88, %c0_89] {strides = array<i32: 1, 2, 2, 1>} : memref<2x20x20x4xf32, #tpu.memory_space<vmem>>, vector<2x8x8x4xf32>
    %73 = vector.shape_cast %72 : vector<2x8x8x4xf32> to vector<128x4xf32>
    %c0_90 = arith.constant 0 : index
    %c0_91 = arith.constant 0 : index
    %c0_92 = arith.constant 0 : index
    %74 = vector.load %arg7[%c0_90, %c0_91, %c0_92] : memref<9x4x4xf32, #tpu.memory_space<vmem>>, vector<1x4x4xf32>
    %75 = vector.shape_cast %74 : vector<1x4x4xf32> to vector<4x4xf32>
    %cst_93 = arith.constant dense<0.000000e+00> : vector<128x4xf32>
    %76 = tpu.matmul %73, %75, %cst_93 {dimension_numbers = #tpu.dot_dimension_numbers<[1], [0], [0], [1], [0, 0, 1, 1], [], []>} : vector<128x4xf32>, vector<4x4xf32>, vector<128x4xf32> -> vector<128x4xf32>
    %77 = arith.addf %71, %76 : vector<128x4xf32>
    %c0_94 = arith.constant 0 : index
    %c0_95 = arith.constant 0 : index
    %c2_96 = arith.constant 2 : index
    %c0_97 = arith.constant 0 : index
    %78 = tpu.strided_load %arg17[%c0_94, %c0_95, %c2_96, %c0_97] {strides = array<i32: 1, 2, 2, 1>} : memref<2x20x20x4xf32, #tpu.memory_space<vmem>>, vector<2x8x8x4xf32>
    %79 = vector.shape_cast %78 : vector<2x8x8x4xf32> to vector<128x4xf32>
    %c1_98 = arith.constant 1 : index
    %c0_99 = arith.constant 0 : index
    %c0_100 = arith.constant 0 : index
    %80 = vector.load %arg7[%c1_98, %c0_99, %c0_100] : memref<9x4x4xf32, #tpu.memory_space<vmem>>, vector<1x4x4xf32>
    %81 = vector.shape_cast %80 : vector<1x4x4xf32> to vector<4x4xf32>
    %cst_101 = arith.constant dense<0.000000e+00> : vector<128x4xf32>
    %82 = tpu.matmul %79, %81, %cst_101 {dimension_numbers = #tpu.dot_dimension_numbers<[1], [0], [0], [1], [0, 0, 1, 1], [], []>} : vector<128x4xf32>, vector<4x4xf32>, vector<128x4xf32> -> vector<128x4xf32>
    %83 = arith.addf %77, %82 : vector<128x4xf32>
    %c0_102 = arith.constant 0 : index
    %c0_103 = arith.constant 0 : index
    %c4_104 = arith.constant 4 : index
    %c0_105 = arith.constant 0 : index
    %84 = tpu.strided_load %arg17[%c0_102, %c0_103, %c4_104, %c0_105] {strides = array<i32: 1, 2, 2, 1>} : memref<2x20x20x4xf32, #tpu.memory_space<vmem>>, vector<2x8x8x4xf32>
    %85 = vector.shape_cast %84 : vector<2x8x8x4xf32> to vector<128x4xf32>
    %c2_106 = arith.constant 2 : index
    %c0_107 = arith.constant 0 : index
    %c0_108 = arith.constant 0 : index
    %86 = vector.load %arg7[%c2_106, %c0_107, %c0_108] : memref<9x4x4xf32, #tpu.memory_space<vmem>>, vector<1x4x4xf32>
    %87 = vector.shape_cast %86 : vector<1x4x4xf32> to vector<4x4xf32>
    %cst_109 = arith.constant dense<0.000000e+00> : vector<128x4xf32>
    %88 = tpu.matmul %85, %87, %cst_109 {dimension_numbers = #tpu.dot_dimension_numbers<[1], [0], [0], [1], [0, 0, 1, 1], [], []>} : vector<128x4xf32>, vector<4x4xf32>, vector<128x4xf32> -> vector<128x4xf32>
    %89 = arith.addf %83, %88 : vector<128x4xf32>
    %c0_110 = arith.constant 0 : index
    %c2_111 = arith.constant 2 : index
    %c0_112 = arith.constant 0 : index
    %c0_113 = arith.constant 0 : index
    %90 = tpu.strided_load %arg17[%c0_110, %c2_111, %c0_112, %c0_113] {strides = array<i32: 1, 2, 2, 1>} : memref<2x20x20x4xf32, #tpu.memory_space<vmem>>, vector<2x8x8x4xf32>
    %91 = vector.shape_cast %90 : vector<2x8x8x4xf32> to vector<128x4xf32>
    %c3_114 = arith.constant 3 : index
    %c0_115 = arith.constant 0 : index
    %c0_116 = arith.constant 0 : index
    %92 = vector.load %arg7[%c3_114, %c0_115, %c0_116] : memref<9x4x4xf32, #tpu.memory_space<vmem>>, vector<1x4x4xf32>
    %93 = vector.shape_cast %92 : vector<1x4x4xf32> to vector<4x4xf32>
    %cst_117 = arith.constant dense<0.000000e+00> : vector<128x4xf32>
    %94 = tpu.matmul %91, %93, %cst_117 {dimension_numbers = #tpu.dot_dimension_numbers<[1], [0], [0], [1], [0, 0, 1, 1], [], []>} : vector<128x4xf32>, vector<4x4xf32>, vector<128x4xf32> -> vector<128x4xf32>
    %95 = arith.addf %89, %94 : vector<128x4xf32>
    %c0_118 = arith.constant 0 : index
    %c2_119 = arith.constant 2 : index
    %c2_120 = arith.constant 2 : index
    %c0_121 = arith.constant 0 : index
    %96 = tpu.strided_load %arg17[%c0_118, %c2_119, %c2_120, %c0_121] {strides = array<i32: 1, 2, 2, 1>} : memref<2x20x20x4xf32, #tpu.memory_space<vmem>>, vector<2x8x8x4xf32>
    %97 = vector.shape_cast %96 : vector<2x8x8x4xf32> to vector<128x4xf32>
    %c4_122 = arith.constant 4 : index
    %c0_123 = arith.constant 0 : index
    %c0_124 = arith.constant 0 : index
    %98 = vector.load %arg7[%c4_122, %c0_123, %c0_124] : memref<9x4x4xf32, #tpu.memory_space<vmem>>, vector<1x4x4xf32>
    %99 = vector.shape_cast %98 : vector<1x4x4xf32> to vector<4x4xf32>
    %cst_125 = arith.constant dense<0.000000e+00> : vector<128x4xf32>
    %100 = tpu.matmul %97, %99, %cst_125 {dimension_numbers = #tpu.dot_dimension_numbers<[1], [0], [0], [1], [0, 0, 1, 1], [], []>} : vector<128x4xf32>, vector<4x4xf32>, vector<128x4xf32> -> vector<128x4xf32>
    %101 = arith.addf %95, %100 : vector<128x4xf32>
    %c0_126 = arith.constant 0 : index
    %c2_127 = arith.constant 2 : index
    %c4_128 = arith.constant 4 : index
    %c0_129 = arith.constant 0 : index
    %102 = tpu.strided_load %arg17[%c0_126, %c2_127, %c4_128, %c0_129] {strides = array<i32: 1, 2, 2, 1>} : memref<2x20x20x4xf32, #tpu.memory_space<vmem>>, vector<2x8x8x4xf32>
    %103 = vector.shape_cast %102 : vector<2x8x8x4xf32> to vector<128x4xf32>
    %c5_130 = arith.constant 5 : index
    %c0_131 = arith.constant 0 : index
    %c0_132 = arith.constant 0 : index
    %104 = vector.load %arg7[%c5_130, %c0_131, %c0_132] : memref<9x4x4xf32, #tpu.memory_space<vmem>>, vector<1x4x4xf32>
    %105 = vector.shape_cast %104 : vector<1x4x4xf32> to vector<4x4xf32>
    %cst_133 = arith.constant dense<0.000000e+00> : vector<128x4xf32>
    %106 = tpu.matmul %103, %105, %cst_133 {dimension_numbers = #tpu.dot_dimension_numbers<[1], [0], [0], [1], [0, 0, 1, 1], [], []>} : vector<128x4xf32>, vector<4x4xf32>, vector<128x4xf32> -> vector<128x4xf32>
    %107 = arith.addf %101, %106 : vector<128x4xf32>
    %c0_134 = arith.constant 0 : index
    %c4_135 = arith.constant 4 : index
    %c0_136 = arith.constant 0 : index
    %c0_137 = arith.constant 0 : index
    %108 = tpu.strided_load %arg17[%c0_134, %c4_135, %c0_136, %c0_137] {strides = array<i32: 1, 2, 2, 1>} : memref<2x20x20x4xf32, #tpu.memory_space<vmem>>, vector<2x8x8x4xf32>
    %109 = vector.shape_cast %108 : vector<2x8x8x4xf32> to vector<128x4xf32>
    %c6_138 = arith.constant 6 : index
    %c0_139 = arith.constant 0 : index
    %c0_140 = arith.constant 0 : index
    %110 = vector.load %arg7[%c6_138, %c0_139, %c0_140] : memref<9x4x4xf32, #tpu.memory_space<vmem>>, vector<1x4x4xf32>
    %111 = vector.shape_cast %110 : vector<1x4x4xf32> to vector<4x4xf32>
    %cst_141 = arith.constant dense<0.000000e+00> : vector<128x4xf32>
    %112 = tpu.matmul %109, %111, %cst_141 {dimension_numbers = #tpu.dot_dimension_numbers<[1], [0], [0], [1], [0, 0, 1, 1], [], []>} : vector<128x4xf32>, vector<4x4xf32>, vector<128x4xf32> -> vector<128x4xf32>
    %113 = arith.addf %107, %112 : vector<128x4xf32>
    %c0_142 = arith.constant 0 : index
    %c4_143 = arith.constant 4 : index
    %c2_144 = arith.constant 2 : index
    %c0_145 = arith.constant 0 : index
    %114 = tpu.strided_load %arg17[%c0_142, %c4_143, %c2_144, %c0_145] {strides = array<i32: 1, 2, 2, 1>} : memref<2x20x20x4xf32, #tpu.memory_space<vmem>>, vector<2x8x8x4xf32>
    %115 = vector.shape_cast %114 : vector<2x8x8x4xf32> to vector<128x4xf32>
    %c7_146 = arith.constant 7 : index
    %c0_147 = arith.constant 0 : index
    %c0_148 = arith.constant 0 : index
    %116 = vector.load %arg7[%c7_146, %c0_147, %c0_148] : memref<9x4x4xf32, #tpu.memory_space<vmem>>, vector<1x4x4xf32>
    %117 = vector.shape_cast %116 : vector<1x4x4xf32> to vector<4x4xf32>
    %cst_149 = arith.constant dense<0.000000e+00> : vector<128x4xf32>
    %118 = tpu.matmul %115, %117, %cst_149 {dimension_numbers = #tpu.dot_dimension_numbers<[1], [0], [0], [1], [0, 0, 1, 1], [], []>} : vector<128x4xf32>, vector<4x4xf32>, vector<128x4xf32> -> vector<128x4xf32>
    %119 = arith.addf %113, %118 : vector<128x4xf32>
    %c0_150 = arith.constant 0 : index
    %c4_151 = arith.constant 4 : index
    %c4_152 = arith.constant 4 : index
    %c0_153 = arith.constant 0 : index
    %120 = tpu.strided_load %arg17[%c0_150, %c4_151, %c4_152, %c0_153] {strides = array<i32: 1, 2, 2, 1>} : memref<2x20x20x4xf32, #tpu.memory_space<vmem>>, vector<2x8x8x4xf32>
    %121 = vector.shape_cast %120 : vector<2x8x8x4xf32> to vector<128x4xf32>
    %c8_154 = arith.constant 8 : index
    %c0_155 = arith.constant 0 : index
    %c0_156 = arith.constant 0 : index
    %122 = vector.load %arg7[%c8_154, %c0_155, %c0_156] : memref<9x4x4xf32, #tpu.memory_space<vmem>>, vector<1x4x4xf32>
    %123 = vector.shape_cast %122 : vector<1x4x4xf32> to vector<4x4xf32>
    %cst_157 = arith.constant dense<0.000000e+00> : vector<128x4xf32>
    %124 = tpu.matmul %121, %123, %cst_157 {dimension_numbers = #tpu.dot_dimension_numbers<[1], [0], [0], [1], [0, 0, 1, 1], [], []>} : vector<128x4xf32>, vector<4x4xf32>, vector<128x4xf32> -> vector<128x4xf32>
    %125 = arith.addf %119, %124 : vector<128x4xf32>
    %126 = tpu.concatenate %70, %125 in 1 : vector<128x4xf32>, vector<128x4xf32> -> vector<128x8xf32>
    %c0_158 = arith.constant 0 : index
    %c0_159 = arith.constant 0 : index
    %127 = vector.load %arg8[%c0_158, %c0_159] : memref<1x8xf32, #tpu.memory_space<vmem>>, vector<1x8xf32>
    %128 = vector.broadcast %127 : vector<1x8xf32> to vector<128x8xf32>
    %129 = arith.addf %126, %128 : vector<128x8xf32>
    %cst_160 = arith.constant 0.000000e+00 : f32
    %130 = vector.broadcast %cst_160 : f32 to vector<128x8xf32>
    %131 = arith.maximumf %129, %130 : vector<128x8xf32>
    %c0_161 = arith.constant 0 : index
    %c0_162 = arith.constant 0 : index
    %132 = vector.load %arg9[%c0_161, %c0_162] : memref<2x128xf32, #tpu.memory_space<vmem>>, vector<2x128xf32>
    %cst_163 = arith.constant dense<0.000000e+00> : vector<2x8xf32>
    %133 = tpu.matmul %132, %131, %cst_163 {dimension_numbers = #tpu.dot_dimension_numbers<[1], [0], [0], [1], [0, 0, 1, 1], [], []>} : vector<2x128xf32>, vector<128x8xf32>, vector<2x8xf32> -> vector<2x8xf32>
    %c0_164 = arith.constant 0 : index
    %c0_165 = arith.constant 0 : index
    %134 = vector.load %arg10[%c0_164, %c0_165] : memref<8x32xf32, #tpu.memory_space<vmem>>, vector<8x32xf32>
    %cst_166 = arith.constant dense<0.000000e+00> : vector<2x32xf32>
    %135 = tpu.matmul %133, %134, %cst_166 {dimension_numbers = #tpu.dot_dimension_numbers<[1], [0], [0], [1], [0, 0, 1, 1], [], []>} : vector<2x8xf32>, vector<8x32xf32>, vector<2x32xf32> -> vector<2x32xf32>
    %c0_167 = arith.constant 0 : index
    %c0_168 = arith.constant 0 : index
    %136 = vector.load %arg11[%c0_167, %c0_168] : memref<1x32xf32, #tpu.memory_space<vmem>>, vector<1x32xf32>
    %137 = vector.broadcast %136 : vector<1x32xf32> to vector<2x32xf32>
    %138 = arith.addf %135, %137 : vector<2x32xf32>
    %cst_169 = arith.constant 0.000000e+00 : f32
    %139 = vector.broadcast %cst_169 : f32 to vector<2x32xf32>
    %140 = arith.maximumf %138, %139 : vector<2x32xf32>
    %c0_170 = arith.constant 0 : index
    %c0_171 = arith.constant 0 : index
    %141 = vector.load %arg12[%c0_170, %c0_171] : memref<32x32xf32, #tpu.memory_space<vmem>>, vector<32x32xf32>
    %cst_172 = arith.constant dense<0.000000e+00> : vector<2x32xf32>
    %142 = tpu.matmul %140, %141, %cst_172 {dimension_numbers = #tpu.dot_dimension_numbers<[1], [0], [0], [1], [0, 0, 1, 1], [], []>} : vector<2x32xf32>, vector<32x32xf32>, vector<2x32xf32> -> vector<2x32xf32>
    %c0_173 = arith.constant 0 : index
    %c0_174 = arith.constant 0 : index
    %143 = vector.load %arg13[%c0_173, %c0_174] : memref<1x32xf32, #tpu.memory_space<vmem>>, vector<1x32xf32>
    %144 = vector.broadcast %143 : vector<1x32xf32> to vector<2x32xf32>
    %145 = arith.addf %142, %144 : vector<2x32xf32>
    %cst_175 = arith.constant 0.000000e+00 : f32
    %146 = vector.broadcast %cst_175 : f32 to vector<2x32xf32>
    %147 = arith.maximumf %145, %146 : vector<2x32xf32>
    %c0_176 = arith.constant 0 : index
    %c0_177 = arith.constant 0 : index
    %148 = vector.load %arg14[%c0_176, %c0_177] : memref<32x8xf32, #tpu.memory_space<vmem>>, vector<32x8xf32>
    %cst_178 = arith.constant dense<0.000000e+00> : vector<2x8xf32>
    %149 = tpu.matmul %147, %148, %cst_178 {dimension_numbers = #tpu.dot_dimension_numbers<[1], [0], [0], [1], [0, 0, 1, 1], [], []>} : vector<2x32xf32>, vector<32x8xf32>, vector<2x8xf32> -> vector<2x8xf32>
    %c0_179 = arith.constant 0 : index
    %c0_180 = arith.constant 0 : index
    %150 = vector.load %arg15[%c0_179, %c0_180] : memref<1x8xf32, #tpu.memory_space<vmem>>, vector<1x8xf32>
    %151 = vector.broadcast %150 : vector<1x8xf32> to vector<2x8xf32>
    %152 = arith.addf %149, %151 : vector<2x8xf32>
    %c0_181 = arith.constant 0 : index
    %c0_182 = arith.constant 0 : index
    %153 = vector.load %arg16[%c0_181, %c0_182] : memref<2x8xf32, #tpu.memory_space<vmem>>, vector<2x8xf32>
    tpu.vector_store %arg16[%c0_181, %c0_182], %152 {strides = array<i32>} : memref<2x8xf32, #tpu.memory_space<vmem>>, vector<2x8xf32>,
    return
  }
  func.func @transform_0(%arg0: i32) -> (i32, i32) {
    %c0_i32 = arith.constant 0 : i32
    %c0_i32_0 = arith.constant 0 : i32
    %c0_i32_1 = arith.constant 0 : i32
    return %c0_i32, %c0_i32_0 : i32, i32
  }
  func.func @transform_1(%arg0: i32) -> (i32, i32) {
    %c0_i32 = arith.constant 0 : i32
    %c0_i32_0 = arith.constant 0 : i32
    %c0_i32_1 = arith.constant 0 : i32
    return %c0_i32, %c0_i32_0 : i32, i32
  }
  func.func @transform_2(%arg0: i32) -> (i32, i32) {
    %c0_i32 = arith.constant 0 : i32
    %c0_i32_0 = arith.constant 0 : i32
    %c0_i32_1 = arith.constant 0 : i32
    return %c0_i32, %c0_i32_0 : i32, i32
  }
  func.func @transform_3(%arg0: i32) -> (i32, i32) {
    %c0_i32 = arith.constant 0 : i32
    %c0_i32_0 = arith.constant 0 : i32
    %c0_i32_1 = arith.constant 0 : i32
    return %c0_i32, %c0_i32_0 : i32, i32
  }
  func.func @transform_4(%arg0: i32) -> (i32, i32) {
    %c0_i32 = arith.constant 0 : i32
    %c0_i32_0 = arith.constant 0 : i32
    %c0_i32_1 = arith.constant 0 : i32
    return %c0_i32, %c0_i32_0 : i32, i32
  }
  func.func @transform_5(%arg0: i32) -> (i32, i32, i32) {
    %c0_i32 = arith.constant 0 : i32
    %c0_i32_0 = arith.constant 0 : i32
    %c0_i32_1 = arith.constant 0 : i32
    %c0_i32_2 = arith.constant 0 : i32
    return %c0_i32, %c0_i32_0, %c0_i32_1 : i32, i32, i32
  }
  func.func @transform_6(%arg0: i32) -> (i32, i32, i32) {
    %c0_i32 = arith.constant 0 : i32
    %c0_i32_0 = arith.constant 0 : i32
    %c0_i32_1 = arith.constant 0 : i32
    %c0_i32_2 = arith.constant 0 : i32
    return %c0_i32, %c0_i32_0, %c0_i32_1 : i32, i32, i32
  }
  func.func @transform_7(%arg0: i32) -> (i32, i32) {
    %c0_i32 = arith.constant 0 : i32
    %c0_i32_0 = arith.constant 0 : i32
    %c0_i32_1 = arith.constant 0 : i32
    return %c0_i32, %c0_i32_0 : i32, i32
  }
  func.func @transform_8(%arg0: i32) -> (i32, i32) {
    %c0_i32 = arith.constant 0 : i32
    %c0_i32_0 = arith.constant 0 : i32
    %c0_i32_1 = arith.constant 0 : i32
    return %c0_i32, %c0_i32_0 : i32, i32
  }
  func.func @transform_9(%arg0: i32) -> (i32, i32) {
    %c0_i32 = arith.constant 0 : i32
    %c0_i32_0 = arith.constant 0 : i32
    %c0_i32_1 = arith.constant 0 : i32
    return %c0_i32, %c0_i32_0 : i32, i32
  }
  func.func @transform_10(%arg0: i32) -> (i32, i32) {
    %c0_i32 = arith.constant 0 : i32
    %c0_i32_0 = arith.constant 0 : i32
    %c0_i32_1 = arith.constant 0 : i32
    return %c0_i32, %c0_i32_0 : i32, i32
  }
  func.func @transform_11(%arg0: i32) -> (i32, i32) {
    %c0_i32 = arith.constant 0 : i32
    %c0_i32_0 = arith.constant 0 : i32
    %c0_i32_1 = arith.constant 0 : i32
    return %c0_i32, %c0_i32_0 : i32, i32
  }
  func.func @transform_12(%arg0: i32) -> (i32, i32) {
    %c0_i32 = arith.constant 0 : i32
    %c0_i32_0 = arith.constant 0 : i32
    %c0_i32_1 = arith.constant 0 : i32
    return %c0_i32, %c0_i32_0 : i32, i32
  }
  func.func @transform_13(%arg0: i32) -> (i32, i32) {
    %c0_i32 = arith.constant 0 : i32
    %c0_i32_0 = arith.constant 0 : i32
    %c0_i32_1 = arith.constant 0 : i32
    return %c0_i32, %c0_i32_0 : i32, i32
  }
  func.func @transform_14(%arg0: i32) -> (i32, i32) {
    %c0_i32 = arith.constant 0 : i32
    %c0_i32_0 = arith.constant 0 : i32
    %c0_i32_1 = arith.constant 0 : i32
    return %c0_i32, %c0_i32_0 : i32, i32
  }
  func.func @transform_15(%arg0: i32) -> (i32, i32) {
    %c0_i32 = arith.constant 0 : i32
    %c0_i32_0 = arith.constant 0 : i32
    %c0_i32_1 = arith.constant 0 : i32
    return %c0_i32, %c0_i32_0 : i32, i32
  }
}

</mosaic_0001>

<bundles_post_ra>
// kernel: forward.1
= control target key start
LH: loop header
LB: loop body
LE: loop exit
PB: predicated region body
PF: predicated region fallthrough
CT: control target
= control target key end

     0   :  { %vm310_vm0 = vcmask 1040384   ;;  %vm117_vm1 = vcmask 72704   ;;  %s7778_s0 = inlined_call_operand.vmem [shape: f32[512,9], index: 0, kind: input, shape index: {}]   ;;  %s7779_s1 = inlined_call_operand.vmem [shape: f32[512,9], index: 1, kind: input, shape index: {}]   ;;  %s7780_s2 = inlined_call_operand.vmem [shape: f32[9,2], index: 2, kind: input, shape index: {}]   ;;  %s7781_s3 = inlined_call_operand.vmem [shape: f32[9,2], index: 3, kind: input, shape index: {}]   ;;  %s7782_s4 = inlined_call_operand.vmem [shape: f32[1,4], index: 4, kind: input, shape index: {}]   ;;  %s7783_s5 = inlined_call_operand.vmem [shape: f32[9,4,4], index: 5, kind: input, shape index: {}]   ;;  %s7784_s6 = inlined_call_operand.vmem [shape: f32[9,4,4], index: 6, kind: input, shape index: {}]   ;;  %s7785_s7 = inlined_call_operand.vmem [shape: f32[1,8], index: 7, kind: input, shape index: {}]   ;;  %s7786_s8 = inlined_call_operand.vmem [shape: f32[2,128], index: 8, kind: input, shape index: {}]   ;;  %s7787_s9 = inlined_call_operand.vmem [shape: f32[8,32], index: 9, kind: input, shape index: {}]   ;;  %s7788_s10 = inlined_call_operand.vmem [shape: f32[1,32], index: 10, kind: input, shape index: {}]   ;;  %s7789_s11 = inlined_call_operand.vmem [shape: f32[32,32], index: 11, kind: input, shape index: {}]   ;;  %s7790_s12 = inlined_call_operand.vmem [shape: f32[1,32], index: 12, kind: input, shape index: {}]   ;;  %s7791_s13 = inlined_call_operand.vmem [shape: f32[32,8], index: 13, kind: input, shape index: {}]   ;;  %s7792_s14 = inlined_call_operand.vmem [shape: f32[1,8], index: 14, kind: input, shape index: {}]   ;;  %s7793_s15 = inlined_call_operand.hbm [shape: f32[2,8], index: 15, kind: output, shape index: {}]  }
   0x1   :  { %v588_v0 = vld [vmem:[%s7781_s3 + $0x8] sm:$0x1]  ;;  %v587_v1 = vld [vmem:[%s7781_s3] sm:$0xff] }
   0x2   :  { %5012 = vmatpush.msk.msra.mxu1 %vm310_vm0, %v588_v0  ;;  %v523_v2 = vld [vmem:[%s7779_s1] sm:$0xff] }
   0x4   :  { %799 = vmatpush.msra.mxu1 %v587_v1 }
   0x5   :  { %5013 = vmatmul.msk.f32.vlgmr.msra.gmra.mxu1 %vm117_vm1, %v523_v2 }
   0x6   :  { %20 = vsyncpa [#allocation4], 0  ;;  %v524_v3 = vld [vmem:[%s7779_s1 + $0x8] sm:$0xff]  ;;  %v525_v4 = vld [vmem:[%s7779_s1 + $0x10] sm:$0xff]  ;;  %s5444_s30 = smov 2   ;;  %vm1446_vm2 = vcmask 31744  }
   0x7   :  { %v526_v5 = vld [vmem:[%s7779_s1 + $0x18] sm:$0xff]  ;;  %v527_v6 = vld [vmem:[%s7779_s1 + $0x20] sm:$0xff]  ;;  %v528_v7 = vld [vmem:[%s7779_s1 + $0x28] sm:$0xff]  ;;  %vm1249_vm3 = vcmask 15360   ;;  %vm1749_vm4 = vcmask 1043456   ;;  %vm1449_vm5 = vcmask 27648  }
   0x8   :  { %v529_v8 = vld [vmem:[%s7779_s1 + $0x30] sm:$0xff]  ;;  %v116_v9 = vld [vmem:[%s7780_s2 + $0x8] sm:$0x1]  ;;  %v530_v10 = vld [vmem:[%s7779_s1 + $0x38] sm:$0xff]  ;;  %vm4618_vm6 = vcmask 64512   ;;  %vm4651_vm7 = vcmask 261120  }
   0x9   :  { %4947 = vmatpush.msk.msra.mxu0 %vm310_vm0, %v116_v9  ;;  %v115_v11 = vld [vmem:[%s7780_s2] sm:$0xff]  ;;  %v52_v14 = vld [vmem:[%s7778_s0 + $0x8] sm:$0xff]  ;;  %v53_v16 = vld [vmem:[%s7778_s0 + $0x10] sm:$0xff]  ;;  %s5447_s22 = smov [#allocation3]   ;;  %vm4707_vm8 = vcmask 58368  }
   0xa   :  { %v51_v12 = vld [vmem:[%s7778_s0] sm:$0xff]  ;;  %v532_v15 = vld [vmem:[%s7779_s1 + $0x48] sm:$0xff]  ;;  %v533_v17 = vld [vmem:[%s7779_s1 + $0x50] sm:$0xff] }
   0xb   :  { %329 = vmatpush.msra.mxu0 %v115_v11  ;;  %v531_v13 = vld [vmem:[%s7779_s1 + $0x40] sm:$0xff]  ;;  %v54_v18 = vld [vmem:[%s7778_s0 + $0x18] sm:$0xff]  ;;  %v56_v22 = vld [vmem:[%s7778_s0 + $0x28] sm:$0xff] }
   0xc   :  { %4948 = vmatmul.msk.f32.vlgmr.msra.gmra.mxu0 %vm117_vm1, %v51_v12  ;;  %v534_v19 = vld [vmem:[%s7779_s1 + $0x58] sm:$0xff]  ;;  %v55_v20 = vld [vmem:[%s7778_s0 + $0x20] sm:$0xff]  ;;  %v536_v23 = vld [vmem:[%s7779_s1 + $0x68] sm:$0xff] }
   0xd   :  { %5014 = vmatmul.msk.f32.gmra.mxu1 %vm117_vm1, %v524_v3  ;;  %v535_v21 = vld [vmem:[%s7779_s1 + $0x60] sm:$0xff]  ;;  %v57_v24 = vld [vmem:[%s7778_s0 + $0x30] sm:$0xff]  ;;  %v58_v26 = vld [vmem:[%s7778_s0 + $0x38] sm:$0xff] }
   0xe   :  { %v537_v25 = vld [vmem:[%s7779_s1 + $0x70] sm:$0xff]  ;;  %v538_v27 = vld [vmem:[%s7779_s1 + $0x78] sm:$0xff]  ;;  %v59_v28 = vld [vmem:[%s7778_s0 + $0x40] sm:$0xff] }
   0xf   :  { %v539_v30 = vld [vmem:[%s7779_s1 + $0x80] sm:$0xff]  ;;  %v60_v31 = vld [vmem:[%s7778_s0 + $0x48] sm:$0xff]  ;;  %v61_v34 = vld [vmem:[%s7778_s0 + $0x50] sm:$0xff] }
  0x10   :  { %v540_v33 = vld [vmem:[%s7779_s1 + $0x88] sm:$0xff]  ;;  %v541_v36 = vld [vmem:[%s7779_s1 + $0x90] sm:$0xff]  ;;  %v62_v37 = vld [vmem:[%s7778_s0 + $0x58] sm:$0xff] }
  0x11   :  { %v542_v39 = vld [vmem:[%s7779_s1 + $0x98] sm:$0xff]  ;;  %v63_v40 = vld [vmem:[%s7778_s0 + $0x60] sm:$0xff]  ;;  %v64_v43 = vld [vmem:[%s7778_s0 + $0x68] sm:$0xff] }
  0x12   :  { %v543_v42 = vld [vmem:[%s7779_s1 + $0xa0] sm:$0xff]  ;;  %v544_v45 = vld [vmem:[%s7779_s1 + $0xa8] sm:$0xff]  ;;  %v65_v46 = vld [vmem:[%s7778_s0 + $0x70] sm:$0xff] }
  0x13   :  { %v545_v48 = vld [vmem:[%s7779_s1 + $0xb0] sm:$0xff]  ;;  %v66_v49 = vld [vmem:[%s7778_s0 + $0x78] sm:$0xff]  ;;  %v67_v53 = vld [vmem:[%s7778_s0 + $0x80] sm:$0xff] }
  0x14   :  { %4949 = vmatmul.msk.f32.gmra.mxu0 %vm117_vm1, %v52_v14  ;;  %v546_v51 = vld [vmem:[%s7779_s1 + $0xb8] sm:$0xff]  ;;  %v547_v55 = vld [vmem:[%s7779_s1 + $0xc0] sm:$0xff]  ;;  %v68_v57 = vld [vmem:[%s7778_s0 + $0x88] sm:$0xff] }
  0x15   :  { %5015 = vmatmul.msk.f32.gmra.mxu1 %vm117_vm1, %v525_v4  ;;  %v548_v59 = vld [vmem:[%s7779_s1 + $0xc8] sm:$0xff]  ;;  %v69_v61 = vld [vmem:[%s7778_s0 + $0x90] sm:$0xff]  ;;  %v70_v1 = vld [vmem:[%s7778_s0 + $0x98] sm:$0xff] }
  0x16   :  { %v549_v63 = vld [vmem:[%s7779_s1 + $0xd0] sm:$0xff]  ;;  %v550_v3 = vld [vmem:[%s7779_s1 + $0xd8] sm:$0xff]  ;;  %v552_v11 = vld [vmem:[%s7779_s1 + $0xe8] sm:$0xff] }
  0x17   :  { %v73_v12 = vld [vmem:[%s7778_s0 + $0xb0] sm:$0xff] }
  0x1c   :  { %4950 = vmatmul.msk.f32.gmra.mxu0 %vm117_vm1, %v53_v16  ;;  %v74_v16 = vld [vmem:[%s7778_s0 + $0xb8] sm:$0xff] }
  0x1d   :  { %5016 = vmatmul.msk.f32.gmra.mxu1 %vm117_vm1, %v526_v5  ;;  %v71_v5 = vld [vmem:[%s7778_s0 + $0xa0] sm:$0xff] }
  0x24   :  { %4951 = vmatmul.msk.f32.gmra.mxu0 %vm117_vm1, %v54_v18  ;;  %v554_v18 = vld [vmem:[%s7779_s1 + $0xf8] sm:$0xff] }
  0x25   :  { %5017 = vmatmul.msk.f32.gmra.mxu1 %vm117_vm1, %v527_v6 }
  0x2c   :  { %4952 = vmatmul.msk.f32.gmra.mxu0 %vm117_vm1, %v55_v20  ;;  %v75_v20 = vld [vmem:[%s7778_s0 + $0xc0] sm:$0xff] }
  0x2d   :  { %5018 = vmatmul.msk.f32.gmra.mxu1 %vm117_vm1, %v528_v7  ;;  %v551_v7 = vld [vmem:[%s7779_s1 + $0xe0] sm:$0xff] }
  0x34   :  { %4953 = vmatmul.msk.f32.gmra.mxu0 %vm117_vm1, %v56_v22  ;;  %v555_v22 = vld [vmem:[%s7779_s1 + $0x100] sm:$0xff] }
  0x35   :  { %5019 = vmatmul.msk.f32.gmra.mxu1 %vm117_vm1, %v529_v8  ;;  %v72_v8 = vld [vmem:[%s7778_s0 + $0xa8] sm:$0xff] }
  0x3c   :  { %4954 = vmatmul.msk.f32.gmra.mxu0 %vm117_vm1, %v57_v24  ;;  %v76_v24 = vld [vmem:[%s7778_s0 + $0xc8] sm:$0xff] }
  0x3d   :  { %5020 = vmatmul.msk.f32.gmra.mxu1 %vm117_vm1, %v530_v10 }
  0x44   :  { %4955 = vmatmul.msk.f32.gmra.mxu0 %vm117_vm1, %v58_v26  ;;  %v556_v26 = vld [vmem:[%s7779_s1 + $0x108] sm:$0xff] }
  0x45   :  { %5021 = vmatmul.msk.f32.gmra.mxu1 %vm117_vm1, %v531_v13 }
  0x4c   :  { %4956 = vmatmul.msk.f32.gmra.mxu0 %vm117_vm1, %v59_v28 }
  0x4d   :  { %5022 = vmatmul.msk.f32.gmra.mxu1 %vm117_vm1, %v532_v15  ;;  %v553_v15 = vld [vmem:[%s7779_s1 + $0xf0] sm:$0xff] }
  0x54   :  { %4957 = vmatmul.msk.f32.gmra.mxu0 %vm117_vm1, %v60_v31  ;;  %v557_v31 = vld [vmem:[%s7779_s1 + $0x110] sm:$0xff] }
  0x55   :  { %5023 = vmatmul.msk.f32.gmra.mxu1 %vm117_vm1, %v533_v17 }
  0x5c   :  { %4958 = vmatmul.msk.f32.gmra.mxu0 %vm117_vm1, %v61_v34 }
  0x5d   :  { %5024 = vmatmul.msk.f32.gmra.mxu1 %vm117_vm1, %v534_v19 }
  0x64   :  { %4959 = vmatmul.msk.f32.gmra.mxu0 %vm117_vm1, %v62_v37  ;;  %v558_v37 = vld [vmem:[%s7779_s1 + $0x118] sm:$0xff] }
  0x65   :  { %5025 = vmatmul.msk.f32.gmra.mxu1 %vm117_vm1, %v535_v21 }
  0x6c   :  { %4960 = vmatmul.msk.f32.gmra.mxu0 %vm117_vm1, %v63_v40 }
  0x6d   :  { %5026 = vmatmul.msk.f32.gmra.mxu1 %vm117_vm1, %v536_v23 }
  0x74   :  { %4961 = vmatmul.msk.f32.gmra.mxu0 %vm117_vm1, %v64_v43 }
  0x75   :  { %5027 = vmatmul.msk.f32.gmra.mxu1 %vm117_vm1, %v537_v25 }
  0x7c   :  { %4962 = vmatmul.msk.f32.gmra.mxu0 %vm117_vm1, %v65_v46 }
  0x7d   :  { %5028 = vmatmul.msk.f32.gmra.mxu1 %vm117_vm1, %v538_v27  ;;  %v77_v27 = vld [vmem:[%s7778_s0 + $0xd0] sm:$0xff] }
  0x82   :  { %v5642_v29 = vpop.f32.mrf.mxu1 }
  0x84   :  { %4963 = vmatmul.msk.f32.gmra.mxu0 %vm117_vm1, %v66_v49 }
  0x85   :  { %5029 = vmatmul.msk.f32.gmra.mxu1 %vm117_vm1, %v539_v30 }
  0x89   :  { %v5717_v52 = vpop.f32.mrf.mxu0 }
  0x8a   :  { %v5652_v32 = vpop.f32.mrf.mxu1 }
  0x8c   :  { %4964 = vmatmul.msk.f32.gmra.mxu0 %vm117_vm1, %v67_v53 }
  0x8d   :  { %5030 = vmatmul.msk.f32.gmra.mxu1 %vm117_vm1, %v540_v33  ;;  %v78_v33 = vld [vmem:[%s7778_s0 + $0xd8] sm:$0xff] }
  0x91   :  { %v5729_v56 = vpop.f32.mrf.mxu0 }
  0x92   :  { %v5662_v35 = vpop.f32.mrf.mxu1 }
  0x94   :  { %4965 = vmatmul.msk.f32.gmra.mxu0 %vm117_vm1, %v68_v57  ;;  %v82_v57 = vld [vmem:[%s7778_s0 + $0xf8] sm:$0xff] }
  0x95   :  { %5031 = vmatmul.msk.f32.gmra.mxu1 %vm117_vm1, %v541_v36 }
  0x99   :  { %v5741_v60 = vpop.f32.mrf.mxu0 }
  0x9a   :  { %v5672_v38 = vpop.f32.mrf.mxu1 }
  0x9c   :  { %4966 = vmatmul.msk.f32.gmra.mxu0 %vm117_vm1, %v69_v61 }
  0x9d   :  { %5032 = vmatmul.msk.f32.gmra.mxu1 %vm117_vm1, %v542_v39  ;;  %v79_v39 = vld [vmem:[%s7778_s0 + $0xe0] sm:$0xff] }
  0xa1   :  { %v5753_v0 = vpop.f32.mrf.mxu0 }
  0xa2   :  { %v5682_v41 = vpop.f32.mrf.mxu1 }
  0xa4   :  { %4967 = vmatmul.msk.f32.gmra.mxu0 %vm117_vm1, %v70_v1  ;;  %v83_v1 = vld [vmem:[%s7778_s0 + $0x100] sm:$0xff] }
  0xa5   :  { %5033 = vmatmul.msk.f32.gmra.mxu1 %vm117_vm1, %v543_v42  ;;  %v559_v42 = vld [vmem:[%s7779_s1 + $0x120] sm:$0xff] }
  0xa9   :  { %v5766_v4 = vpop.f32.mrf.mxu0 }
  0xaa   :  { %v5692_v44 = vpop.f32.mrf.mxu1 }
  0xac   :  { %4968 = vmatmul.msk.f32.gmra.mxu0 %vm117_vm1, %v71_v5 }
  0xad   :  { %5034 = vmatmul.msk.f32.gmra.mxu1 %vm117_vm1, %v544_v45  ;;  %v80_v45 = vld [vmem:[%s7778_s0 + $0xe8] sm:$0xff] }
  0xb1   :  { %v5781_v9 = vpop.f32.mrf.mxu0 }
  0xb2   :  { %v5702_v47 = vpop.f32.mrf.mxu1 }
  0xb4   :  { %4969 = vmatmul.msk.f32.gmra.mxu0 %vm117_vm1, %v72_v8  ;;  %v84_v8 = vld [vmem:[%s7778_s0 + $0x108] sm:$0xff] }
  0xb5   :  { %5035 = vmatmul.msk.f32.gmra.mxu1 %vm117_vm1, %v545_v48  ;;  %v560_v48 = vld [vmem:[%s7779_s1 + $0x128] sm:$0xff] }
  0xb9   :  { %v5794_v13 = vpop.f32.mrf.mxu0 }
  0xba   :  { %v5712_v50 = vpop.f32.mrf.mxu1 }
  0xbc   :  { %4970 = vmatmul.msk.f32.gmra.mxu0 %vm117_vm1, %v73_v12  ;;  %v564_v12 = vld [vmem:[%s7779_s1 + $0x148] sm:$0xff] }
  0xbd   :  { %5036 = vmatmul.msk.f32.gmra.mxu1 %vm117_vm1, %v546_v51  ;;  %v81_v51 = vld [vmem:[%s7778_s0 + $0xf0] sm:$0xff] }
  0xc1   :  { %v5811_v19 = vpop.f32.mrf.mxu0 }
  0xc2   :  { %v5724_v54 = vpop.f32.mrf.mxu1 }
  0xc4   :  { %4971 = vmatmul.msk.f32.gmra.mxu0 %vm117_vm1, %v74_v16  ;;  %v85_v16 = vld [vmem:[%s7778_s0 + $0x110] sm:$0xff] }
  0xc5   :  { %5037 = vmatmul.msk.f32.gmra.mxu1 %vm117_vm1, %v547_v55  ;;  %v561_v55 = vld [vmem:[%s7779_s1 + $0x130] sm:$0xff] }
  0xc9   :  { %v5824_v23 = vpop.f32.mrf.mxu0 }
  0xca   :  { %v5736_v58 = vpop.f32.mrf.mxu1 }
  0xcc   :  { %4972 = vmatmul.msk.f32.gmra.mxu0 %vm117_vm1, %v75_v20  ;;  %v565_v20 = vld [vmem:[%s7779_s1 + $0x150] sm:$0xff] }
  0xcd   :  { %5038 = vmatmul.msk.f32.gmra.mxu1 %vm117_vm1, %v548_v59 }
  0xd1   :  { %v5839_v28 = vpop.f32.mrf.mxu0 }
  0xd2   :  { %v5748_v62 = vpop.f32.mrf.mxu1 }
  0xd4   :  { %4973 = vmatmul.msk.f32.gmra.mxu0 %vm117_vm1, %v76_v24  ;;  %v86_v24 = vld [vmem:[%s7778_s0 + $0x118] sm:$0xff] }
  0xd5   :  { %5039 = vmatmul.msk.f32.gmra.mxu1 %vm117_vm1, %v549_v63  ;;  %v562_v63 = vld [vmem:[%s7779_s1 + $0x138] sm:$0xff] }
  0xd9   :  { %v5852_v34 = vpop.f32.mrf.mxu0 }
  0xda   :  { %v5760_v2 = vpop.f32.mrf.mxu1  ;;  %7794 = vst [vmem:[#allocation6_spill] sm:$0xff] %v5852_v34 }
  0xdc   :  { %4974 = vmatmul.msk.f32.gmra.mxu0 %vm117_vm1, %v77_v27  ;;  %v566_v27 = vld [vmem:[%s7779_s1 + $0x158] sm:$0xff] }
  0xdd   :  { %5040 = vmatmul.msk.f32.gmra.mxu1 %vm117_vm1, %v550_v3 }
  0xe1   :  { %v5869_v43 = vpop.f32.mrf.mxu0 }
  0xe2   :  { %v5772_v6 = vpop.f32.mrf.mxu1 }
  0xe4   :  { %4975 = vmatmul.msk.f32.gmra.mxu0 %vm117_vm1, %v78_v33 }
  0xe5   :  { %5041 = vmatmul.msk.f32.gmra.mxu1 %vm117_vm1, %v551_v7  ;;  %v563_v7 = vld [vmem:[%s7779_s1 + $0x140] sm:$0xff] }
  0xe9   :  { %v5882_v49 = vpop.f32.mrf.mxu0 }
  0xea   :  { %v5784_v10 = vpop.f32.mrf.mxu1 }
  0xec   :  { %4976 = vmatmul.msk.f32.gmra.mxu0 %vm117_vm1, %v79_v39  ;;  %v567_v39 = vld [vmem:[%s7779_s1 + $0x160] sm:$0xff] }
  0xed   :  { %5042 = vmatmul.msk.f32.gmra.mxu1 %vm117_vm1, %v552_v11 }
  0xf1   :  { %v5896_v59 = vpop.f32.mrf.mxu0 }
  0xf2   :  { %v5796_v14 = vpop.f32.mrf.mxu1  ;;  %7795 = vst [vmem:[#allocation7_spill] sm:$0xff] %v5896_v59 }
  0xf4   :  { %4977 = vmatmul.msk.f32.gmra.mxu0 %vm117_vm1, %v80_v45 }
  0xf5   :  { %5043 = vmatmul.msk.f32.gmra.mxu1 %vm117_vm1, %v553_v15 }
  0xf9   :  { %v5908_v3 = vpop.f32.mrf.mxu0 }
  0xfa   :  { %v5806_v17 = vpop.f32.mrf.mxu1  ;;  %7796 = vst [vmem:[#allocation8_spill] sm:$0xff] %v5908_v3 }
  0xfc   :  { %4978 = vmatmul.msk.f32.gmra.mxu0 %vm117_vm1, %v81_v51  ;;  %v568_v51 = vld [vmem:[%s7779_s1 + $0x168] sm:$0xff] }
  0xfd   :  { %5044 = vmatmul.msk.f32.gmra.mxu1 %vm117_vm1, %v554_v18 }
 0x101   :  { %v5925_v15 = vpop.f32.mrf.mxu0 }
 0x102   :  { %v5818_v21 = vpop.f32.mrf.mxu1 }
 0x104   :  { %4979 = vmatmul.msk.f32.gmra.mxu0 %vm117_vm1, %v82_v57  ;;  %v569_v57 = vld [vmem:[%s7779_s1 + $0x170] sm:$0xff] }
 0x105   :  { %5045 = vmatmul.msk.f32.gmra.mxu1 %vm117_vm1, %v555_v22 }
 0x109   :  { %v5937_v22 = vpop.f32.mrf.mxu0 }
 0x10a   :  { %v5830_v25 = vpop.f32.mrf.mxu1  ;;  %7797 = vst [vmem:[#allocation9_spill] sm:$0xff] %v5937_v22 }
 0x10c   :  { %4980 = vmatmul.msk.f32.gmra.mxu0 %vm117_vm1, %v83_v1 }
 0x10d   :  { %5046 = vmatmul.msk.f32.gmra.mxu1 %vm117_vm1, %v556_v26 }
 0x111   :  { %v5951_v33 = vpop.f32.mrf.mxu0 }
 0x112   :  { %v5842_v30 = vpop.f32.mrf.mxu1  ;;  %7798 = vst [vmem:[#allocation10_spill] sm:$0xff] %v5951_v33 }
 0x114   :  { %4981 = vmatmul.msk.f32.gmra.mxu0 %vm117_vm1, %v84_v8 }
 0x115   :  { %5047 = vmatmul.msk.f32.gmra.mxu1 %vm117_vm1, %v557_v31  ;;  %v87_v31 = vld [vmem:[%s7778_s0 + $0x120] sm:$0xff] }
 0x119   :  { %v5964_v45 = vpop.f32.mrf.mxu0 }
 0x11a   :  { %v5854_v36 = vpop.f32.mrf.mxu1  ;;  %7799 = vst [vmem:[#allocation11_spill] sm:$0xff] %v5964_v45 }
 0x11c   :  { %4982 = vmatmul.msk.f32.gmra.mxu0 %vm117_vm1, %v85_v16 }
 0x11d   :  { %5048 = vmatmul.msk.f32.gmra.mxu1 %vm117_vm1, %v558_v37 }
 0x122   :  { %v5864_v40 = vpop.f32.mrf.mxu1 }
 0x124   :  { %4983 = vmatmul.msk.f32.gmra.mxu0 %vm117_vm1, %v86_v24 }
 0x125   :  { %5049 = vmatmul.msk.f32.gmra.mxu1 %vm117_vm1, %v559_v42  ;;  %v88_v42 = vld [vmem:[%s7778_s0 + $0x128] sm:$0xff] }
 0x12a   :  { %v5876_v46 = vpop.f32.mrf.mxu1 }
 0x12c   :  { %4984 = vmatmul.msk.f32.gmra.mxu0 %vm117_vm1, %v87_v31  ;;  %v572_v31 = vld [vmem:[%s7779_s1 + $0x188] sm:$0xff] }
 0x12d   :  { %5050 = vmatmul.msk.f32.gmra.mxu1 %vm117_vm1, %v560_v48 }
 0x132   :  { %v867_v53 = vpop.f32.mrf.mxu1 }
 0x133   :  { %1101 = vrot.lane.b32.xlu0 %v867_v53, %s5444_s30  ;;  %v89_v53 = vld [vmem:[%s7778_s0 + $0x130] sm:$0xff] }
 0x134   :  { %4985 = vmatmul.msk.f32.gmra.mxu0 %vm117_vm1, %v88_v42 }
 0x135   :  { %5051 = vmatmul.msk.f32.gmra.mxu1 %vm117_vm1, %v561_v55 }
 0x13a   :  { %v870_v61 = vpop.f32.mrf.mxu1 }
 0x13b   :  { %1103 = vrot.lane.b32.xlu0 %v870_v61, %s5444_s30  ;;  %v5981_v61 = vpop.f32.mrf.mxu0 }
 0x13c   :  { %4986 = vmatmul.msk.f32.gmra.mxu0 %vm117_vm1, %v89_v53  ;;  %7800 = vst [vmem:[#allocation12_spill] sm:$0xff] %v5981_v61 }
 0x13d   :  { %5052 = vmatmul.msk.f32.gmra.mxu1 %vm117_vm1, %v562_v63  ;;  %v90_v63 = vld [vmem:[%s7778_s0 + $0x138] sm:$0xff] }
 0x142   :  { %v5910_v5 = vpop.f32.mrf.mxu1 }
 0x143   :  { %v5993_v8 = vpop.f32.mrf.mxu0 }
 0x144   :  { %4987 = vmatmul.msk.f32.gmra.mxu0 %vm117_vm1, %v90_v63  ;;  %7801 = vst [vmem:[#allocation13_spill] sm:$0xff] %v5993_v8 }
 0x145   :  { %5053 = vmatmul.msk.f32.gmra.mxu1 %vm117_vm1, %v563_v7  ;;  %v570_v7 = vld [vmem:[%s7779_s1 + $0x178] sm:$0xff] }
 0x14a   :  { %v5920_v11 = vpop.f32.mrf.mxu1 }
 0x14b   :  { %v6014_v24 = vpop.f32.mrf.mxu0 }
 0x14c   :  { %7802 = vst [vmem:[#allocation14_spill] sm:$0xff] %v6014_v24 }
 0x14d   :  { %5054 = vmatmul.msk.f32.gmra.mxu1 %vm117_vm1, %v564_v12  ;;  %v91_v12 = vld [vmem:[%s7778_s0 + $0x140] sm:$0xff] }
 0x14e   :  { %4988 = vmatmul.msk.f32.gmra.mxu0 %vm117_vm1, %v91_v12  ;;  %v575_v12 = vld [vmem:[%s7779_s1 + $0x1a0] sm:$0xff] }
 0x152   :  { %v879_v18 = vpop.f32.mrf.mxu1 }
 0x153   :  { %1109 = vrot.lane.b32.xlu1 %v879_v18, %s5444_s30  ;;  %v571_v18 = vld [vmem:[%s7779_s1 + $0x180] sm:$0xff] }
 0x155   :  { %5055 = vmatmul.msk.f32.gmra.mxu1 %vm117_vm1, %v565_v20  ;;  %v5445_v20 = vmov 0.0  }
 0x156   :  { %1487 = vst.msk [vmem:[#allocation2 + $0x138] sm:$0xff] %vm1446_vm2, %v5445_v20 }
 0x157   :  { %1488 = vst.msk [vmem:[#allocation2 + $0x140] sm:$0xff] %vm1446_vm2, %v5445_v20 }
 0x158   :  { %1447 = vst.msk [vmem:[#allocation2] sm:$0xff] %vm1446_vm2, %v5445_v20 }
 0x159   :  { %1448 = vst.msk [vmem:[#allocation2 + $0x8] sm:$0xff] %vm1446_vm2, %v5445_v20 }
 0x15a   :  { %v882_v26 = vpop.f32.mrf.mxu1  ;;  %1451 = vst.msk [vmem:[#allocation2 + $0x18] sm:$0xff] %vm1446_vm2, %v5445_v20 }
 0x15b   :  { %1111 = vrot.lane.b32.xlu1 %v882_v26, %s5444_s30  ;;  %v92_v26 = vld [vmem:[%s7778_s0 + $0x148] sm:$0xff]  ;;  %1452 = vst.msk [vmem:[#allocation2 + $0x20] sm:$0xff] %vm1446_vm2, %v5445_v20 }
 0x15c   :  { %4989 = vmatmul.msk.f32.gmra.mxu0 %vm117_vm1, %v92_v26  ;;  %1454 = vst.msk [vmem:[#allocation2 + $0x30] sm:$0xff] %vm1446_vm2, %v5445_v20 }
 0x15d   :  { %5056 = vmatmul.msk.f32.gmra.mxu1 %vm117_vm1, %v566_v27  ;;  %1455 = vst.msk [vmem:[#allocation2 + $0x38] sm:$0xff] %vm1446_vm2, %v5445_v20 }
 0x15e   :  { %1457 = vst.msk [vmem:[#allocation2 + $0x48] sm:$0xff] %vm1446_vm2, %v5445_v20 }
 0x15f   :  { %1458 = vst.msk [vmem:[#allocation2 + $0x50] sm:$0xff] %vm1446_vm2, %v5445_v20 }
 0x160   :  { %1460 = vst.msk [vmem:[#allocation2 + $0x60] sm:$0xff] %vm1446_vm2, %v5445_v20 }
 0x161   :  { %1461 = vst.msk [vmem:[#allocation2 + $0x68] sm:$0xff] %vm1446_vm2, %v5445_v20 }
 0x162   :  { %v5954_v37 = vpop.f32.mrf.mxu1  ;;  %1463 = vst.msk [vmem:[#allocation2 + $0x78] sm:$0xff] %vm1446_vm2, %v5445_v20 }
 0x163   :  { %1464 = vst.msk [vmem:[#allocation2 + $0x80] sm:$0xff] %vm1446_vm2, %v5445_v20 }
 0x164   :  { %1466 = vst.msk [vmem:[#allocation2 + $0x90] sm:$0xff] %vm1446_vm2, %v5445_v20 }
 0x165   :  { %5057 = vmatmul.msk.f32.gmra.mxu1 %vm117_vm1, %v567_v39  ;;  %v397_v39 = vpop.f32.mrf.mxu0  ;;  %1467 = vst.msk [vmem:[#allocation2 + $0x98] sm:$0xff] %vm1446_vm2, %v5445_v20 }
 0x166   :  { %1469 = vst.msk [vmem:[#allocation2 + $0xa8] sm:$0xff] %vm1446_vm2, %v5445_v20 }
 0x167   :  { %1470 = vst.msk [vmem:[#allocation2 + $0xb0] sm:$0xff] %vm1446_vm2, %v5445_v20 }
 0x168   :  { %1472 = vst.msk [vmem:[#allocation2 + $0xc0] sm:$0xff] %vm1446_vm2, %v5445_v20 }
 0x169   :  { %1473 = vst.msk [vmem:[#allocation2 + $0xc8] sm:$0xff] %vm1446_vm2, %v5445_v20 }
 0x16a   :  { %v5966_v48 = vpop.f32.mrf.mxu1  ;;  %1475 = vst.msk [vmem:[#allocation2 + $0xd8] sm:$0xff] %vm1446_vm2, %v5445_v20 }
 0x16b   :  { %1476 = vst.msk [vmem:[#allocation2 + $0xe0] sm:$0xff] %vm1446_vm2, %v5445_v20 }
 0x16c   :  { %1478 = vst.msk [vmem:[#allocation2 + $0xf0] sm:$0xff] %vm1446_vm2, %v5445_v20 }
 0x16d   :  { %5058 = vmatmul.msk.f32.gmra.mxu1 %vm117_vm1, %v568_v51  ;;  %v573_v51 = vld [vmem:[%s7779_s1 + $0x190] sm:$0xff]  ;;  %1479 = vst.msk [vmem:[#allocation2 + $0xf8] sm:$0xff] %vm1446_vm2, %v5445_v20  ;;  %v6074_v63 = vpop.f32.mrf.mxu0 }
 0x16e   :  { %1481 = vst.msk [vmem:[#allocation2 + $0x108] sm:$0xff] %vm1446_vm2, %v5445_v20 }
 0x16f   :  { %1482 = vst.msk [vmem:[#allocation2 + $0x110] sm:$0xff] %vm1446_vm2, %v5445_v20 }
 0x170   :  { %1484 = vst.msk [vmem:[#allocation2 + $0x120] sm:$0xff] %vm1446_vm2, %v5445_v20 }
 0x171   :  { %1485 = vst.msk [vmem:[#allocation2 + $0x128] sm:$0xff] %vm1446_vm2, %v5445_v20 }
 0x172   :  { %v5976_v55 = vpop.f32.mrf.mxu1  ;;  %1490 = vst.msk [vmem:[#allocation2 + $0x150] sm:$0xff] %vm1446_vm2, %v5445_v20 }
 0x173   :  { %1491 = vst.msk [vmem:[#allocation2 + $0x158] sm:$0xff] %vm1446_vm2, %v5445_v20 }
 0x174   :  { %1493 = vst.msk [vmem:[#allocation2 + $0x168] sm:$0xff] %vm1446_vm2, %v5445_v20 }
 0x175   :  { %5059 = vmatmul.msk.f32.gmra.mxu1 %vm117_vm1, %v569_v57  ;;  %v574_v57 = vld [vmem:[%s7779_s1 + $0x198] sm:$0xff]  ;;  %1494 = vst.msk [vmem:[#allocation2 + $0x170] sm:$0xff] %vm1446_vm2, %v5445_v20  ;;  %v6108_v26 = vpop.f32.mrf.mxu0 }
 0x176   :  { %1496 = vst.msk [vmem:[#allocation2 + $0x180] sm:$0xff] %vm1446_vm2, %v5445_v20 }
 0x177   :  { %1497 = vst.msk [vmem:[#allocation2 + $0x188] sm:$0xff] %vm1446_vm2, %v5445_v20 }
 0x178   :  { %7803 = vst [vmem:[#allocation15_spill] sm:$0xff] %v6108_v26 }
 0x179   :  { %1499 = vst.msk [vmem:[#allocation2 + $0x198] sm:$0xff] %vm1446_vm2, %v5445_v20 }
 0x17a   :  { %v5988_v1 = vpop.f32.mrf.mxu1  ;;  %1500 = vst.msk [vmem:[#allocation2 + $0x1a0] sm:$0xff] %vm1446_vm2, %v5445_v20 }
 0x17b   :  { %1502 = vst.msk [vmem:[#allocation2 + $0x1b0] sm:$0xff] %vm1446_vm2, %v5445_v20 }
 0x17c   :  { %1503 = vst.msk [vmem:[#allocation2 + $0x1b8] sm:$0xff] %vm1446_vm2, %v5445_v20 }
 0x17d   :  { %5060 = vmatmul.msk.f32.gmra.mxu1 %vm117_vm1, %v570_v7  ;;  %1508 = vst.msk [vmem:[#allocation2 + $0x1e0] sm:$0xff] %vm1446_vm2, %v5445_v20 }
 0x17e   :  { %1509 = vst.msk [vmem:[#allocation2 + $0x1e8] sm:$0xff] %vm1446_vm2, %v5445_v20 }
 0x17f   :  { %1511 = vst.msk [vmem:[#allocation2 + $0x1f8] sm:$0xff] %vm1446_vm2, %v5445_v20 }
 0x180   :  { %1512 = vst.msk [vmem:[#allocation2 + $0x200] sm:$0xff] %vm1446_vm2, %v5445_v20 }
 0x181   :  { %1514 = vst.msk [vmem:[#allocation2 + $0x210] sm:$0xff] %vm1446_vm2, %v5445_v20 }
 0x182   :  { %v6000_v16 = vpop.f32.mrf.mxu1  ;;  %1515 = vst.msk [vmem:[#allocation2 + $0x218] sm:$0xff] %vm1446_vm2, %v5445_v20 }
 0x183   :  { %1517 = vst.msk [vmem:[#allocation2 + $0x228] sm:$0xff] %vm1446_vm2, %v5445_v20 }
 0x184   :  { %1518 = vst.msk [vmem:[#allocation2 + $0x230] sm:$0xff] %vm1446_vm2, %v5445_v20 }
 0x185   :  { %5061 = vmatmul.msk.f32.gmra.mxu1 %vm117_vm1, %v571_v18  ;;  %v6102_v18 = vld [vmem:[%s7782_s4] ss:$0 sm:$0xff]  ;;  %1520 = vst.msk [vmem:[#allocation2 + $0x240] sm:$0xff] %vm1446_vm2, %v5445_v20 }
 0x186   :  { %1521 = vst.msk [vmem:[#allocation2 + $0x248] sm:$0xff] %vm1446_vm2, %v5445_v20 }
 0x187   :  { %1523 = vst.msk [vmem:[#allocation2 + $0x258] sm:$0xff] %vm1446_vm2, %v5445_v20 }
 0x188   :  { %1524 = vst.msk [vmem:[#allocation2 + $0x260] sm:$0xff] %vm1446_vm2, %v5445_v20 }
 0x189   :  { %1526 = vst.msk [vmem:[#allocation2 + $0x270] sm:$0xff] %vm1446_vm2, %v5445_v20 }
 0x18a   :  { %v6026_v27 = vpop.f32.mrf.mxu1  ;;  %1527 = vst.msk [vmem:[#allocation2 + $0x278] sm:$0xff] %vm1446_vm2, %v5445_v20 }
 0x18b   :  { %1529 = vst.msk [vmem:[#allocation2 + $0x288] sm:$0xff] %vm1446_vm2, %v5445_v20 }
 0x18c   :  { %1530 = vst.msk [vmem:[#allocation2 + $0x290] sm:$0xff] %vm1446_vm2, %v5445_v20 }
 0x18d   :  { %5062 = vmatmul.msk.f32.gmra.mxu1 %vm117_vm1, %v572_v31  ;;  %1532 = vst.msk [vmem:[#allocation2 + $0x2a0] sm:$0xff] %vm1446_vm2, %v5445_v20 }
 0x18e   :  { %1533 = vst.msk [vmem:[#allocation2 + $0x2a8] sm:$0xff] %vm1446_vm2, %v5445_v20 }
 0x18f   :  { %1535 = vst.msk [vmem:[#allocation2 + $0x2b8] sm:$0xff] %vm1446_vm2, %v5445_v20 }
 0x190   :  { %1536 = vst.msk [vmem:[#allocation2 + $0x2c0] sm:$0xff] %vm1446_vm2, %v5445_v20 }
 0x191   :  { %1538 = vst.msk [vmem:[#allocation2 + $0x2d0] sm:$0xff] %vm1446_vm2, %v5445_v20 }
 0x192   :  { %v903_v42 = vpop.f32.mrf.mxu1  ;;  %1539 = vst.msk [vmem:[#allocation2 + $0x2d8] sm:$0xff] %vm1446_vm2, %v5445_v20 }
 0x193   :  { %1125 = vrot.lane.b32.xlu2 %v903_v42, %s5444_s30  ;;  %1541 = vst.msk [vmem:[#allocation2 + $0x2e8] sm:$0xff] %vm1446_vm2, %v5445_v20 }
 0x194   :  { %1542 = vst.msk [vmem:[#allocation2 + $0x2f0] sm:$0xff] %vm1446_vm2, %v5445_v20 }
 0x195   :  { %5063 = vmatmul.msk.f32.gmra.mxu1 %vm117_vm1, %v573_v51  ;;  %1544 = vst.msk [vmem:[#allocation2 + $0x300] sm:$0xff] %vm1446_vm2, %v5445_v20 }
 0x196   :  { %1545 = vst.msk [vmem:[#allocation2 + $0x308] sm:$0xff] %vm1446_vm2, %v5445_v20 }
 0x197   :  { %1547 = vst.msk [vmem:[#allocation2 + $0x318] sm:$0xff] %vm1446_vm2, %v5445_v20 }
 0x198   :  { %1548 = vst.msk [vmem:[#allocation2 + $0x320] sm:$0xff] %vm1446_vm2, %v5445_v20 }
 0x199   :  { %1550 = vst.msk [vmem:[#allocation2 + $0x330] sm:$0xff] %vm1446_vm2, %v5445_v20 }
 0x19a   :  { %v906_v53 = vpop.f32.mrf.mxu1  ;;  %1551 = vst.msk [vmem:[#allocation2 + $0x338] sm:$0xff] %vm1446_vm2, %v5445_v20 }
 0x19b   :  { %1127 = vrot.lane.b32.xlu2 %v906_v53, %s5444_s30  ;;  %1553 = vst.msk [vmem:[#allocation2 + $0x348] sm:$0xff] %vm1446_vm2, %v5445_v20 }
 0x19c   :  { %1554 = vst.msk [vmem:[#allocation2 + $0x350] sm:$0xff] %vm1446_vm2, %v5445_v20 }
 0x19d   :  { %5064 = vmatmul.msk.f32.gmra.mxu1 %vm117_vm1, %v574_v57  ;;  %1556 = vst.msk [vmem:[#allocation2 + $0x360] sm:$0xff] %vm1446_vm2, %v5445_v20 }
 0x19e   :  { %1557 = vst.msk [vmem:[#allocation2 + $0x368] sm:$0xff] %vm1446_vm2, %v5445_v20 }
 0x19f   :  { %1559 = vst.msk [vmem:[#allocation2 + $0x378] sm:$0xff] %vm1446_vm2, %v5445_v20 }
 0x1a0   :  { %1560 = vst.msk [vmem:[#allocation2 + $0x380] sm:$0xff] %vm1446_vm2, %v5445_v20 }
 0x1a1   :  { %1562 = vst.msk [vmem:[#allocation2 + $0x390] sm:$0xff] %vm1446_vm2, %v5445_v20 }
 0x1a2   :  { %v6092_v7 = vpop.f32.mrf.mxu1  ;;  %1563 = vst.msk [vmem:[#allocation2 + $0x398] sm:$0xff] %vm1446_vm2, %v5445_v20 }
 0x1a3   :  { %1489 = vst.msk [vmem:[#allocation2 + $0x148] sm:$0xf] %vm1449_vm5, %v5445_v20 }
 0x1a4   :  { %1450 = vst.msk [vmem:[#allocation2 + $0x10] sm:$0xf] %vm1449_vm5, %v5445_v20 }
 0x1a5   :  { %v1102_v31 = vpop.permute.xlu0 %1101  ;;  %5065 = vmatmul.msk.f32.gmra.mxu1 %vm117_vm1, %v575_v12  ;;  %v6135_v12 = vpop.f32.mrf.mxu0  ;;  %1453 = vst.msk [vmem:[#allocation2 + $0x28] sm:$0xf] %vm1449_vm5, %v5445_v20 }
 0x1a6   :  { %v1272_v42 = vsel %vm1249_vm3, %v397_v39, %v1102_v31  ;;  %v576_v39 = vld [vmem:[%s7779_s1 + $0x1a8] sm:$0xff]  ;;  %7804 = vst [vmem:[#allocation16_spill] sm:$0xff] %v6135_v12  ;;  %v93_v31 = vld [vmem:[%s7778_s0 + $0x150] sm:$0xff] }
 0x1a7   :  { %v1340_v51 = vadd.f32 %v6102_v18, %v1272_v42  ;;  %4990 = vmatmul.msk.f32.gmra.mxu0 %vm117_vm1, %v93_v31  ;;  %v5077_v31 = vld [vmem:[%s7783_s5 + $0x4] sm:$0xf]  ;;  %1456 = vst.msk [vmem:[#allocation2 + $0x40] sm:$0xf] %vm1449_vm5, %v5445_v20 }
 0x1a8   :  { %5402 = vmatpush.msk.msra.mxu2 %vm1749_vm4, %v5077_v31  ;;  %5078 = vmatpush.msk.msrb.mxu0 %vm1749_vm4, %v5077_v31  ;;  %v95_v31 = vld [vmem:[%s7778_s0 + $0x160] sm:$0xff]  ;;  %1459 = vst.msk [vmem:[#allocation2 + $0x58] sm:$0xf] %vm1449_vm5, %v5445_v20 }
 0x1a9   :  { %v1404_v53 = vmax.f32 %v1340_v51, 0.0  ;;  %v577_v51 = vld [vmem:[%s7779_s1 + $0x1b0] sm:$0xff]  ;;  %1462 = vst.msk [vmem:[#allocation2 + $0x70] sm:$0xf] %vm1449_vm5, %v5445_v20 }
 0x1aa   :  { %v6121_v57 = vpop.f32.mrf.mxu1  ;;  %1465 = vst.msk [vmem:[#allocation2 + $0x88] sm:$0xf] %vm1449_vm5, %v5445_v20 }
 0x1ab   :  { %1591 = vst.msk [vmem:[#allocation2 + $0x13a] sm:$0xff] %vm1446_vm2, %v1404_v53 }
 0x1ac   :  { %1468 = vst.msk [vmem:[#allocation2 + $0xa0] sm:$0xf] %vm1449_vm5, %v5445_v20 }
 0x1ad   :  { %5066 = vmatmul.msk.f32.gmra.mxu1 %vm117_vm1, %v576_v39  ;;  %v6167_v53 = vpop.f32.mrf.mxu0  ;;  %v94_v39 = vld [vmem:[%s7778_s0 + $0x158] sm:$0xff]  ;;  %1471 = vst.msk [vmem:[#allocation2 + $0xb8] sm:$0xf] %vm1449_vm5, %v5445_v20 }
 0x1ae   :  { %1474 = vst.msk [vmem:[#allocation2 + $0xd0] sm:$0xf] %vm1449_vm5, %v5445_v20 }
 0x1af   :  { %4991 = vmatmul.msk.f32.gmra.mxu0 %vm117_vm1, %v94_v39  ;;  %v578_v39 = vld [vmem:[%s7779_s1 + $0x1b8] sm:$0xff]  ;;  %1477 = vst.msk [vmem:[#allocation2 + $0xe8] sm:$0xf] %vm1449_vm5, %v5445_v20 }
 0x1b0   :  { %1480 = vst.msk [vmem:[#allocation2 + $0x100] sm:$0xf] %vm1449_vm5, %v5445_v20 }
 0x1b1   :  { %1483 = vst.msk [vmem:[#allocation2 + $0x118] sm:$0xf] %vm1449_vm5, %v5445_v20 }
 0x1b2   :  { %v915_v42 = vpop.f32.mrf.mxu1  ;;  %1486 = vst.msk [vmem:[#allocation2 + $0x130] sm:$0xf] %vm1449_vm5, %v5445_v20 }
 0x1b3   :  { %1133 = vrot.lane.b32.xlu0 %v915_v42, %s5444_s30  ;;  %v1666_v42 = vld [vmem:[%s7783_s5] sm:$0xf]  ;;  %1492 = vst.msk [vmem:[#allocation2 + $0x160] sm:$0xf] %vm1449_vm5, %v5445_v20 }
 0x1b4   :  { %5403 = vmatpush.msk.msra.mxu3 %vm1749_vm4, %v1666_v42  ;;  %5095 = vmatpush.msk.msrb.mxu1 %vm1749_vm4, %v1666_v42  ;;  %1495 = vst.msk [vmem:[#allocation2 + $0x178] sm:$0xf] %vm1449_vm5, %v5445_v20 }
 0x1b5   :  { %5067 = vmatmul.msk.f32.gmra.mxu1 %vm117_vm1, %v577_v51  ;;  %v6212_v42 = vpop.f32.mrf.mxu0  ;;  %1498 = vst.msk [vmem:[#allocation2 + $0x190] sm:$0xf] %vm1449_vm5, %v5445_v20 }
 0x1b6   :  { %1501 = vst.msk [vmem:[#allocation2 + $0x1a8] sm:$0xf] %vm1449_vm5, %v5445_v20 }
 0x1b7   :  { %4992 = vmatmul.msk.f32.gmra.mxu0 %vm117_vm1, %v95_v31  ;;  %1504 = vst.msk [vmem:[#allocation2 + $0x1c0] sm:$0xf] %vm1449_vm5, %v5445_v20 }
 0x1b8   :  { %1510 = vst.msk [vmem:[#allocation2 + $0x1f0] sm:$0xf] %vm1449_vm5, %v5445_v20 }
 0x1b9   :  { %1513 = vst.msk [vmem:[#allocation2 + $0x208] sm:$0xf] %vm1449_vm5, %v5445_v20 }
 0x1ba   :  { %v918_v51 = vpop.f32.mrf.mxu1  ;;  %1516 = vst.msk [vmem:[#allocation2 + $0x220] sm:$0xf] %vm1449_vm5, %v5445_v20 }
 0x1bb   :  { %1135 = vrot.lane.b32.xlu1 %v918_v51, %s5444_s30  ;;  %v1104_v51 = vpop.permute.xlu0 %1103  ;;  %1519 = vst.msk [vmem:[#allocation2 + $0x238] sm:$0xf] %vm1449_vm5, %v5445_v20 }
 0x1bc   :  { %1522 = vst.msk [vmem:[#allocation2 + $0x250] sm:$0xf] %vm1449_vm5, %v5445_v20 }
 0x1bd   :  { %5068 = vmatmul.msk.f32.gmra.mxu1 %vm117_vm1, %v578_v39  ;;  %v1273_v39 = vsel %vm1249_vm3, %v6074_v63, %v1104_v51  ;;  %v6237_v26 = vpop.f32.mrf.mxu0  ;;  %1525 = vst.msk [vmem:[#allocation2 + $0x268] sm:$0xf] %vm1449_vm5, %v5445_v20 }
 0x1be   :  { %v1341_v31 = vadd.f32 %v6102_v18, %v1273_v39  ;;  %7805 = vst [vmem:[#allocation17_spill] sm:$0xff] %v6237_v26  ;;  %v579_v39 = vld [vmem:[%s7779_s1 + $0x1c0] sm:$0xff]  ;;  %v98_v26 = vld [vmem:[%s7778_s0 + $0x178] sm:$0xff] }
 0x1bf   :  { %1528 = vst.msk [vmem:[#allocation2 + $0x280] sm:$0xf] %vm1449_vm5, %v5445_v20 }
 0x1c0   :  { %v1405_v63 = vmax.f32 %v1341_v31, 0.0  ;;  %v96_v31 = vld [vmem:[%s7778_s0 + $0x168] sm:$0xff]  ;;  %1531 = vst.msk [vmem:[#allocation2 + $0x298] sm:$0xf] %vm1449_vm5, %v5445_v20 }
 0x1c1   :  { %4993 = vmatmul.msk.f32.gmra.mxu0 %vm117_vm1, %v96_v31  ;;  %v580_v31 = vld [vmem:[%s7779_s1 + $0x1c8] sm:$0xff]  ;;  %1534 = vst.msk [vmem:[#allocation2 + $0x2b0] sm:$0xf] %vm1449_vm5, %v5445_v20 }
 0x1c2   :  { %v6247_v51 = vpop.f32.mrf.mxu1  ;;  %1592 = vst.msk [vmem:[#allocation2 + $0x142] sm:$0xff] %vm1446_vm2, %v1405_v63 }
 0x1c3   :  { %1537 = vst.msk [vmem:[#allocation2 + $0x2c8] sm:$0xf] %vm1449_vm5, %v5445_v20 }
 0x1c4   :  { %1540 = vst.msk [vmem:[#allocation2 + $0x2e0] sm:$0xf] %vm1449_vm5, %v5445_v20 }
 0x1c5   :  { %v6259_v12 = vpop.f32.mrf.mxu0  ;;  %5069 = vmatmul.msk.f32.gmra.mxu1 %vm117_vm1, %v579_v39  ;;  %1543 = vst.msk [vmem:[#allocation2 + $0x2f8] sm:$0xf] %vm1449_vm5, %v5445_v20 }
 0x1c6   :  { %7806 = vst [vmem:[#allocation18_spill] sm:$0xff] %v6259_v12 }
 0x1c7   :  { %1546 = vst.msk [vmem:[#allocation2 + $0x310] sm:$0xf] %vm1449_vm5, %v5445_v20 }
 0x1c8   :  { %1549 = vst.msk [vmem:[#allocation2 + $0x328] sm:$0xf] %vm1449_vm5, %v5445_v20 }
 0x1c9   :  { %v1680_v63 = vld [vmem:[#allocation2 + $0x13a] ss:$2 sm:$0xff]  ;;  %v1647_v39 = vld [vmem:[#allocation2 + $0x139] ss:$2 sm:$0xff]  ;;  %1552 = vst.msk [vmem:[#allocation2 + $0x340] sm:$0xf] %vm1449_vm5, %v5445_v20 }
 0x1ca   :  { %v6276_v12 = vpop.f32.mrf.mxu1  ;;  %5085 = vmatmul.msk.f32.vlgmr.msra.gmra.mxu2 %vm1446_vm2, %v1680_v63  ;;  %5102 = vmatmul.msk.f32.vlgmr.msra.gmra.mxu3 %vm1446_vm2, %v1647_v39  ;;  %v97_v63 = vld [vmem:[%s7778_s0 + $0x170] sm:$0xff]  ;;  %1555 = vst.msk [vmem:[#allocation2 + $0x358] sm:$0xf] %vm1449_vm5, %v5445_v20 }
 0x1cb   :  { %4994 = vmatmul.msk.f32.gmra.mxu0 %vm117_vm1, %v97_v63  ;;  %v1110_v63 = vpop.permute.xlu1 %1109  ;;  %1558 = vst.msk [vmem:[#allocation2 + $0x370] sm:$0xf] %vm1449_vm5, %v5445_v20 }
 0x1cc   :  { %1561 = vst.msk [vmem:[#allocation2 + $0x388] sm:$0xf] %vm1449_vm5, %v5445_v20 }
 0x1cd   :  { %v6289_v61 = vpop.f32.mrf.mxu0  ;;  %5070 = vmatmul.msk.f32.gmra.mxu1 %vm117_vm1, %v580_v31  ;;  %v581_v31 = vld [vmem:[%s7779_s1 + $0x1d0] sm:$0xff]  ;;  %1564 = vst.msk [vmem:[#allocation2 + $0x3a0] sm:$0xf] %vm1449_vm5, %v5445_v20 }
 0x1ce   :  { %7807 = vst [vmem:[#allocation19_spill] sm:$0xff] %v6289_v61 }
 0x1d2   :  { %v927_v39 = vpop.f32.mrf.mxu1 }
 0x1d3   :  { %1141 = vrot.lane.b32.xlu2 %v927_v39, %s5444_s30  ;;  %4995 = vmatmul.msk.f32.gmra.mxu0 %vm117_vm1, %v98_v26  ;;  %v1112_v8 = vpop.permute.xlu1 %1111 }
 0x1d5   :  { %v6316_v61 = vpop.f32.mrf.mxu0  ;;  %5071 = vmatmul.msk.f32.gmra.mxu1 %vm117_vm1, %v581_v31  ;;  %v582_v31 = vld [vmem:[%s7779_s1 + $0x1d8] sm:$0xff] }
 0x1d6   :  { %7808 = vst [vmem:[#allocation20_spill] sm:$0xff] %v6316_v61  ;;  %v99_v61 = vld [vmem:[%s7778_s0 + $0x180] sm:$0xff] }
 0x1da   :  { %v930_v39 = vpop.f32.mrf.mxu1 }
 0x1db   :  { %1143 = vrot.lane.b32.xlu0 %v930_v39, %s5444_s30  ;;  %v1276_v39 = vsel %vm1249_vm3, %v6167_v53, %v1110_v63  ;;  %4996 = vmatmul.msk.f32.gmra.mxu0 %vm117_vm1, %v99_v61 }
 0x1dc   :  { %v1344_v22 = vadd.f32 %v6102_v18, %v1276_v39 }
 0x1dd   :  { %v6341_v26 = vpop.f32.mrf.mxu0  ;;  %5072 = vmatmul.msk.f32.gmra.mxu1 %vm117_vm1, %v582_v31  ;;  %v1277_v31 = vsel %vm1249_vm3, %v6212_v42, %v1112_v8  ;;  %v100_v8 = vld [vmem:[%s7778_s0 + $0x188] sm:$0xff] }
 0x1de   :  { %7809 = vst [vmem:[#allocation21_spill] sm:$0xff] %v6341_v26  ;;  %v1345_v61 = vadd.f32 %v6102_v18, %v1277_v31  ;;  %v1408_v42 = vmax.f32 %v1344_v22, 0.0  ;;  %v101_v22 = vld [vmem:[%s7778_s0 + $0x190] sm:$0xff] }
 0x1e0   :  { %v1409_v63 = vmax.f32 %v1345_v61, 0.0  ;;  %1595 = vst.msk [vmem:[#allocation2 + $0x16a] sm:$0xff] %vm1446_vm2, %v1408_v42 }
 0x1e2   :  { %v6362_v26 = vpop.f32.mrf.mxu1  ;;  %1596 = vst.msk [vmem:[#allocation2 + $0x172] sm:$0xff] %vm1446_vm2, %v1409_v63 }
 0x1e3   :  { %4997 = vmatmul.msk.f32.gmra.mxu0 %vm117_vm1, %v100_v8 }
 0x1e5   :  { %v6372_v53 = vpop.f32.mrf.mxu0 }
 0x1e6   :  { %7810 = vst [vmem:[#allocation22_spill] sm:$0xff] %v6372_v53 }
 0x1e9   :  { %v1682_v33 = vld [vmem:[#allocation2 + $0x16a] ss:$2 sm:$0xff]  ;;  %v1649_v59 = vld [vmem:[#allocation2 + $0x169] ss:$2 sm:$0xff] }
 0x1ea   :  { %v6386_v31 = vpop.f32.mrf.mxu1  ;;  %5086 = vmatmul.msk.f32.gmra.mxu2 %vm1446_vm2, %v1682_v33  ;;  %5103 = vmatmul.msk.f32.gmra.mxu3 %vm1446_vm2, %v1649_v59  ;;  %v103_v33 = vld [vmem:[%s7778_s0 + $0x1a0] sm:$0xff] }
 0x1eb   :  { %4998 = vmatmul.msk.f32.gmra.mxu0 %vm117_vm1, %v101_v22 }
 0x1ed   :  { %v1126_v39 = vpop.permute.xlu2 %1125  ;;  %v433_v53 = vpop.f32.mrf.mxu0 }
 0x1ee   :  { %v1284_v24 = vsel %vm1249_vm3, %v433_v53, %v1126_v39 }
 0x1ef   :  { %v1352_v61 = vadd.f32 %v6102_v18, %v1284_v24  ;;  %v102_v24 = vld [vmem:[%s7778_s0 + $0x198] sm:$0xff] }
 0x1f1   :  { %v1416_v8 = vmax.f32 %v1352_v61, 0.0  ;;  %v1684_v61 = vld [vmem:[#allocation2 + $0x1fa] ss:$2 sm:$0xff] }
 0x1f2   :  { %v939_v20 = vpop.f32.mrf.mxu1  ;;  %5087 = vmatmul.msk.f32.gmra.mxu2 %vm1446_vm2, %v1684_v61 }
 0x1f3   :  { %1603 = vst.msk [vmem:[#allocation2 + $0x22a] sm:$0xff] %vm1446_vm2, %v1416_v8  ;;  %1149 = vrot.lane.b32.xlu1 %v939_v20, %s5444_s30  ;;  %4999 = vmatmul.msk.f32.gmra.mxu0 %vm117_vm1, %v102_v24  ;;  %v1651_v8 = vld [vmem:[#allocation2 + $0x1f9] ss:$2 sm:$0xff] }
 0x1f4   :  { %5104 = vmatmul.msk.f32.gmra.mxu3 %vm1446_vm2, %v1651_v8  ;;  %v105_v8 = vld [vmem:[%s7778_s0 + $0x1b0] sm:$0xff] }
 0x1f5   :  { %v1128_v42 = vpop.permute.xlu2 %1127  ;;  %v436_v63 = vpop.f32.mrf.mxu0 }
 0x1f6   :  { %v1285_v53 = vsel %vm1249_vm3, %v436_v63, %v1128_v42 }
 0x1f7   :  { %v1353_v39 = vadd.f32 %v6102_v18, %v1285_v53 }
 0x1f9   :  { %v1417_v22 = vmax.f32 %v1353_v39, 0.0  ;;  %v104_v39 = vld [vmem:[%s7778_s0 + $0x1a8] sm:$0xff] }
 0x1fa   :  { %v942_v20 = vpop.f32.mrf.mxu1 }
 0x1fb   :  { %1604 = vst.msk [vmem:[#allocation2 + $0x232] sm:$0xff] %vm1446_vm2, %v1417_v22  ;;  %1151 = vrot.lane.b32.xlu2 %v942_v20, %s5444_s30  ;;  %5000 = vmatmul.msk.f32.gmra.mxu0 %vm117_vm1, %v103_v33 }
 0x1fd   :  { %v6410_v59 = vpop.f32.mrf.mxu0 }
 0x1fe   :  { %7811 = vst [vmem:[#allocation23_spill] sm:$0xff] %v6410_v59 }
 0x202   :  { %v6416_v42 = vpop.f32.mrf.mxu1  ;;  %v1686_v63 = vld [vmem:[#allocation2 + $0x22a] ss:$2 sm:$0xff]  ;;  %v1653_v24 = vld [vmem:[#allocation2 + $0x229] ss:$2 sm:$0xff] }
 0x203   :  { %5088 = vmatmul.msk.f32.gmra.mxu2 %vm1446_vm2, %v1686_v63  ;;  %5105 = vmatmul.msk.f32.gmra.mxu3 %vm1446_vm2, %v1653_v24  ;;  %v106_v63 = vld [vmem:[%s7778_s0 + $0x1b8] sm:$0xff] }
 0x204   :  { %5001 = vmatmul.msk.f32.gmra.mxu0 %vm117_vm1, %v104_v39 }
 0x205   :  { %v6420_v53 = vpop.f32.mrf.mxu0 }
 0x206   :  { %7812 = vst [vmem:[#allocation24_spill] sm:$0xff] %v6420_v53 }
 0x20a   :  { %v6426_v22 = vpop.f32.mrf.mxu1 }
 0x20c   :  { %5002 = vmatmul.msk.f32.gmra.mxu0 %vm117_vm1, %v105_v8 }
 0x20d   :  { %v445_v61 = vpop.f32.mrf.mxu0 }
 0x212   :  { %v951_v20 = vpop.f32.mrf.mxu1 }
 0x213   :  { %1157 = vrot.lane.b32.xlu0 %v951_v20, %s5444_s30  ;;  %v107_v20 = vld [vmem:[%s7778_s0 + $0x1c0] sm:$0xff] }
 0x214   :  { %5003 = vmatmul.msk.f32.gmra.mxu0 %vm117_vm1, %v106_v63 }
 0x215   :  { %v448_v33 = vpop.f32.mrf.mxu0 }
 0x21a   :  { %v954_v45 = vpop.f32.mrf.mxu1 }
 0x21b   :  { %1159 = vrot.lane.b32.xlu1 %v954_v45, %s5444_s30 }
 0x21c   :  { %5004 = vmatmul.msk.f32.gmra.mxu0 %vm117_vm1, %v107_v20 }
 0x21d   :  { %v6441_v8 = vpop.f32.mrf.mxu0 }
 0x21e   :  { %7813 = vst [vmem:[#allocation25_spill] sm:$0xff] %v6441_v8 }
 0x223   :  { %1059 = vrot.lane.b32.xlu1 %v5652_v32, %s5444_s30 }
 0x225   :  { %v1134_v24 = vpop.permute.xlu0 %1133  ;;  %v6458_v63 = vpop.f32.mrf.mxu0 }
 0x226   :  { %v1288_v39 = vsel %vm1249_vm3, %v445_v61, %v1134_v24  ;;  %v583_v61 = vld [vmem:[%s7779_s1 + $0x1e0] sm:$0xff]  ;;  %7814 = vst [vmem:[#allocation26_spill] sm:$0xff] %v6458_v63 }
 0x227   :  { %v1356_v59 = vadd.f32 %v6102_v18, %v1288_v39  ;;  %5073 = vmatmul.msk.f32.gmra.mxu1 %vm117_vm1, %v583_v61 }
 0x229   :  { %v1420_v53 = vmax.f32 %v1356_v59, 0.0 }
 0x22b   :  { %1607 = vst.msk [vmem:[#allocation2 + $0x25a] sm:$0xff] %vm1446_vm2, %v1420_v53  ;;  %v6453_v53 = vpop.f32.mrf.mxu1 }
 0x22d   :  { %v1136_v3 = vpop.permute.xlu1 %1135  ;;  %v1142_v61 = vpop.permute.xlu2 %1141 }
 0x22e   :  { %v1289_v24 = vsel %vm1249_vm3, %v448_v33, %v1136_v3  ;;  %v108_v3 = vld [vmem:[%s7778_s0 + $0x1c8] sm:$0xff]  ;;  %v457_v32 = vpop.f32.mrf.mxu0 }
 0x22f   :  { %v1357_v59 = vadd.f32 %v6102_v18, %v1289_v24  ;;  %5005 = vmatmul.msk.f32.gmra.mxu0 %vm117_vm1, %v108_v3  ;;  %v109_v24 = vld [vmem:[%s7778_s0 + $0x1d0] sm:$0xff] }
 0x231   :  { %v1421_v45 = vmax.f32 %v1357_v59, 0.0  ;;  %v1292_v59 = vsel %vm1249_vm3, %v457_v32, %v1142_v61 }
 0x233   :  { %1608 = vst.msk [vmem:[#allocation2 + $0x262] sm:$0xff] %vm1446_vm2, %v1421_v45  ;;  %v6464_v33 = vpop.f32.mrf.mxu1  ;;  %v1360_v45 = vadd.f32 %v6102_v18, %v1292_v59 }
 0x235   :  { %v1424_v3 = vmax.f32 %v1360_v45, 0.0 }
 0x237   :  { %5006 = vmatmul.msk.f32.gmra.mxu0 %vm117_vm1, %v109_v24  ;;  %1611 = vst.msk [vmem:[#allocation2 + $0x28a] sm:$0xff] %vm1446_vm2, %v1424_v3 }
 0x23a   :  { %v1688_v39 = vld [vmem:[#allocation2 + $0x25a] ss:$2 sm:$0xff]  ;;  %v1655_v20 = vld [vmem:[#allocation2 + $0x259] ss:$2 sm:$0xff] }
 0x23b   :  { %5089 = vmatmul.msk.f32.gmra.mxu2 %vm1446_vm2, %v1688_v39  ;;  %5106 = vmatmul.msk.f32.gmra.mxu3 %vm1446_vm2, %v1655_v20  ;;  %v963_v63 = vpop.f32.mrf.mxu1  ;;  %v460_v39 = vpop.f32.mrf.mxu0  ;;  %v110_v20 = vld [vmem:[%s7778_s0 + $0x1d8] sm:$0xff] }
 0x23c   :  { %1165 = vrot.lane.b32.xlu2 %v963_v63, %s5444_s30 }
 0x23f   :  { %5007 = vmatmul.msk.f32.gmra.mxu0 %vm117_vm1, %v110_v20 }
 0x243   :  { %v966_v8 = vpop.f32.mrf.mxu1  ;;  %v6481_v61 = vpop.f32.mrf.mxu0 }
 0x244   :  { %1167 = vrot.lane.b32.xlu0 %v966_v8, %s5444_s30  ;;  %7815 = vst [vmem:[#allocation27_spill] sm:$0xff] %v6481_v61 }
 0x24b   :  { %v6483_v32 = vpop.f32.mrf.mxu1  ;;  %v6487_v24 = vpop.f32.mrf.mxu0 }
 0x24c   :  { %1057 = vrot.lane.b32.xlu0 %v5642_v29, %s5444_s30  ;;  %7816 = vst [vmem:[#allocation28_spill] sm:$0xff] %v6487_v24 }
 0x24d   :  { %v1144_v59 = vpop.permute.xlu0 %1143 }
 0x24e   :  { %v1293_v3 = vsel %vm1249_vm3, %v460_v39, %v1144_v59  ;;  %v584_v39 = vld [vmem:[%s7779_s1 + $0x1e8] sm:$0xff] }
 0x24f   :  { %v1361_v8 = vadd.f32 %v6102_v18, %v1293_v3  ;;  %5074 = vmatmul.msk.f32.gmra.mxu1 %vm117_vm1, %v584_v39 }
 0x251   :  { %v1425_v20 = vmax.f32 %v1361_v8, 0.0 }
 0x253   :  { %v6489_v63 = vpop.f32.mrf.mxu1  ;;  %v469_v45 = vpop.f32.mrf.mxu0  ;;  %1612 = vst.msk [vmem:[#allocation2 + $0x292] sm:$0xff] %vm1446_vm2, %v1425_v20 }
 0x254   :  { %1063 = vrot.lane.b32.xlu0 %v5672_v38, %s5444_s30 }
 0x255   :  { %v1152_v29 = vpop.permute.xlu2 %1151 }
 0x25a   :  { %v1690_v8 = vld [vmem:[#allocation2 + $0x28a] ss:$2 sm:$0xff]  ;;  %v1657_v20 = vld [vmem:[#allocation2 + $0x289] ss:$2 sm:$0xff] }
 0x25b   :  { %v975_v61 = vpop.f32.mrf.mxu1  ;;  %v472_v24 = vpop.f32.mrf.mxu0  ;;  %5090 = vmatmul.msk.f32.gmra.mxu2 %vm1446_vm2, %v1690_v8  ;;  %5107 = vmatmul.msk.f32.gmra.mxu3 %vm1446_vm2, %v1657_v20 }
 0x25c   :  { %1069 = vrot.lane.b32.xlu0 %v5702_v47, %s5444_s30  ;;  %1173 = vrot.lane.b32.xlu1 %v975_v61, %s5444_s30  ;;  %v1297_v34 = vsel %vm1249_vm3, %v472_v24, %v1152_v29 }
 0x25d   :  { %v1365_v38 = vadd.f32 %v6102_v18, %v1297_v34 }
 0x25f   :  { %v1429_v59 = vmax.f32 %v1365_v38, 0.0 }
 0x261   :  { %1616 = vst.msk [vmem:[#allocation2 + $0x2c2] sm:$0xff] %vm1446_vm2, %v1429_v59  ;;  %v113_v59 = vld [vmem:[%s7778_s0 + $0x1f0] sm:$0xff] }
 0x263   :  { %v978_v3 = vpop.f32.mrf.mxu1  ;;  %v6513_v47 = vpop.f32.mrf.mxu0 }
 0x264   :  { %1075 = vrot.lane.b32.xlu0 %v5736_v58, %s5444_s30  ;;  %1065 = vrot.lane.b32.xlu1 %v5682_v41, %s5444_s30 }
 0x265   :  { %1175 = vrot.lane.b32.xlu2 %v978_v3, %s5444_s30  ;;  %v1150_v58 = vpop.permute.xlu1 %1149 }
 0x266   :  { %v1296_v41 = vsel %vm1249_vm3, %v469_v45, %v1150_v58 }
 0x267   :  { %v1364_v61 = vadd.f32 %v6102_v18, %v1296_v41 }
 0x269   :  { %v1428_v24 = vmax.f32 %v1364_v61, 0.0 }
 0x26b   :  { %v6521_v34 = vpop.f32.mrf.mxu0  ;;  %1615 = vst.msk [vmem:[#allocation2 + $0x2ba] sm:$0xff] %vm1446_vm2, %v1428_v24 }
 0x26c   :  { %1081 = vrot.lane.b32.xlu0 %v5772_v6, %s5444_s30  ;;  %1071 = vrot.lane.b32.xlu1 %v5712_v50, %s5444_s30 }
 0x26d   :  { %1061 = vrot.lane.b32.xlu2 %v5662_v35, %s5444_s30 }
 0x272   :  { %v1692_v50 = vld [vmem:[#allocation2 + $0x2ba] ss:$2 sm:$0xff]  ;;  %v1659_v6 = vld [vmem:[#allocation2 + $0x2b9] ss:$2 sm:$0xff] }
 0x273   :  { %v481_v35 = vpop.f32.mrf.mxu0  ;;  %5091 = vmatmul.msk.f32.gmra.mxu2 %vm1446_vm2, %v1692_v50  ;;  %5108 = vmatmul.msk.f32.gmra.mxu3 %vm1446_vm2, %v1659_v6 }
 0x274   :  { %1087 = vrot.lane.b32.xlu0 %v5806_v17, %s5444_s30  ;;  %1077 = vrot.lane.b32.xlu1 %v5748_v62, %s5444_s30 }
 0x275   :  { %1067 = vrot.lane.b32.xlu2 %v5692_v44, %s5444_s30 }
 0x27b   :  { %v484_v62 = vpop.f32.mrf.mxu0 }
 0x27c   :  { %1093 = vrot.lane.b32.xlu0 %v5842_v30, %s5444_s30  ;;  %1083 = vrot.lane.b32.xlu1 %v5784_v10, %s5444_s30 }
 0x27d   :  { %1073 = vrot.lane.b32.xlu2 %v5724_v54, %s5444_s30  ;;  %v111_v54 = vld [vmem:[%s7778_s0 + $0x1e0] sm:$0xff] }
 0x27e   :  { %5008 = vmatmul.msk.f32.gmra.mxu0 %vm117_vm1, %v111_v54 }
 0x283   :  { %v6546_v44 = vpop.f32.mrf.mxu0 }
 0x284   :  { %1099 = vrot.lane.b32.xlu0 %v5876_v46, %s5444_s30  ;;  %1089 = vrot.lane.b32.xlu1 %v5818_v21, %s5444_s30 }
 0x285   :  { %1079 = vrot.lane.b32.xlu2 %v5760_v2, %s5444_s30  ;;  %v1158_v10 = vpop.permute.xlu0 %1157 }
 0x286   :  { %v1300_v2 = vsel %vm1249_vm3, %v481_v35, %v1158_v10 }
 0x287   :  { %v1368_v21 = vadd.f32 %v6102_v18, %v1300_v2 }
 0x289   :  { %v1432_v30 = vmax.f32 %v1368_v21, 0.0 }
 0x28b   :  { %v6557_v17 = vpop.f32.mrf.mxu0  ;;  %1619 = vst.msk [vmem:[#allocation2 + $0x2ea] sm:$0xff] %vm1446_vm2, %v1432_v30  ;;  %v5130_v30 = vld [vmem:[%s7783_s5 + $0xc] sm:$0xf] }
 0x28c   :  { %1113 = vrot.lane.b32.xlu0 %v5954_v37, %s5444_s30  ;;  %1095 = vrot.lane.b32.xlu1 %v5854_v36, %s5444_s30 }
 0x28d   :  { %1085 = vrot.lane.b32.xlu2 %v5796_v14, %s5444_s30  ;;  %v112_v14 = vld [vmem:[%s7778_s0 + $0x1e8] sm:$0xff]  ;;  %v1160_v36 = vpop.permute.xlu1 %1159  ;;  %5131 = vmatpush.msk.msrb.mxu3 %vm1749_vm4, %v5130_v30 }
 0x28e   :  { %5009 = vmatmul.msk.f32.gmra.mxu0 %vm117_vm1, %v112_v14  ;;  %v1301_v37 = vsel %vm1249_vm3, %v484_v62, %v1160_v36 }
 0x28f   :  { %v1369_v29 = vadd.f32 %v6102_v18, %v1301_v37 }
 0x291   :  { %v1433_v38 = vmax.f32 %v1369_v29, 0.0 }
 0x293   :  { %v493_v45 = vpop.f32.mrf.mxu0  ;;  %1620 = vst.msk [vmem:[#allocation2 + $0x2f2] sm:$0xff] %vm1446_vm2, %v1433_v38 }
 0x294   :  { %1123 = vrot.lane.b32.xlu0 %v6026_v27, %s5444_s30  ;;  %1105 = vrot.lane.b32.xlu1 %v5910_v5, %s5444_s30 }
 0x295   :  { %1091 = vrot.lane.b32.xlu2 %v5830_v25, %s5444_s30  ;;  %v585_v25 = vld [vmem:[%s7779_s1 + $0x1f0] sm:$0xff]  ;;  %v1060_v3 = vpop.permute.xlu1 %1059 }
 0x296   :  { %v1166_v46 = vpop.permute.xlu2 %1165  ;;  %5075 = vmatmul.msk.f32.gmra.mxu1 %vm117_vm1, %v585_v25  ;;  %5010 = vmatmul.msk.f32.gmra.mxu0 %vm117_vm1, %v113_v59 }
 0x297   :  { %v1304_v27 = vsel %vm1249_vm3, %v493_v45, %v1166_v46 }
 0x298   :  { %v1372_v5 = vadd.f32 %v6102_v18, %v1304_v27 }
 0x29a   :  { %v1436_v39 = vmax.f32 %v1372_v5, 0.0  ;;  %v1694_v58 = vld [vmem:[#allocation2 + $0x2ea] ss:$2 sm:$0xff]  ;;  %v1661_v41 = vld [vmem:[#allocation2 + $0x2e9] ss:$2 sm:$0xff] }
 0x29b   :  { %5092 = vmatmul.msk.f32.gmra.mxu2 %vm1446_vm2, %v1694_v58  ;;  %5109 = vmatmul.msk.f32.gmra.mxu3 %vm1446_vm2, %v1661_v41 }
 0x29c   :  { %1137 = vrot.lane.b32.xlu0 %v6247_v51, %s5444_s30  ;;  %1115 = vrot.lane.b32.xlu1 %v5966_v48, %s5444_s30  ;;  %1623 = vst.msk [vmem:[#allocation2 + $0x31a] sm:$0xff] %vm1446_vm2, %v1436_v39  ;;  %v1251_v48 = vsel %vm1249_vm3, %v5729_v56, %v1060_v3  ;;  %v496_v51 = vpop.f32.mrf.mxu0  ;;  %v114_v56 = vld [vmem:[%s7778_s0 + $0x1f8] sm:$0xff] }
 0x29d   :  { %1097 = vrot.lane.b32.xlu2 %v5864_v40, %s5444_s30  ;;  %v1319_v8 = vadd.f32 %v6102_v18, %v1251_v48  ;;  %v586_v40 = vld [vmem:[%s7779_s1 + $0x1f8] sm:$0xff] }
 0x29e   :  { %5076 = vmatmul.msk.f32.gmra.mxu1 %vm117_vm1, %v586_v40  ;;  %5011 = vmatmul.msk.f32.gmra.mxu0 %vm117_vm1, %v114_v56 }
 0x29f   :  { %v1383_v20 = vmax.f32 %v1319_v8, 0.0 }
 0x2a1   :  { %1570 = vst.msk [vmem:[#allocation2 + $0x3a] sm:$0xff] %vm1446_vm2, %v1383_v20 }
 0x2a4   :  { %1147 = vrot.lane.b32.xlu0 %v6386_v31, %s5444_s30  ;;  %1129 = vrot.lane.b32.xlu1 %v6092_v7, %s5444_s30  ;;  %v6612_v31 = vpop.f32.mrf.mxu0  ;;  %v1668_v7 = vld [vmem:[#allocation2 + $0x1a] ss:$2 sm:$0xff]  ;;  %v981_v54 = vpop.f32.mrf.mxu1 }
 0x2a5   :  { %1107 = vrot.lane.b32.xlu2 %v5920_v11, %s5444_s30  ;;  %v1635_v11 = vld [vmem:[#allocation2 + $0x19] ss:$2 sm:$0xff] }
 0x2a6   :  { %5096 = vmatmul.msk.f32.vlgmr.msrb.gmra.mxu1 %vm1446_vm2, %v1635_v11  ;;  %5079 = vmatmul.msk.f32.vlgmr.msrb.gmra.mxu0 %vm1446_vm2, %v1668_v7 }
 0x2ac   :  { %1161 = vrot.lane.b32.xlu0 %v6453_v53, %s5444_s30  ;;  %1139 = vrot.lane.b32.xlu1 %v6276_v12, %s5444_s30  ;;  %v6622_v61 = vpop.f32.mrf.mxu0 }
 0x2ad   :  { %1121 = vrot.lane.b32.xlu2 %v6000_v16, %s5444_s30 }
 0x2b4   :  { %1171 = vrot.lane.b32.xlu0 %v6489_v63, %s5444_s30  ;;  %1153 = vrot.lane.b32.xlu1 %v6416_v42, %s5444_s30  ;;  %v505_v53 = vpop.f32.mrf.mxu0 }
 0x2b5   :  { %1131 = vrot.lane.b32.xlu2 %v6121_v57, %s5444_s30 }
 0x2b6   :  { %v1168_v12 = vpop.permute.xlu0 %1167 }
 0x2b7   :  { %v1305_v16 = vsel %vm1249_vm3, %v496_v51, %v1168_v12 }
 0x2b8   :  { %v1373_v24 = vadd.f32 %v6102_v18, %v1305_v16 }
 0x2ba   :  { %v1437_v35 = vmax.f32 %v1373_v24, 0.0 }
 0x2bc   :  { %1624 = vst.msk [vmem:[#allocation2 + $0x322] sm:$0xff] %vm1446_vm2, %v1437_v35  ;;  %1117 = vrot.lane.b32.xlu0 %v5976_v55, %s5444_s30  ;;  %1163 = vrot.lane.b32.xlu1 %v6464_v33, %s5444_s30  ;;  %v508_v50 = vpop.f32.mrf.mxu0 }
 0x2bd   :  { %1145 = vrot.lane.b32.xlu2 %v6362_v26, %s5444_s30  ;;  %v5112_v26 = vld [vmem:[%s7783_s5 + $0x8] sm:$0xf] }
 0x2be   :  { %v1058_v42 = vpop.permute.xlu0 %1057  ;;  %5113 = vmatpush.msk.msrb.mxu2 %vm1749_vm4, %v5112_v26 }
 0x2bf   :  { %v1250_v57 = vsel %vm1249_vm3, %v5717_v52, %v1058_v42  ;;  %v1176_v63 = vpop.permute.xlu2 %1175 }
 0x2c0   :  { %v1318_v6 = vadd.f32 %v6102_v18, %v1250_v57  ;;  %v1309_v62 = vsel %vm1249_vm3, %v508_v50, %v1176_v63 }
 0x2c1   :  { %v1377_v10 = vadd.f32 %v6102_v18, %v1309_v62 }
 0x2c2   :  { %v1382_v55 = vmax.f32 %v1318_v6, 0.0 }
 0x2c3   :  { %v1696_v2 = vld [vmem:[#allocation2 + $0x31a] ss:$2 sm:$0xff]  ;;  %v1663_v21 = vld [vmem:[#allocation2 + $0x319] ss:$2 sm:$0xff]  ;;  %v1441_v33 = vmax.f32 %v1377_v10, 0.0 }
 0x2c4   :  { %1569 = vst.msk [vmem:[#allocation2 + $0x32] sm:$0xff] %vm1446_vm2, %v1382_v55  ;;  %1177 = vrot.lane.b32.xlu1 %v981_v54, %s5444_s30  ;;  %5093 = vmatmul.msk.f32.gmra.mxu2 %vm1446_vm2, %v1696_v2  ;;  %v1935_v2 = vld [vmem:[#allocation2 + $0x1b] ss:$2 sm:$0xff] }
 0x2c5   :  { %1155 = vrot.lane.b32.xlu2 %v6426_v22, %s5444_s30  ;;  %5110 = vmatmul.msk.f32.gmra.mxu3 %vm1446_vm2, %v1663_v21  ;;  %1628 = vst.msk [vmem:[#allocation2 + $0x352] sm:$0xff] %vm1446_vm2, %v1441_v33 }
 0x2c6   :  { %v1064_v52 = vpop.permute.xlu0 %1063 }
 0x2c7   :  { %v1253_v14 = vsel %vm1249_vm3, %v5753_v0, %v1064_v52  ;;  %v1062_v36 = vpop.permute.xlu2 %1061  ;;  %v7817_v52 = vld [vmem:[#allocation6_spill] sm:$0xff] }
 0x2c8   :  { %v1321_v22 = vadd.f32 %v6102_v18, %v1253_v14  ;;  %v1252_v46 = vsel %vm1249_vm3, %v5741_v60, %v1062_v36 }
 0x2c9   :  { %v1320_v37 = vadd.f32 %v6102_v18, %v1252_v46 }
 0x2ca   :  { %v1385_v45 = vmax.f32 %v1321_v22, 0.0  ;;  %v7818_v22 = vld [vmem:[#allocation8_spill] sm:$0xff] }
 0x2cb   :  { %v1384_v29 = vmax.f32 %v1320_v37, 0.0 }
 0x2cc   :  { %1572 = vst.msk [vmem:[#allocation2 + $0x52] sm:$0xff] %vm1446_vm2, %v1385_v45  ;;  %1119 = vrot.lane.b32.xlu1 %v5988_v1, %s5444_s30  ;;  %v984_v63 = vpop.f32.mrf.mxu1 }
 0x2cd   :  { %1571 = vst.msk [vmem:[#allocation2 + $0x4a] sm:$0xff] %vm1446_vm2, %v1384_v29  ;;  %1169 = vrot.lane.b32.xlu2 %v6483_v32, %s5444_s30 }
 0x2ce   :  { %v1070_v0 = vpop.permute.xlu0 %1069  ;;  %v1174_v27 = vpop.permute.xlu1 %1173 }
 0x2cf   :  { %v1256_v5 = vsel %vm1249_vm3, %v5794_v13, %v1070_v0  ;;  %v1308_v60 = vsel %vm1249_vm3, %v505_v53, %v1174_v27  ;;  %v1068_v38 = vpop.permute.xlu2 %1067 }
 0x2d0   :  { %v1324_v39 = vadd.f32 %v6102_v18, %v1256_v5  ;;  %v1376_v25 = vadd.f32 %v6102_v18, %v1308_v60  ;;  %v1255_v1 = vsel %vm1249_vm3, %v5781_v9, %v1068_v38 }
 0x2d1   :  { %v1323_v59 = vadd.f32 %v6102_v18, %v1255_v1  ;;  %v7820_v1 = vld [vmem:[#allocation7_spill] sm:$0xff] }
 0x2d2   :  { %v1388_v3 = vmax.f32 %v1324_v39, 0.0  ;;  %v1440_v48 = vmax.f32 %v1376_v25, 0.0  ;;  %v7819_v39 = vld [vmem:[#allocation11_spill] sm:$0xff] }
 0x2d3   :  { %v1387_v32 = vmax.f32 %v1323_v59, 0.0 }
 0x2d4   :  { %1575 = vst.msk [vmem:[#allocation2 + $0x7a] sm:$0xff] %vm1446_vm2, %v1388_v3  ;;  %v1670_v51 = vld [vmem:[#allocation2 + $0x4a] ss:$2 sm:$0xff]  ;;  %v1637_v8 = vld [vmem:[#allocation2 + $0x49] ss:$2 sm:$0xff] }
 0x2d5   :  { %1627 = vst.msk [vmem:[#allocation2 + $0x34a] sm:$0xff] %vm1446_vm2, %v1440_v48  ;;  %5080 = vmatmul.msk.f32.gmra.mxu0 %vm1446_vm2, %v1670_v51  ;;  %5097 = vmatmul.msk.f32.gmra.mxu1 %vm1446_vm2, %v1637_v8  ;;  %v1937_v5 = vld [vmem:[#allocation2 + $0x4b] ss:$2 sm:$0xff]  ;;  %v6737_v48 = vld [vmem:[%s7782_s4] ss:$0 sm:$0xff]  ;;  %v7821_v8 = vld [vmem:[#allocation10_spill] sm:$0xff] }
 0x2d6   :  { %1574 = vst.msk [vmem:[#allocation2 + $0x6a] sm:$0xff] %vm1446_vm2, %v1387_v32  ;;  %v1076_v13 = vpop.permute.xlu0 %1075  ;;  %v1066_v20 = vpop.permute.xlu1 %1065  ;;  %1179 = vrot.lane.b32.xlu2 %v984_v63, %s5444_s30 }
 0x2d7   :  { %v1259_v9 = vsel %vm1249_vm3, %v5839_v28, %v1076_v13  ;;  %v1254_v58 = vsel %vm1249_vm3, %v5766_v4, %v1066_v20  ;;  %v1074_v41 = vpop.permute.xlu2 %1073 }
 0x2d8   :  { %v1327_v40 = vadd.f32 %v6102_v18, %v1259_v9  ;;  %v1322_v56 = vadd.f32 %v6102_v18, %v1254_v58  ;;  %v1258_v11 = vsel %vm1249_vm3, %v5824_v23, %v1074_v41 }
 0x2d9   :  { %v1326_v7 = vadd.f32 %v6102_v18, %v1258_v11 }
 0x2da   :  { %v1391_v12 = vmax.f32 %v1327_v40, 0.0  ;;  %v1386_v16 = vmax.f32 %v1322_v56, 0.0 }
 0x2db   :  { %v1390_v53 = vmax.f32 %v1326_v7, 0.0 }
 0x2dc   :  { %1578 = vst.msk [vmem:[#allocation2 + $0x9a] sm:$0xff] %vm1446_vm2, %v1391_v12  ;;  %v1698_v24 = vld [vmem:[#allocation2 + $0x34a] ss:$2 sm:$0xff]  ;;  %v1665_v28 = vld [vmem:[#allocation2 + $0x349] ss:$2 sm:$0xff] }
 0x2dd   :  { %1573 = vst.msk [vmem:[#allocation2 + $0x62] sm:$0xff] %vm1446_vm2, %v1386_v16  ;;  %5094 = vmatmul.msk.f32.gmra.mxu2 %vm1446_vm2, %v1698_v24  ;;  %5111 = vmatmul.msk.f32.gmra.mxu3 %vm1446_vm2, %v1665_v28  ;;  %v7823_v28 = vld [vmem:[#allocation9_spill] sm:$0xff] }
 0x2de   :  { %1577 = vst.msk [vmem:[#allocation2 + $0x92] sm:$0xff] %vm1446_vm2, %v1390_v53  ;;  %v1082_v4 = vpop.permute.xlu0 %1081  ;;  %v1072_v35 = vpop.permute.xlu1 %1071  ;;  %v7822_v53 = vld [vmem:[#allocation14_spill] sm:$0xff] }
 0x2df   :  { %v1262_v23 = vsel %vm1249_vm3, %v5882_v49, %v1082_v4  ;;  %v1257_v42 = vsel %vm1249_vm3, %v5811_v19, %v1072_v35  ;;  %v1080_v57 = vpop.permute.xlu2 %1079  ;;  %v2101_v19 = vld [vmem:[#allocation2 + $0x31] ss:$2 sm:$0xff] }
 0x2e0   :  { %v1330_v50 = vadd.f32 %v6102_v18, %v1262_v23  ;;  %v1325_v6 = vadd.f32 %v6102_v18, %v1257_v42  ;;  %v1261_v62 = vsel %vm1249_vm3, %v5869_v43, %v1080_v57  ;;  %v3128_v23 = vld [vmem:[%s7784_s6] sm:$0xf]  ;;  %v5273_v42 = vld [vmem:[%s7784_s6 + $0x8] sm:$0xf] }
 0x2e1   :  { %v1329_v54 = vadd.f32 %v6102_v18, %v1261_v62  ;;  %5256 = vmatpush.msk.msra.mxu0 %vm1749_vm4, %v3128_v23  ;;  %5274 = vmatpush.msk.msra.mxu1 %vm1749_vm4, %v5273_v42 }
 0x2e2   :  { %v1394_v10 = vmax.f32 %v1330_v50, 0.0  ;;  %v1389_v55 = vmax.f32 %v1325_v6, 0.0  ;;  %v7824_v50 = vld [vmem:[#allocation13_spill] sm:$0xff] }
 0x2e3   :  { %v1393_v49 = vmax.f32 %v1329_v54, 0.0 }
 0x2e4   :  { %1581 = vst.msk [vmem:[#allocation2 + $0xc2] sm:$0xff] %vm1446_vm2, %v1394_v10  ;;  %v2103_v60 = vld [vmem:[#allocation2 + $0x61] ss:$2 sm:$0xff] }
 0x2e5   :  { %1576 = vst.msk [vmem:[#allocation2 + $0x82] sm:$0xff] %vm1446_vm2, %v1389_v55  ;;  %5114 = vmatmul.msk.f32.vlgmr.msrb.gmra.mxu2 %vm1446_vm2, %v1935_v2  ;;  %5132 = vmatmul.msk.f32.vlgmr.msrb.gmra.mxu3 %vm1446_vm2, %v2101_v19  ;;  %v2105_v7 = vld [vmem:[#allocation2 + $0x91] ss:$2 sm:$0xff] }
 0x2e6   :  { %1580 = vst.msk [vmem:[#allocation2 + $0xb2] sm:$0xff] %vm1446_vm2, %v1393_v49  ;;  %v1088_v43 = vpop.permute.xlu0 %1087  ;;  %v1078_v21 = vpop.permute.xlu1 %1077 }
 0x2e7   :  { %v1265_v33 = vsel %vm1249_vm3, %v5925_v15, %v1088_v43  ;;  %v1260_v26 = vsel %vm1249_vm3, %v7817_v52, %v1078_v21  ;;  %v1086_v30 = vpop.permute.xlu2 %1085  ;;  %v7825_v52 = vld [vmem:[#allocation17_spill] sm:$0xff] }
 0x2e8   :  { %v1333_v14 = vadd.f32 %v6102_v18, %v1265_v33  ;;  %v1328_v36 = vadd.f32 %v6102_v18, %v1260_v26  ;;  %v1264_v46 = vsel %vm1249_vm3, %v7818_v22, %v1086_v30  ;;  %v7826_v30 = vld [vmem:[#allocation12_spill] sm:$0xff] }
 0x2e9   :  { %v1332_v37 = vadd.f32 %v6102_v18, %v1264_v46 }
 0x2ea   :  { %v1397_v45 = vmax.f32 %v1333_v14, 0.0  ;;  %v1392_v29 = vmax.f32 %v1328_v36, 0.0 }
 0x2eb   :  { %v1396_v0 = vmax.f32 %v1332_v37, 0.0  ;;  %v7827_v37 = vld [vmem:[#allocation16_spill] sm:$0xff] }
 0x2ec   :  { %1584 = vst.msk [vmem:[#allocation2 + $0xe2] sm:$0xff] %vm1446_vm2, %v1397_v45  ;;  %v1672_v27 = vld [vmem:[#allocation2 + $0x7a] ss:$2 sm:$0xff]  ;;  %v1639_v15 = vld [vmem:[#allocation2 + $0x79] ss:$2 sm:$0xff] }
 0x2ed   :  { %1579 = vst.msk [vmem:[#allocation2 + $0xaa] sm:$0xff] %vm1446_vm2, %v1392_v29  ;;  %5081 = vmatmul.msk.f32.gmra.mxu0 %vm1446_vm2, %v1672_v27  ;;  %5098 = vmatmul.msk.f32.gmra.mxu1 %vm1446_vm2, %v1639_v15  ;;  %v1939_v11 = vld [vmem:[#allocation2 + $0x7b] ss:$2 sm:$0xff] }
 0x2ee   :  { %1583 = vst.msk [vmem:[#allocation2 + $0xda] sm:$0xff] %vm1446_vm2, %v1396_v0  ;;  %5115 = vmatmul.msk.f32.gmra.mxu2 %vm1446_vm2, %v1937_v5  ;;  %5133 = vmatmul.msk.f32.gmra.mxu3 %vm1446_vm2, %v2103_v60  ;;  %v1094_v18 = vpop.permute.xlu0 %1093  ;;  %v1084_v38 = vpop.permute.xlu1 %1083 }
 0x2ef   :  { %v1268_v25 = vsel %vm1249_vm3, %v7819_v39, %v1094_v18  ;;  %v1263_v59 = vsel %vm1249_vm3, %v7820_v1, %v1084_v38  ;;  %v1092_v3 = vpop.permute.xlu2 %1091  ;;  %v7828_v39 = vld [vmem:[#allocation22_spill] sm:$0xff]  ;;  %v7829_v1 = vld [vmem:[#allocation15_spill] sm:$0xff] }
 0x2f0   :  { %v1336_v32 = vadd.f32 %v6737_v48, %v1268_v25  ;;  %v1331_v51 = vadd.f32 %v6737_v48, %v1263_v59  ;;  %v1267_v13 = vsel %vm1249_vm3, %v7821_v8, %v1092_v3  ;;  %v7830_v8 = vld [vmem:[#allocation21_spill] sm:$0xff] }
 0x2f1   :  { %v1335_v20 = vadd.f32 %v6737_v48, %v1267_v13 }
 0x2f2   :  { %v1400_v9 = vmax.f32 %v1336_v32, 0.0  ;;  %v1395_v58 = vmax.f32 %v1331_v51, 0.0 }
 0x2f3   :  { %v1399_v41 = vmax.f32 %v1335_v20, 0.0 }
 0x2f4   :  { %1587 = vst.msk [vmem:[#allocation2 + $0x10a] sm:$0xff] %vm1446_vm2, %v1400_v9  ;;  %v1674_v40 = vld [vmem:[#allocation2 + $0xaa] ss:$2 sm:$0xff]  ;;  %v1641_v56 = vld [vmem:[#allocation2 + $0xa9] ss:$2 sm:$0xff] }
 0x2f5   :  { %1582 = vst.msk [vmem:[#allocation2 + $0xca] sm:$0xff] %vm1446_vm2, %v1395_v58  ;;  %5082 = vmatmul.msk.f32.gmra.mxu0 %vm1446_vm2, %v1674_v40  ;;  %5099 = vmatmul.msk.f32.gmra.mxu1 %vm1446_vm2, %v1641_v56  ;;  %v1676_v2 = vld [vmem:[#allocation2 + $0xda] ss:$2 sm:$0xff]  ;;  %v1643_v49 = vld [vmem:[#allocation2 + $0xd9] ss:$2 sm:$0xff] }
 0x2f6   :  { %1586 = vst.msk [vmem:[#allocation2 + $0xfa] sm:$0xff] %vm1446_vm2, %v1399_v41  ;;  %5116 = vmatmul.msk.f32.gmra.mxu2 %vm1446_vm2, %v1939_v11  ;;  %5134 = vmatmul.msk.f32.gmra.mxu3 %vm1446_vm2, %v2105_v7  ;;  %v1100_v12 = vpop.permute.xlu0 %1099  ;;  %v1090_v16 = vpop.permute.xlu1 %1089  ;;  %v1941_v43 = vld [vmem:[#allocation2 + $0xab] ss:$2 sm:$0xff]  ;;  %v1943_v60 = vld [vmem:[#allocation2 + $0xdb] ss:$2 sm:$0xff] }
 0x2f7   :  { %v1271_v24 = vsel %vm1249_vm3, %v7822_v53, %v1100_v12  ;;  %v1266_v4 = vsel %vm1249_vm3, %v7823_v28, %v1090_v16  ;;  %v1098_v35 = vpop.permute.xlu2 %1097  ;;  %v7831_v53 = vld [vmem:[#allocation25_spill] sm:$0xff]  ;;  %v7832_v28 = vld [vmem:[#allocation18_spill] sm:$0xff] }
 0x2f8   :  { %v1339_v57 = vadd.f32 %v6737_v48, %v1271_v24  ;;  %v1334_v63 = vadd.f32 %v6737_v48, %v1266_v4  ;;  %v1270_v6 = vsel %vm1249_vm3, %v7824_v50, %v1098_v35 }
 0x2f9   :  { %v1338_v62 = vadd.f32 %v6737_v48, %v1270_v6 }
 0x2fa   :  { %v1403_v54 = vmax.f32 %v1339_v57, 0.0  ;;  %v1398_v10 = vmax.f32 %v1334_v63, 0.0  ;;  %v7833_v57 = vld [vmem:[#allocation24_spill] sm:$0xff] }
 0x2fb   :  { %v1402_v55 = vmax.f32 %v1338_v62, 0.0 }
 0x2fc   :  { %1590 = vst.msk [vmem:[#allocation2 + $0x12a] sm:$0xff] %vm1446_vm2, %v1403_v54  ;;  %v2107_v19 = vld [vmem:[#allocation2 + $0xc1] ss:$2 sm:$0xff]  ;;  %v3097_v54 = vld [vmem:[#allocation2] ss:$2 sm:$0xff] }
 0x2fd   :  { %1585 = vst.msk [vmem:[#allocation2 + $0xf2] sm:$0xff] %vm1446_vm2, %v1398_v10  ;;  %5083 = vmatmul.msk.f32.gmra.mxu0 %vm1446_vm2, %v1676_v2  ;;  %5100 = vmatmul.msk.f32.gmra.mxu1 %vm1446_vm2, %v1643_v49  ;;  %v3396_v10 = vld [vmem:[#allocation2 + $0x4] ss:$2 sm:$0xff]  ;;  %v6814_v2 = vpop.f32.mrf.mxu2 }
 0x2fe   :  { %1589 = vst.msk [vmem:[#allocation2 + $0x122] sm:$0xff] %vm1446_vm2, %v1402_v55  ;;  %5117 = vmatmul.msk.f32.gmra.mxu2 %vm1446_vm2, %v1941_v43  ;;  %5135 = vmatmul.msk.f32.gmra.mxu3 %vm1446_vm2, %v2107_v19  ;;  %v1114_v21 = vpop.permute.xlu0 %1113  ;;  %v1096_v33 = vpop.permute.xlu1 %1095  ;;  %v1947_v43 = vld [vmem:[#allocation2 + $0x13b] ss:$2 sm:$0xff] }
 0x2ff   :  { %v1278_v26 = vsel %vm1249_vm3, %v7825_v52, %v1114_v21  ;;  %v1269_v14 = vsel %vm1249_vm3, %v7826_v30, %v1096_v33  ;;  %v1108_v36 = vpop.permute.xlu2 %1107  ;;  %v6817_v19 = vpop.f32.mrf.mxu3  ;;  %v7834_v52 = vld [vmem:[#allocation28_spill] sm:$0xff]  ;;  %v7835_v30 = vld [vmem:[#allocation23_spill] sm:$0xff] }
 0x300   :  { %v1346_v22 = vadd.f32 %v6737_v48, %v1278_v26  ;;  %v1337_v46 = vadd.f32 %v6737_v48, %v1269_v14  ;;  %v1275_v45 = vsel %vm1249_vm3, %v7827_v37, %v1108_v36  ;;  %v7836_v37 = vld [vmem:[#allocation27_spill] sm:$0xff] }
 0x301   :  { %v1343_v29 = vadd.f32 %v6737_v48, %v1275_v45 }
 0x302   :  { %v1410_v0 = vmax.f32 %v1346_v22, 0.0  ;;  %v1401_v27 = vmax.f32 %v1337_v46, 0.0 }
 0x303   :  { %v1407_v15 = vmax.f32 %v1343_v29, 0.0 }
 0x304   :  { %1597 = vst.msk [vmem:[#allocation2 + $0x182] sm:$0xff] %vm1446_vm2, %v1410_v0  ;;  %v2109_v5 = vld [vmem:[#allocation2 + $0xf1] ss:$2 sm:$0xff] }
 0x305   :  { %1588 = vst.msk [vmem:[#allocation2 + $0x112] sm:$0xff] %vm1446_vm2, %v1401_v27  ;;  %v2111_v7 = vld [vmem:[#allocation2 + $0x121] ss:$2 sm:$0xff] }
 0x306   :  { %1594 = vst.msk [vmem:[#allocation2 + $0x15a] sm:$0xff] %vm1446_vm2, %v1407_v15  ;;  %5118 = vmatmul.msk.f32.gmra.mxu2 %vm1446_vm2, %v1943_v60  ;;  %5136 = vmatmul.msk.f32.gmra.mxu3 %vm1446_vm2, %v2109_v5  ;;  %v1124_v18 = vpop.permute.xlu0 %1123  ;;  %v1106_v38 = vpop.permute.xlu1 %1105  ;;  %v3099_v5 = vld [vmem:[#allocation2 + $0x30] ss:$2 sm:$0xff] }
 0x307   :  { %v1283_v25 = vsel %vm1249_vm3, %v7828_v39, %v1124_v18  ;;  %v1274_v59 = vsel %vm1249_vm3, %v7829_v1, %v1106_v38  ;;  %v1122_v3 = vpop.permute.xlu2 %1121  ;;  %v6834_v60 = vpop.f32.mrf.mxu2  ;;  %v3398_v38 = vld [vmem:[#allocation2 + $0x34] ss:$2 sm:$0xff] }
 0x308   :  { %v1351_v32 = vadd.f32 %v6737_v48, %v1283_v25  ;;  %v1342_v51 = vadd.f32 %v6737_v48, %v1274_v59  ;;  %v1282_v13 = vsel %vm1249_vm3, %v7830_v8, %v1122_v3  ;;  %v6837_v39 = vpop.f32.mrf.mxu3  ;;  %v1949_v25 = vld [vmem:[#allocation2 + $0x16b] ss:$2 sm:$0xff] }
 0x309   :  { %v1350_v20 = vadd.f32 %v6737_v48, %v1282_v13 }
 0x30a   :  { %v1415_v9 = vmax.f32 %v1351_v32, 0.0  ;;  %v1406_v58 = vmax.f32 %v1342_v51, 0.0  ;;  %v7837_v51 = vld [vmem:[#allocation26_spill] sm:$0xff] }
 0x30b   :  { %v1414_v41 = vmax.f32 %v1350_v20, 0.0 }
 0x30c   :  { %1602 = vst.msk [vmem:[#allocation2 + $0x21a] sm:$0xff] %vm1446_vm2, %v1415_v9  ;;  %v1678_v40 = vld [vmem:[#allocation2 + $0x10a] ss:$2 sm:$0xff]  ;;  %v1645_v56 = vld [vmem:[#allocation2 + $0x109] ss:$2 sm:$0xff] }
 0x30d   :  { %1593 = vst.msk [vmem:[#allocation2 + $0x152] sm:$0xff] %vm1446_vm2, %v1406_v58  ;;  %5084 = vmatmul.msk.f32.gmra.mxu0 %vm1446_vm2, %v1678_v40  ;;  %5101 = vmatmul.msk.f32.gmra.mxu1 %vm1446_vm2, %v1645_v56  ;;  %v1945_v11 = vld [vmem:[#allocation2 + $0x10b] ss:$2 sm:$0xff] }
 0x30e   :  { %1601 = vst.msk [vmem:[#allocation2 + $0x212] sm:$0xff] %vm1446_vm2, %v1414_v41  ;;  %5119 = vmatmul.msk.f32.gmra.mxu2 %vm1446_vm2, %v1945_v11  ;;  %5137 = vmatmul.msk.f32.gmra.mxu3 %vm1446_vm2, %v2111_v7  ;;  %v1138_v12 = vpop.permute.xlu0 %1137  ;;  %v1116_v16 = vpop.permute.xlu1 %1115  ;;  %v1951_v7 = vld [vmem:[#allocation2 + $0x1fb] ss:$2 sm:$0xff] }
 0x30f   :  { %v1290_v24 = vsel %vm1249_vm3, %v7831_v53, %v1138_v12  ;;  %v1279_v4 = vsel %vm1249_vm3, %v7832_v28, %v1116_v16  ;;  %v1132_v35 = vpop.permute.xlu2 %1131  ;;  %v3400_v12 = vld [vmem:[#allocation2 + $0x64] ss:$2 sm:$0xff]  ;;  %v6859_v53 = vpop.f32.mrf.mxu2 }
 0x310   :  { %v1358_v23 = vadd.f32 %v6737_v48, %v1290_v24  ;;  %v1347_v42 = vadd.f32 %v6737_v48, %v1279_v4  ;;  %v1287_v63 = vsel %vm1249_vm3, %v7833_v57, %v1132_v35  ;;  %v5148_v16 = vld [vmem:[%s7783_s5 + $0x10] sm:$0xf]  ;;  %v6861_v24 = vpop.f32.mrf.mxu3  ;;  %v5166_v35 = vld [vmem:[%s7783_s5 + $0x14] sm:$0xf] }
 0x311   :  { %v1355_v50 = vadd.f32 %v6737_v48, %v1287_v63  ;;  %5149 = vmatpush.msk.msra.mxu2 %vm1749_vm4, %v5148_v16  ;;  %5167 = vmatpush.msk.msra.mxu3 %vm1749_vm4, %v5166_v35 }
 0x312   :  { %v1422_v6 = vmax.f32 %v1358_v23, 0.0  ;;  %v1411_v62 = vmax.f32 %v1347_v42, 0.0 }
 0x313   :  { %v1419_v55 = vmax.f32 %v1355_v50, 0.0  ;;  %v987_v1 = vpop.f32.mrf.mxu1 }
 0x314   :  { %1609 = vst.msk [vmem:[#allocation2 + $0x272] sm:$0xff] %vm1446_vm2, %v1422_v6  ;;  %v2113_v49 = vld [vmem:[#allocation2 + $0x151] ss:$2 sm:$0xff]  ;;  %1181 = vrot.lane.b32.xlu2 %v987_v1, %s5444_s30 }
 0x315   :  { %1598 = vst.msk [vmem:[#allocation2 + $0x18a] sm:$0xff] %vm1446_vm2, %v1411_v62  ;;  %5257 = vmatmul.msk.f32.vlgmr.msra.gmra.mxu0 %vm1446_vm2, %v3097_v54  ;;  %5275 = vmatmul.msk.f32.vlgmr.msra.gmra.mxu1 %vm1446_vm2, %v3396_v10 }
 0x316   :  { %1606 = vst.msk [vmem:[#allocation2 + $0x24a] sm:$0xff] %vm1446_vm2, %v1419_v55  ;;  %5120 = vmatmul.msk.f32.gmra.mxu2 %vm1446_vm2, %v1947_v43  ;;  %5138 = vmatmul.msk.f32.gmra.mxu3 %vm1446_vm2, %v2113_v49  ;;  %v1148_v21 = vpop.permute.xlu0 %1147  ;;  %v1130_v33 = vpop.permute.xlu1 %1129  ;;  %v3103_v55 = vld [vmem:[#allocation2 + $0x90] ss:$2 sm:$0xff]  ;;  %v1953_v43 = vld [vmem:[#allocation2 + $0x22b] ss:$2 sm:$0xff] }
 0x317   :  { %v1295_v26 = vsel %vm1249_vm3, %v7834_v52, %v1148_v21  ;;  %v1286_v14 = vsel %vm1249_vm3, %v7835_v30, %v1130_v33  ;;  %v1146_v36 = vpop.permute.xlu2 %1145  ;;  %v3402_v49 = vld [vmem:[#allocation2 + $0x94] ss:$2 sm:$0xff]  ;;  %v6891_v52 = vpop.f32.mrf.mxu2 }
 0x318   :  { %v1363_v22 = vadd.f32 %v6737_v48, %v1295_v26  ;;  %v1354_v46 = vadd.f32 %v6737_v48, %v1286_v14  ;;  %v1294_v45 = vsel %vm1249_vm3, %v7836_v37, %v1146_v36  ;;  %v7838_v26 = vld [vmem:[#allocation19_spill] sm:$0xff]  ;;  %v6897_v36 = vpop.f32.mrf.mxu3 }
 0x319   :  { %v1362_v29 = vadd.f32 %v6737_v48, %v1294_v45 }
 0x31a   :  { %v1427_v0 = vmax.f32 %v1363_v22, 0.0  ;;  %v1418_v27 = vmax.f32 %v1354_v46, 0.0  ;;  %v511_v22 = vpop.f32.mrf.mxu0 }
 0x31b   :  { %v1426_v15 = vmax.f32 %v1362_v29, 0.0  ;;  %v990_v63 = vpop.f32.mrf.mxu1 }
 0x31c   :  { %1614 = vst.msk [vmem:[#allocation2 + $0x2aa] sm:$0xff] %vm1446_vm2, %v1427_v0  ;;  %v2115_v18 = vld [vmem:[#allocation2 + $0x181] ss:$2 sm:$0xff]  ;;  %1183 = vrot.lane.b32.xlu0 %v990_v63, %s5444_s30  ;;  %v3105_v0 = vld [vmem:[#allocation2 + $0xc0] ss:$2 sm:$0xff] }
 0x31d   :  { %1605 = vst.msk [vmem:[#allocation2 + $0x242] sm:$0xff] %vm1446_vm2, %v1418_v27  ;;  %5258 = vmatmul.msk.f32.gmra.mxu0 %vm1446_vm2, %v3099_v5  ;;  %5276 = vmatmul.msk.f32.gmra.mxu1 %vm1446_vm2, %v3398_v38  ;;  %v3404_v27 = vld [vmem:[#allocation2 + $0xc4] ss:$2 sm:$0xff]  ;;  %v3410_v63 = vld [vmem:[#allocation2 + $0x154] ss:$2 sm:$0xff] }
 0x31e   :  { %1613 = vst.msk [vmem:[#allocation2 + $0x2a2] sm:$0xff] %vm1446_vm2, %v1426_v15  ;;  %5121 = vmatmul.msk.f32.gmra.mxu2 %vm1446_vm2, %v1949_v25  ;;  %5139 = vmatmul.msk.f32.gmra.mxu3 %vm1446_vm2, %v2115_v18  ;;  %v1162_v59 = vpop.permute.xlu0 %1161  ;;  %v1140_v3 = vpop.permute.xlu1 %1139  ;;  %v1955_v15 = vld [vmem:[#allocation2 + $0x25b] ss:$2 sm:$0xff] }
 0x31f   :  { %v1302_v32 = vsel %vm1249_vm3, %v6546_v44, %v1162_v59  ;;  %v1291_v8 = vsel %vm1249_vm3, %v7837_v51, %v1140_v3  ;;  %v1156_v13 = vpop.permute.xlu2 %1155  ;;  %v3101_v44 = vld [vmem:[#allocation2 + $0x60] ss:$2 sm:$0xff]  ;;  %v6908_v38 = vpop.f32.mrf.mxu2 }
 0x320   :  { %v1370_v20 = vadd.f32 %v6737_v48, %v1302_v32  ;;  %v1359_v9 = vadd.f32 %v6737_v48, %v1291_v8  ;;  %v1299_v58 = vsel %vm1249_vm3, %v6521_v34, %v1156_v13  ;;  %v2117_v34 = vld [vmem:[#allocation2 + $0x211] ss:$2 sm:$0xff]  ;;  %v6910_v25 = vpop.f32.mrf.mxu3  ;;  %v3107_v8 = vld [vmem:[#allocation2 + $0xf0] ss:$2 sm:$0xff] }
 0x321   :  { %v1367_v41 = vadd.f32 %v6737_v48, %v1299_v58  ;;  %v3406_v13 = vld [vmem:[#allocation2 + $0xf4] ss:$2 sm:$0xff] }
 0x322   :  { %v1434_v40 = vmax.f32 %v1370_v20, 0.0  ;;  %v1423_v56 = vmax.f32 %v1359_v9, 0.0  ;;  %v514_v59 = vpop.f32.mrf.mxu0  ;;  %v1957_v9 = vld [vmem:[#allocation2 + $0x28b] ss:$2 sm:$0xff] }
 0x323   :  { %v1431_v11 = vmax.f32 %v1367_v41, 0.0 }
 0x324   :  { %1621 = vst.msk [vmem:[#allocation2 + $0x302] sm:$0xff] %vm1446_vm2, %v1434_v40  ;;  %v2119_v21 = vld [vmem:[#allocation2 + $0x241] ss:$2 sm:$0xff] }
 0x325   :  { %1610 = vst.msk [vmem:[#allocation2 + $0x27a] sm:$0xff] %vm1446_vm2, %v1423_v56  ;;  %5259 = vmatmul.msk.f32.gmra.mxu0 %vm1446_vm2, %v3101_v44  ;;  %5277 = vmatmul.msk.f32.gmra.mxu1 %vm1446_vm2, %v3400_v12  ;;  %v2123_v58 = vld [vmem:[#allocation2 + $0x2a1] ss:$2 sm:$0xff]  ;;  %v7839_v56 = vld [vmem:[#allocation20_spill] sm:$0xff] }
 0x326   :  { %1618 = vst.msk [vmem:[#allocation2 + $0x2da] sm:$0xff] %vm1446_vm2, %v1431_v11  ;;  %5122 = vmatmul.msk.f32.gmra.mxu2 %vm1446_vm2, %v1951_v7  ;;  %5140 = vmatmul.msk.f32.gmra.mxu3 %vm1446_vm2, %v2117_v34  ;;  %v1172_v28 = vpop.permute.xlu0 %1171  ;;  %v1154_v4 = vpop.permute.xlu1 %1153  ;;  %v3109_v34 = vld [vmem:[#allocation2 + $0x120] ss:$2 sm:$0xff] }
 0x327   :  { %v1307_v23 = vsel %vm1249_vm3, %v6622_v61, %v1172_v28  ;;  %v1298_v42 = vsel %vm1249_vm3, %v6513_v47, %v1154_v4  ;;  %v1170_v57 = vpop.permute.xlu2 %1169  ;;  %v6922_v7 = vpop.f32.mrf.mxu2  ;;  %v3408_v28 = vld [vmem:[#allocation2 + $0x124] ss:$2 sm:$0xff]  ;;  %v1959_v4 = vld [vmem:[#allocation2 + $0x2bb] ss:$2 sm:$0xff] }
 0x328   :  { %v1375_v50 = vadd.f32 %v6737_v48, %v1307_v23  ;;  %v1366_v6 = vadd.f32 %v6737_v48, %v1298_v42  ;;  %v1306_v62 = vsel %vm1249_vm3, %v6612_v31, %v1170_v57  ;;  %v6924_v44 = vpop.f32.mrf.mxu3  ;;  %v3111_v57 = vld [vmem:[#allocation2 + $0x150] ss:$2 sm:$0xff] }
 0x329   :  { %v1374_v61 = vadd.f32 %v6737_v48, %v1306_v62 }
 0x32a   :  { %v1439_v54 = vmax.f32 %v1375_v50, 0.0  ;;  %v1430_v10 = vmax.f32 %v1366_v6, 0.0  ;;  %v6937_v42 = vpop.f32.mrf.mxu0  ;;  %v1961_v50 = vld [vmem:[#allocation2 + $0x2eb] ss:$2 sm:$0xff] }
 0x32b   :  { %v1438_v47 = vmax.f32 %v1374_v61, 0.0 }
 0x32c   :  { %1626 = vst.msk [vmem:[#allocation2 + $0x33a] sm:$0xff] %vm1446_vm2, %v1439_v54  ;;  %v2121_v5 = vld [vmem:[#allocation2 + $0x271] ss:$2 sm:$0xff]  ;;  %v3113_v54 = vld [vmem:[#allocation2 + $0x1e0] ss:$2 sm:$0xff] }
 0x32d   :  { %1617 = vst.msk [vmem:[#allocation2 + $0x2d2] sm:$0xff] %vm1446_vm2, %v1430_v10  ;;  %5260 = vmatmul.msk.f32.gmra.mxu0 %vm1446_vm2, %v3103_v55  ;;  %5278 = vmatmul.msk.f32.gmra.mxu1 %vm1446_vm2, %v3402_v49  ;;  %v3412_v10 = vld [vmem:[#allocation2 + $0x1e4] ss:$2 sm:$0xff]  ;;  %v1963_v55 = vld [vmem:[#allocation2 + $0x31b] ss:$2 sm:$0xff] }
 0x32e   :  { %1625 = vst.msk [vmem:[#allocation2 + $0x332] sm:$0xff] %vm1446_vm2, %v1438_v47  ;;  %5123 = vmatmul.msk.f32.gmra.mxu2 %vm1446_vm2, %v1953_v43  ;;  %5141 = vmatmul.msk.f32.gmra.mxu3 %vm1446_vm2, %v2119_v21  ;;  %v1118_v31 = vpop.permute.xlu0 %1117  ;;  %v1164_v33 = vpop.permute.xlu1 %1163 }
 0x32f   :  { %v1280_v30 = vsel %vm1249_vm3, %v7838_v26, %v1118_v31  ;;  %v1303_v14 = vsel %vm1249_vm3, %v6557_v17, %v1164_v33  ;;  %v6933_v23 = vpop.f32.mrf.mxu2  ;;  %v3115_v31 = vld [vmem:[#allocation2 + $0x210] ss:$2 sm:$0xff] }
 0x330   :  { %v1348_v46 = vadd.f32 %v6737_v48, %v1280_v30  ;;  %v1371_v37 = vadd.f32 %v6737_v48, %v1303_v14  ;;  %v1180_v32 = vpop.permute.xlu2 %1179  ;;  %v3414_v33 = vld [vmem:[#allocation2 + $0x214] ss:$2 sm:$0xff]  ;;  %v1886_v30 = vpop.f32.mrf.mxu1  ;;  %v1965_v14 = vld [vmem:[#allocation2 + $0x34b] ss:$2 sm:$0xff] }
 0x331   :  { %v1311_v51 = vsel %vm1249_vm3, %v514_v59, %v1180_v32 }
 0x332   :  { %v1412_v45 = vmax.f32 %v1348_v46, 0.0  ;;  %v1435_v29 = vmax.f32 %v1371_v37, 0.0  ;;  %v1379_v20 = vadd.f32 %v6737_v48, %v1311_v51  ;;  %v6947_v47 = vpop.f32.mrf.mxu0  ;;  %v3119_v51 = vld [vmem:[#allocation2 + $0x270] ss:$2 sm:$0xff] }
 0x334   :  { %1599 = vst.msk [vmem:[#allocation2 + $0x19a] sm:$0xff] %vm1446_vm2, %v1412_v45  ;;  %v1443_v40 = vmax.f32 %v1379_v20, 0.0  ;;  %v2125_v35 = vld [vmem:[#allocation2 + $0x2d1] ss:$2 sm:$0xff] }
 0x335   :  { %1622 = vst.msk [vmem:[#allocation2 + $0x30a] sm:$0xff] %vm1446_vm2, %v1435_v29  ;;  %5261 = vmatmul.msk.f32.gmra.mxu0 %vm1446_vm2, %v3105_v0  ;;  %5279 = vmatmul.msk.f32.gmra.mxu1 %vm1446_vm2, %v3404_v27  ;;  %v2129_v49 = vld [vmem:[#allocation2 + $0x331] ss:$2 sm:$0xff]  ;;  %v3117_v29 = vld [vmem:[#allocation2 + $0x240] ss:$2 sm:$0xff] }
 0x336   :  { %5124 = vmatmul.msk.f32.gmra.mxu2 %vm1446_vm2, %v1955_v15  ;;  %5142 = vmatmul.msk.f32.gmra.mxu3 %vm1446_vm2, %v2121_v5  ;;  %v1178_v17 = vpop.permute.xlu1 %1177  ;;  %1630 = vst.msk [vmem:[#allocation2 + $0x36a] sm:$0xff] %vm1446_vm2, %v1443_v40  ;;  %v3416_v0 = vld [vmem:[#allocation2 + $0x244] ss:$2 sm:$0xff]  ;;  %v2433_v5 = vld [vmem:[#allocation2 + $0x33] ss:$2 sm:$0xff] }
 0x337   :  { %v1310_v18 = vsel %vm1249_vm3, %v511_v22, %v1178_v17  ;;  %v6943_v62 = vpop.f32.mrf.mxu2  ;;  %v2267_v15 = vld [vmem:[#allocation2 + $0x32] ss:$2 sm:$0xff]  ;;  %v2435_v20 = vld [vmem:[#allocation2 + $0x63] ss:$2 sm:$0xff] }
 0x338   :  { %v1378_v1 = vadd.f32 %v6737_v48, %v1310_v18 }
 0x33a   :  { %v1442_v3 = vmax.f32 %v1378_v1, 0.0  ;;  %v1770_v26 = vpop.f32.mrf.mxu0 }
 0x33b   :  { %v1887_v27 = vadd.f32 %v1886_v30, %v1770_v26  ;;  %v6989_v26 = vld [vmem:[#allocation2 + $0xc2] ss:$2 sm:$0xff]  ;;  %v2439_v30 = vld [vmem:[#allocation2 + $0xc3] ss:$2 sm:$0xff] }
 0x33c   :  { %1629 = vst.msk [vmem:[#allocation2 + $0x362] sm:$0xff] %vm1446_vm2, %v1442_v3  ;;  %v2127_v6 = vld [vmem:[#allocation2 + $0x301] ss:$2 sm:$0xff] }
 0x33d   :  { %5262 = vmatmul.msk.f32.gmra.mxu0 %vm1446_vm2, %v3107_v8  ;;  %5280 = vmatmul.msk.f32.gmra.mxu1 %vm1446_vm2, %v3406_v13  ;;  %v3418_v8 = vld [vmem:[#allocation2 + $0x274] ss:$2 sm:$0xff] }
 0x33e   :  { %5125 = vmatmul.msk.f32.gmra.mxu2 %vm1446_vm2, %v1957_v9  ;;  %5143 = vmatmul.msk.f32.gmra.mxu3 %vm1446_vm2, %v2123_v58  ;;  %v1120_v41 = vpop.permute.xlu1 %1119  ;;  %v2269_v13 = vld [vmem:[#allocation2 + $0x62] ss:$2 sm:$0xff] }
 0x33f   :  { %v1281_v11 = vsel %vm1249_vm3, %v7839_v56, %v1120_v41 }
 0x340   :  { %v1349_v12 = vadd.f32 %v6737_v48, %v1281_v11  ;;  %v6935_v48 = vpop.f32.mrf.mxu3 }
 0x342   :  { %v1413_v16 = vmax.f32 %v1349_v12, 0.0  ;;  %v3121_v12 = vld [vmem:[#allocation2 + $0x2a0] ss:$2 sm:$0xff] }
 0x343   :  { %v2131_v22 = vld [vmem:[#allocation2 + $0x361] ss:$2 sm:$0xff] }
 0x344   :  { %1600 = vst.msk [vmem:[#allocation2 + $0x1a2] sm:$0xff] %vm1446_vm2, %v1413_v16 }
 0x345   :  { %5263 = vmatmul.msk.f32.gmra.mxu0 %vm1446_vm2, %v3109_v34  ;;  %5281 = vmatmul.msk.f32.gmra.mxu1 %vm1446_vm2, %v3408_v28  ;;  %v3420_v34 = vld [vmem:[#allocation2 + $0x2a4] ss:$2 sm:$0xff]  ;;  %v5327_v28 = vld [vmem:[%s7784_s6 + $0x14] sm:$0xf] }
 0x346   :  { %5126 = vmatmul.msk.f32.gmra.mxu2 %vm1446_vm2, %v1959_v4  ;;  %5144 = vmatmul.msk.f32.gmra.mxu3 %vm1446_vm2, %v2125_v35  ;;  %v5345_v4 = vld [vmem:[%s7784_s6 + $0x18] sm:$0xf] }
 0x347   :  { %v6953_v43 = vpop.f32.mrf.mxu2  ;;  %v2271_v35 = vld [vmem:[#allocation2 + $0x92] ss:$2 sm:$0xff]  ;;  %5328 = vmatpush.msk.msrb.mxu0 %vm1749_vm4, %v5327_v28  ;;  %5346 = vmatpush.msk.msrb.mxu1 %vm1749_vm4, %v5345_v4 }
 0x348   :  { %v6945_v61 = vpop.f32.mrf.mxu3  ;;  %v3813_v4 = vld [vmem:[#allocation2 + $0x34] ss:$2 sm:$0xff] }
 0x34d   :  { %5264 = vmatmul.msk.f32.gmra.mxu0 %vm1446_vm2, %v3111_v57  ;;  %5282 = vmatmul.msk.f32.gmra.mxu1 %vm1446_vm2, %v3410_v63  ;;  %v2437_v57 = vld [vmem:[#allocation2 + $0x93] ss:$2 sm:$0xff] }
 0x34e   :  { %5127 = vmatmul.msk.f32.gmra.mxu2 %vm1446_vm2, %v1961_v50  ;;  %5145 = vmatmul.msk.f32.gmra.mxu3 %vm1446_vm2, %v2127_v6 }
 0x350   :  { %v6955_v21 = vpop.f32.mrf.mxu3 }
 0x352   :  { %v1773_v17 = vpop.f32.mrf.mxu0  ;;  %v1889_v18 = vpop.f32.mrf.mxu1 }
 0x353   :  { %v1890_v9 = vadd.f32 %v1889_v18, %v1773_v17  ;;  %v6998_v17 = vld [vmem:[#allocation2 + $0xf2] ss:$2 sm:$0xff]  ;;  %v2441_v18 = vld [vmem:[#allocation2 + $0xf3] ss:$2 sm:$0xff] }
 0x355   :  { %5265 = vmatmul.msk.f32.gmra.mxu0 %vm1446_vm2, %v3113_v54  ;;  %5283 = vmatmul.msk.f32.gmra.mxu1 %vm1446_vm2, %v3412_v10 }
 0x356   :  { %5128 = vmatmul.msk.f32.gmra.mxu2 %vm1446_vm2, %v1963_v55  ;;  %5146 = vmatmul.msk.f32.gmra.mxu3 %vm1446_vm2, %v2129_v49 }
 0x35d   :  { %5266 = vmatmul.msk.f32.gmra.mxu0 %vm1446_vm2, %v3115_v31  ;;  %5284 = vmatmul.msk.f32.gmra.mxu1 %vm1446_vm2, %v3414_v33  ;;  %v3123_v31 = vld [vmem:[#allocation2 + $0x2d0] ss:$2 sm:$0xff] }
 0x35e   :  { %5129 = vmatmul.msk.f32.gmra.mxu2 %vm1446_vm2, %v1965_v14  ;;  %5147 = vmatmul.msk.f32.gmra.mxu3 %vm1446_vm2, %v2131_v22  ;;  %v3422_v33 = vld [vmem:[#allocation2 + $0x2d4] ss:$2 sm:$0xff] }
 0x360   :  { %v1815_v46 = vpop.f32.mrf.mxu2  ;;  %v1931_v37 = vpop.f32.mrf.mxu3 }
 0x361   :  { %v6961_v45 = vadd.f32 %v1931_v37, %v1815_v46 }
 0x365   :  { %5267 = vmatmul.msk.f32.gmra.mxu0 %vm1446_vm2, %v3117_v29  ;;  %5285 = vmatmul.msk.f32.gmra.mxu1 %vm1446_vm2, %v3416_v0  ;;  %v3125_v0 = vld [vmem:[#allocation2 + $0x300] ss:$2 sm:$0xff] }
 0x366   :  { %5150 = vmatmul.msk.f32.vlgmr.msra.gmra.mxu2 %vm1446_vm2, %v2267_v15  ;;  %5168 = vmatmul.msk.f32.vlgmr.msra.gmra.mxu3 %vm1446_vm2, %v2433_v5 }
 0x368   :  { %v2036_v1 = vpop.f32.mrf.mxu2  ;;  %v2202_v59 = vpop.f32.mrf.mxu3 }
 0x369   :  { %v2084_v3 = vadd.f32 %v2036_v1, %v1887_v27  ;;  %v3424_v27 = vld [vmem:[#allocation2 + $0x304] ss:$2 sm:$0xff] }
 0x36a   :  { %v1776_v58 = vpop.f32.mrf.mxu0  ;;  %v1892_v41 = vpop.f32.mrf.mxu1 }
 0x36b   :  { %v6967_v32 = vadd.f32 %v2202_v59, %v2084_v3  ;;  %v1893_v63 = vadd.f32 %v1892_v41, %v1776_v58  ;;  %v7007_v41 = vld [vmem:[#allocation2 + $0x122] ss:$2 sm:$0xff] }
 0x36d   :  { %5268 = vmatmul.msk.f32.gmra.mxu0 %vm1446_vm2, %v3119_v51  ;;  %5286 = vmatmul.msk.f32.gmra.mxu1 %vm1446_vm2, %v3418_v8 }
 0x36e   :  { %5151 = vmatmul.msk.f32.gmra.mxu2 %vm1446_vm2, %v2269_v13  ;;  %5169 = vmatmul.msk.f32.gmra.mxu3 %vm1446_vm2, %v2435_v20  ;;  %v3127_v13 = vld [vmem:[#allocation2 + $0x330] ss:$2 sm:$0xff] }
 0x36f   :  { %v3426_v20 = vld [vmem:[#allocation2 + $0x334] ss:$2 sm:$0xff] }
 0x371   :  { %v2039_v40 = vpop.f32.mrf.mxu2  ;;  %v2205_v56 = vpop.f32.mrf.mxu3 }
 0x372   :  { %v2085_v11 = vadd.f32 %v2039_v40, %v1890_v9  ;;  %v1779_v10 = vpop.f32.mrf.mxu0  ;;  %v1895_v55 = vpop.f32.mrf.mxu1  ;;  %v2443_v40 = vld [vmem:[#allocation2 + $0x123] ss:$2 sm:$0xff] }
 0x373   :  { %v1896_v14 = vadd.f32 %v1895_v55, %v1779_v10 }
 0x374   :  { %v6973_v16 = vadd.f32 %v2205_v56, %v2085_v11 }
 0x375   :  { %5269 = vmatmul.msk.f32.gmra.mxu0 %vm1446_vm2, %v3121_v12  ;;  %5287 = vmatmul.msk.f32.gmra.mxu1 %vm1446_vm2, %v3420_v34 }
 0x376   :  { %5152 = vmatmul.msk.f32.gmra.mxu2 %vm1446_vm2, %v2271_v35  ;;  %5170 = vmatmul.msk.f32.gmra.mxu3 %vm1446_vm2, %v2437_v57  ;;  %v3979_v35 = vld [vmem:[#allocation2 + $0x60] ss:$2 sm:$0xff] }
 0x377   :  { %v7016_v57 = vld [vmem:[#allocation2 + $0x152] ss:$2 sm:$0xff] }
 0x379   :  { %v2042_v50 = vpop.f32.mrf.mxu2  ;;  %v2208_v6 = vpop.f32.mrf.mxu3 }
 0x37a   :  { %v2086_v54 = vadd.f32 %v2042_v50, %v1893_v63  ;;  %v1782_v15 = vpop.f32.mrf.mxu0  ;;  %v1898_v5 = vpop.f32.mrf.mxu1  ;;  %v2445_v63 = vld [vmem:[#allocation2 + $0x153] ss:$2 sm:$0xff]  ;;  %v1905_v50 = vadd.f32 %v6817_v19, %v6814_v2  ;;  %v1908_v2 = vadd.f32 %v6837_v39, %v6834_v60  ;;  %v1911_v39 = vadd.f32 %v6861_v24, %v6859_v53 }
 0x37b   :  { %v1899_v1 = vadd.f32 %v1898_v5, %v1782_v15  ;;  %v5184_v15 = vld [vmem:[%s7783_s5 + $0x18] sm:$0xf]  ;;  %v5202_v60 = vld [vmem:[%s7783_s5 + $0x1c] sm:$0xf]  ;;  %v1914_v53 = vadd.f32 %v6897_v36, %v6891_v52  ;;  %v1917_v52 = vadd.f32 %v6910_v25, %v6908_v38  ;;  %v1920_v38 = vadd.f32 %v6924_v44, %v6922_v7 }
 0x37c   :  { %v6987_v49 = vadd.f32 %v2208_v6, %v2086_v54  ;;  %v7041_v5 = vld [vmem:[#allocation2 + $0x212] ss:$2 sm:$0xff]  ;;  %5185 = vmatpush.msk.msrb.mxu2 %vm1749_vm4, %v5184_v15  ;;  %5203 = vmatpush.msk.msrb.mxu3 %vm1749_vm4, %v5202_v60  ;;  %v1923_v7 = vadd.f32 %v6935_v48, %v6933_v23  ;;  %v1926_v23 = vadd.f32 %v6945_v61, %v6943_v62 }
 0x37d   :  { %5270 = vmatmul.msk.f32.gmra.mxu0 %vm1446_vm2, %v3123_v31  ;;  %5288 = vmatmul.msk.f32.gmra.mxu1 %vm1446_vm2, %v3422_v33  ;;  %v3815_v31 = vld [vmem:[#allocation2 + $0x64] ss:$2 sm:$0xff]  ;;  %v1929_v62 = vadd.f32 %v6955_v21, %v6953_v43 }
 0x37e   :  { %5153 = vmatmul.msk.f32.gmra.mxu2 %vm1446_vm2, %v6989_v26  ;;  %5171 = vmatmul.msk.f32.gmra.mxu3 %vm1446_vm2, %v2439_v30  ;;  %v3981_v33 = vld [vmem:[#allocation2 + $0x90] ss:$2 sm:$0xff] }
 0x37f   :  { %v7027_v30 = vld [vmem:[#allocation2 + $0x182] ss:$2 sm:$0xff] }
 0x381   :  { %v2045_v22 = vpop.f32.mrf.mxu2  ;;  %v2211_v46 = vpop.f32.mrf.mxu3 }
 0x382   :  { %v2087_v37 = vadd.f32 %v2045_v22, %v1896_v14  ;;  %v2447_v14 = vld [vmem:[#allocation2 + $0x183] ss:$2 sm:$0xff] }
 0x384   :  { %v6996_v29 = vadd.f32 %v2211_v46, %v2087_v37 }
 0x385   :  { %5271 = vmatmul.msk.f32.gmra.mxu0 %vm1446_vm2, %v3125_v0  ;;  %5289 = vmatmul.msk.f32.gmra.mxu1 %vm1446_vm2, %v3424_v27  ;;  %v3817_v0 = vld [vmem:[#allocation2 + $0x94] ss:$2 sm:$0xff] }
 0x386   :  { %5154 = vmatmul.msk.f32.gmra.mxu2 %vm1446_vm2, %v6998_v17  ;;  %5172 = vmatmul.msk.f32.gmra.mxu3 %vm1446_vm2, %v2441_v18  ;;  %v3983_v27 = vld [vmem:[#allocation2 + $0xc0] ss:$2 sm:$0xff]  ;;  %v2449_v18 = vld [vmem:[#allocation2 + $0x213] ss:$2 sm:$0xff] }
 0x389   :  { %v2048_v59 = vpop.f32.mrf.mxu2  ;;  %v2214_v3 = vpop.f32.mrf.mxu3 }
 0x38a   :  { %v2088_v51 = vadd.f32 %v2048_v59, %v1899_v1  ;;  %v1785_v9 = vpop.f32.mrf.mxu0  ;;  %v1901_v58 = vpop.f32.mrf.mxu1 }
 0x38b   :  { %v1902_v56 = vadd.f32 %v1901_v58, %v1785_v9  ;;  %v7057_v9 = vld [vmem:[#allocation2 + $0x242] ss:$2 sm:$0xff]  ;;  %v2451_v58 = vld [vmem:[#allocation2 + $0x243] ss:$2 sm:$0xff] }
 0x38c   :  { %v7005_v8 = vadd.f32 %v2214_v3, %v2088_v51 }
 0x38d   :  { %5272 = vmatmul.msk.f32.gmra.mxu0 %vm1446_vm2, %v3127_v13  ;;  %5290 = vmatmul.msk.f32.gmra.mxu1 %vm1446_vm2, %v3426_v20  ;;  %v3819_v13 = vld [vmem:[#allocation2 + $0xc4] ss:$2 sm:$0xff] }
 0x38e   :  { %5155 = vmatmul.msk.f32.gmra.mxu2 %vm1446_vm2, %v7007_v41  ;;  %5173 = vmatmul.msk.f32.gmra.mxu3 %vm1446_vm2, %v2443_v40  ;;  %v3985_v20 = vld [vmem:[#allocation2 + $0xf0] ss:$2 sm:$0xff] }
 0x391   :  { %v2051_v11 = vpop.f32.mrf.mxu2  ;;  %v2217_v12 = vpop.f32.mrf.mxu3 }
 0x392   :  { %v2089_v34 = vadd.f32 %v2051_v11, %v1902_v56  ;;  %v7094_v15 = vpop.f32.mrf.mxu0  ;;  %v7101_v44 = vpop.f32.mrf.mxu1 }
 0x394   :  { %v7014_v28 = vadd.f32 %v2217_v12, %v2089_v34  ;;  %v3821_v12 = vld [vmem:[#allocation2 + $0xf4] ss:$2 sm:$0xff] }
 0x395   :  { %5329 = vmatmul.msk.f32.vlgmr.msrb.gmra.mxu0 %vm1446_vm2, %v3813_v4  ;;  %5347 = vmatmul.msk.f32.vlgmr.msrb.gmra.mxu1 %vm1446_vm2, %v3979_v35  ;;  %v3987_v34 = vld [vmem:[#allocation2 + $0x120] ss:$2 sm:$0xff]  ;;  %v2453_v35 = vld [vmem:[#allocation2 + $0x273] ss:$2 sm:$0xff] }
 0x396   :  { %5156 = vmatmul.msk.f32.gmra.mxu2 %vm1446_vm2, %v7016_v57  ;;  %5174 = vmatmul.msk.f32.gmra.mxu3 %vm1446_vm2, %v2445_v63  ;;  %v7068_v4 = vld [vmem:[#allocation2 + $0x272] ss:$2 sm:$0xff] }
 0x399   :  { %v2054_v6 = vpop.f32.mrf.mxu2  ;;  %v2220_v54 = vpop.f32.mrf.mxu3 }
 0x39a   :  { %v2090_v10 = vadd.f32 %v2054_v6, %v1905_v50  ;;  %v7114_v48 = vpop.f32.mrf.mxu0 }
 0x39c   :  { %v7025_v55 = vadd.f32 %v2220_v54, %v2090_v10  ;;  %v3823_v54 = vld [vmem:[#allocation2 + $0x124] ss:$2 sm:$0xff] }
 0x39d   :  { %5330 = vmatmul.msk.f32.gmra.mxu0 %vm1446_vm2, %v3815_v31  ;;  %5348 = vmatmul.msk.f32.gmra.mxu1 %vm1446_vm2, %v3981_v33  ;;  %v3989_v10 = vld [vmem:[#allocation2 + $0x150] ss:$2 sm:$0xff]  ;;  %v2455_v33 = vld [vmem:[#allocation2 + $0x2a3] ss:$2 sm:$0xff] }
 0x39e   :  { %5157 = vmatmul.msk.f32.gmra.mxu2 %vm1446_vm2, %v7027_v30  ;;  %5175 = vmatmul.msk.f32.gmra.mxu3 %vm1446_vm2, %v2447_v14  ;;  %v7079_v31 = vld [vmem:[#allocation2 + $0x2a2] ss:$2 sm:$0xff] }
 0x3a1   :  { %v2057_v19 = vpop.f32.mrf.mxu2  ;;  %v2223_v22 = vpop.f32.mrf.mxu3 }
 0x3a2   :  { %v2091_v46 = vadd.f32 %v2057_v19, %v1908_v2 }
 0x3a4   :  { %v7036_v37 = vadd.f32 %v2223_v22, %v2091_v46  ;;  %v3825_v22 = vld [vmem:[#allocation2 + $0x154] ss:$2 sm:$0xff] }
 0x3a5   :  { %5331 = vmatmul.msk.f32.gmra.mxu0 %vm1446_vm2, %v3817_v0  ;;  %5349 = vmatmul.msk.f32.gmra.mxu1 %vm1446_vm2, %v3983_v27  ;;  %v3991_v46 = vld [vmem:[#allocation2 + $0x180] ss:$2 sm:$0xff]  ;;  %v2457_v27 = vld [vmem:[#allocation2 + $0x2d3] ss:$2 sm:$0xff] }
 0x3a6   :  { %5158 = vmatmul.msk.f32.gmra.mxu2 %vm1446_vm2, %v7041_v5  ;;  %5176 = vmatmul.msk.f32.gmra.mxu3 %vm1446_vm2, %v2449_v18  ;;  %v7090_v0 = vld [vmem:[#allocation2 + $0x2d2] ss:$2 sm:$0xff] }
 0x3a9   :  { %v2060_v1 = vpop.f32.mrf.mxu2  ;;  %v2226_v59 = vpop.f32.mrf.mxu3 }
 0x3aa   :  { %v2092_v3 = vadd.f32 %v2060_v1, %v1911_v39  ;;  %v3993_v1 = vld [vmem:[#allocation2 + $0x1b0] ss:$2 sm:$0xff] }
 0x3ac   :  { %v7055_v51 = vadd.f32 %v2226_v59, %v2092_v3  ;;  %v3827_v3 = vld [vmem:[#allocation2 + $0x184] ss:$2 sm:$0xff] }
 0x3ad   :  { %5332 = vmatmul.msk.f32.gmra.mxu0 %vm1446_vm2, %v3819_v13  ;;  %5350 = vmatmul.msk.f32.gmra.mxu1 %vm1446_vm2, %v3985_v20  ;;  %v7105_v13 = vld [vmem:[#allocation2 + $0x302] ss:$2 sm:$0xff]  ;;  %v2459_v20 = vld [vmem:[#allocation2 + $0x303] ss:$2 sm:$0xff] }
 0x3ae   :  { %5159 = vmatmul.msk.f32.gmra.mxu2 %vm1446_vm2, %v7057_v9  ;;  %5177 = vmatmul.msk.f32.gmra.mxu3 %vm1446_vm2, %v2451_v58 }
 0x3b1   :  { %v2063_v24 = vpop.f32.mrf.mxu2  ;;  %v2229_v40 = vpop.f32.mrf.mxu3 }
 0x3b2   :  { %v2093_v56 = vadd.f32 %v2063_v24, %v1914_v53  ;;  %v7116_v24 = vpop.f32.mrf.mxu1 }
 0x3b4   :  { %v7066_v11 = vadd.f32 %v2229_v40, %v2093_v56 }
 0x3b5   :  { %5333 = vmatmul.msk.f32.gmra.mxu0 %vm1446_vm2, %v3821_v12  ;;  %5351 = vmatmul.msk.f32.gmra.mxu1 %vm1446_vm2, %v3987_v34  ;;  %v3829_v12 = vld [vmem:[#allocation2 + $0x214] ss:$2 sm:$0xff] }
 0x3b6   :  { %5160 = vmatmul.msk.f32.gmra.mxu2 %vm1446_vm2, %v7068_v4  ;;  %5178 = vmatmul.msk.f32.gmra.mxu3 %vm1446_vm2, %v2453_v35  ;;  %v3995_v34 = vld [vmem:[#allocation2 + $0x240] ss:$2 sm:$0xff] }
 0x3b7   :  { %v7120_v35 = vld [vmem:[#allocation2 + $0x332] ss:$2 sm:$0xff] }
 0x3b9   :  { %v2066_v36 = vpop.f32.mrf.mxu2  ;;  %v2232_v63 = vpop.f32.mrf.mxu3 }
 0x3ba   :  { %v2094_v50 = vadd.f32 %v2066_v36, %v1917_v52  ;;  %v2461_v52 = vld [vmem:[#allocation2 + $0x333] ss:$2 sm:$0xff] }
 0x3bc   :  { %v7077_v6 = vadd.f32 %v2232_v63, %v2094_v50  ;;  %v7129_v63 = vpop.f32.mrf.mxu0 }
 0x3bd   :  { %5334 = vmatmul.msk.f32.gmra.mxu0 %vm1446_vm2, %v3823_v54  ;;  %5352 = vmatmul.msk.f32.gmra.mxu1 %vm1446_vm2, %v3989_v10  ;;  %v7131_v54 = vpop.f32.mrf.mxu1 }
 0x3be   :  { %5161 = vmatmul.msk.f32.gmra.mxu2 %vm1446_vm2, %v7079_v31  ;;  %5179 = vmatmul.msk.f32.gmra.mxu3 %vm1446_vm2, %v2455_v33  ;;  %v3831_v33 = vld [vmem:[#allocation2 + $0x244] ss:$2 sm:$0xff] }
 0x3c1   :  { %v2069_v25 = vpop.f32.mrf.mxu2  ;;  %v2235_v14 = vpop.f32.mrf.mxu3 }
 0x3c2   :  { %v2095_v2 = vadd.f32 %v2069_v25, %v1920_v38  ;;  %v3997_v38 = vld [vmem:[#allocation2 + $0x270] ss:$2 sm:$0xff] }
 0x3c3   :  { %v7135_v25 = vld [vmem:[#allocation2 + $0x362] ss:$2 sm:$0xff] }
 0x3c4   :  { %v7088_v19 = vadd.f32 %v2235_v14, %v2095_v2  ;;  %v2463_v14 = vld [vmem:[#allocation2 + $0x363] ss:$2 sm:$0xff] }
 0x3c5   :  { %5335 = vmatmul.msk.f32.gmra.mxu0 %vm1446_vm2, %v3825_v22  ;;  %5353 = vmatmul.msk.f32.gmra.mxu1 %vm1446_vm2, %v3991_v46  ;;  %v7143_v22 = vpop.f32.mrf.mxu0 }
 0x3c6   :  { %5162 = vmatmul.msk.f32.gmra.mxu2 %vm1446_vm2, %v7090_v0  ;;  %5180 = vmatmul.msk.f32.gmra.mxu3 %vm1446_vm2, %v2457_v27  ;;  %v3833_v27 = vld [vmem:[#allocation2 + $0x274] ss:$2 sm:$0xff] }
 0x3c9   :  { %v2072_v18 = vpop.f32.mrf.mxu2  ;;  %v2238_v60 = vpop.f32.mrf.mxu3 }
 0x3ca   :  { %v2096_v39 = vadd.f32 %v2072_v18, %v1923_v7  ;;  %v3999_v7 = vld [vmem:[#allocation2 + $0x2a0] ss:$2 sm:$0xff]  ;;  %v2600_v18 = vld [vmem:[#allocation2 + $0x49] ss:$2 sm:$0xff] }
 0x3cc   :  { %v7103_v59 = vadd.f32 %v2238_v60, %v2096_v39  ;;  %v2766_v60 = vld [vmem:[#allocation2 + $0x4a] ss:$2 sm:$0xff]  ;;  %v7149_v39 = vpop.f32.mrf.mxu1 }
 0x3cd   :  { %5336 = vmatmul.msk.f32.gmra.mxu0 %vm1446_vm2, %v3827_v3  ;;  %5354 = vmatmul.msk.f32.gmra.mxu1 %vm1446_vm2, %v3993_v1 }
 0x3ce   :  { %5163 = vmatmul.msk.f32.gmra.mxu2 %vm1446_vm2, %v7105_v13  ;;  %5181 = vmatmul.msk.f32.gmra.mxu3 %vm1446_vm2, %v2459_v20 }
 0x3d1   :  { %v2075_v58 = vpop.f32.mrf.mxu2  ;;  %v2241_v53 = vpop.f32.mrf.mxu3 }
 0x3d2   :  { %v2097_v40 = vadd.f32 %v2075_v58, %v1926_v23  ;;  %v3835_v23 = vld [vmem:[#allocation2 + $0x2a4] ss:$2 sm:$0xff] }
 0x3d3   :  { %v4001_v58 = vld [vmem:[#allocation2 + $0x2d0] ss:$2 sm:$0xff] }
 0x3d4   :  { %v7118_v56 = vadd.f32 %v2241_v53, %v2097_v40  ;;  %v2602_v53 = vld [vmem:[#allocation2 + $0x79] ss:$2 sm:$0xff]  ;;  %v2768_v40 = vld [vmem:[#allocation2 + $0x7a] ss:$2 sm:$0xff] }
 0x3d5   :  { %5337 = vmatmul.msk.f32.gmra.mxu0 %vm1446_vm2, %v3829_v12  ;;  %5355 = vmatmul.msk.f32.gmra.mxu1 %vm1446_vm2, %v3995_v34  ;;  %v7158_v12 = vpop.f32.mrf.mxu0  ;;  %v7162_v34 = vpop.f32.mrf.mxu1 }
 0x3d6   :  { %5164 = vmatmul.msk.f32.gmra.mxu2 %vm1446_vm2, %v7120_v35  ;;  %5182 = vmatmul.msk.f32.gmra.mxu3 %vm1446_vm2, %v2461_v52 }
 0x3d9   :  { %v2078_v61 = vpop.f32.mrf.mxu2  ;;  %v2244_v36 = vpop.f32.mrf.mxu3 }
 0x3da   :  { %v2098_v50 = vadd.f32 %v2078_v61, %v1929_v62 }
 0x3dc   :  { %v7133_v10 = vadd.f32 %v2244_v36, %v2098_v50  ;;  %v3837_v36 = vld [vmem:[#allocation2 + $0x2d4] ss:$2 sm:$0xff] }
 0x3dd   :  { %5338 = vmatmul.msk.f32.gmra.mxu0 %vm1446_vm2, %v3831_v33  ;;  %5356 = vmatmul.msk.f32.gmra.mxu1 %vm1446_vm2, %v3997_v38  ;;  %v4003_v50 = vld [vmem:[#allocation2 + $0x300] ss:$2 sm:$0xff]  ;;  %v2604_v33 = vld [vmem:[#allocation2 + $0xa9] ss:$2 sm:$0xff] }
 0x3de   :  { %5165 = vmatmul.msk.f32.gmra.mxu2 %vm1446_vm2, %v7135_v25  ;;  %5183 = vmatmul.msk.f32.gmra.mxu3 %vm1446_vm2, %v2463_v14  ;;  %v2770_v38 = vld [vmem:[#allocation2 + $0xaa] ss:$2 sm:$0xff]  ;;  %v7171_v14 = vpop.f32.mrf.mxu0 }
 0x3e1   :  { %v2081_v43 = vpop.f32.mrf.mxu2  ;;  %v2247_v21 = vpop.f32.mrf.mxu3 }
 0x3e2   :  { %v2099_v2 = vadd.f32 %v2081_v43, %v6961_v45 }
 0x3e4   :  { %v7145_v46 = vadd.f32 %v2247_v21, %v2099_v2  ;;  %v7174_v2 = vpop.f32.mrf.mxu1 }
 0x3e5   :  { %5339 = vmatmul.msk.f32.gmra.mxu0 %vm1446_vm2, %v3833_v27  ;;  %5357 = vmatmul.msk.f32.gmra.mxu1 %vm1446_vm2, %v3999_v7  ;;  %v3839_v7 = vld [vmem:[#allocation2 + $0x304] ss:$2 sm:$0xff] }
 0x3e6   :  { %5186 = vmatmul.msk.f32.vlgmr.msrb.gmra.mxu2 %vm1446_vm2, %v2600_v18  ;;  %5204 = vmatmul.msk.f32.vlgmr.msrb.gmra.mxu3 %vm1446_vm2, %v2766_v60  ;;  %v4005_v18 = vld [vmem:[#allocation2 + $0x330] ss:$2 sm:$0xff]  ;;  %v2606_v60 = vld [vmem:[#allocation2 + $0xd9] ss:$2 sm:$0xff] }
 0x3e9   :  { %v2368_v1 = vpop.f32.mrf.mxu2  ;;  %v2534_v45 = vpop.f32.mrf.mxu3 }
 0x3ea   :  { %v2416_v3 = vadd.f32 %v2368_v1, %v6967_v32  ;;  %v2772_v1 = vld [vmem:[#allocation2 + $0xda] ss:$2 sm:$0xff] }
 0x3ec   :  { %v7154_v20 = vadd.f32 %v2534_v45, %v2416_v3 }
 0x3ed   :  { %5340 = vmatmul.msk.f32.gmra.mxu0 %vm1446_vm2, %v3835_v23  ;;  %5358 = vmatmul.msk.f32.gmra.mxu1 %vm1446_vm2, %v4001_v58  ;;  %v7183_v23 = vpop.f32.mrf.mxu0 }
 0x3ee   :  { %5187 = vmatmul.msk.f32.gmra.mxu2 %vm1446_vm2, %v2602_v53  ;;  %5205 = vmatmul.msk.f32.gmra.mxu3 %vm1446_vm2, %v2768_v40  ;;  %v3841_v53 = vld [vmem:[#allocation2 + $0x334] ss:$2 sm:$0xff] }
 0x3ef   :  { %v4007_v40 = vld [vmem:[#allocation2 + $0x360] ss:$2 sm:$0xff] }
 0x3f1   :  { %v2371_v52 = vpop.f32.mrf.mxu2  ;;  %v2537_v32 = vpop.f32.mrf.mxu3 }
 0x3f2   :  { %v2417_v62 = vadd.f32 %v2371_v52, %v6973_v16  ;;  %v7187_v52 = vpop.f32.mrf.mxu1 }
 0x3f4   :  { %v7165_v61 = vadd.f32 %v2537_v32, %v2417_v62  ;;  %v2608_v32 = vld [vmem:[#allocation2 + $0x109] ss:$2 sm:$0xff]  ;;  %v2774_v62 = vld [vmem:[#allocation2 + $0x10a] ss:$2 sm:$0xff] }
 0x3f5   :  { %5341 = vmatmul.msk.f32.gmra.mxu0 %vm1446_vm2, %v3837_v36  ;;  %5359 = vmatmul.msk.f32.gmra.mxu1 %vm1446_vm2, %v4003_v50 }
 0x3f6   :  { %5188 = vmatmul.msk.f32.gmra.mxu2 %vm1446_vm2, %v2604_v33  ;;  %5206 = vmatmul.msk.f32.gmra.mxu3 %vm1446_vm2, %v2770_v38  ;;  %v3843_v38 = vld [vmem:[#allocation2 + $0x364] ss:$2 sm:$0xff] }
 0x3f9   :  { %v2374_v43 = vpop.f32.mrf.mxu2  ;;  %v2540_v21 = vpop.f32.mrf.mxu3 }
 0x3fa   :  { %v2418_v16 = vadd.f32 %v2374_v43, %v6987_v49  ;;  %v7196_v43 = vpop.f32.mrf.mxu0 }
 0x3fc   :  { %v7176_v27 = vadd.f32 %v2540_v21, %v2418_v16  ;;  %v2610_v21 = vld [vmem:[#allocation2 + $0x139] ss:$2 sm:$0xff]  ;;  %v2776_v16 = vld [vmem:[#allocation2 + $0x13a] ss:$2 sm:$0xff] }
 0x3fd   :  { %5342 = vmatmul.msk.f32.gmra.mxu0 %vm1446_vm2, %v3839_v7  ;;  %5360 = vmatmul.msk.f32.gmra.mxu1 %vm1446_vm2, %v4005_v18  ;;  %v1182_v7 = vpop.permute.xlu2 %1181  ;;  %v1184_v18 = vpop.permute.xlu0 %1183 }
 0x3fe   :  { %5189 = vmatmul.msk.f32.gmra.mxu2 %vm1446_vm2, %v2606_v60  ;;  %5207 = vmatmul.msk.f32.gmra.mxu3 %vm1446_vm2, %v2772_v1  ;;  %v1312_v60 = vsel %vm1249_vm3, %v6937_v42, %v1182_v7  ;;  %v5414_v1 = vld [vmem:[%s7782_s4] ss:$0 sm:$0xff]  ;;  %v2612_v42 = vld [vmem:[#allocation2 + $0x169] ss:$2 sm:$0xff] }
 0x401   :  { %v2377_v45 = vpop.f32.mrf.mxu2  ;;  %v2543_v3 = vpop.f32.mrf.mxu3 }
 0x402   :  { %v2419_v49 = vadd.f32 %v2377_v45, %v6996_v29  ;;  %v1380_v45 = vadd.f32 %v5414_v1, %v1312_v60 }
 0x404   :  { %v7185_v58 = vadd.f32 %v2543_v3, %v2419_v49 }
 0x405   :  { %5343 = vmatmul.msk.f32.gmra.mxu0 %vm1446_vm2, %v3841_v53  ;;  %5361 = vmatmul.msk.f32.gmra.mxu1 %vm1446_vm2, %v4007_v40 }
 0x406   :  { %5190 = vmatmul.msk.f32.gmra.mxu2 %vm1446_vm2, %v2608_v32  ;;  %5208 = vmatmul.msk.f32.gmra.mxu3 %vm1446_vm2, %v2774_v62  ;;  %v1444_v32 = vmax.f32 %v1380_v45, 0.0  ;;  %v2616_v45 = vld [vmem:[#allocation2 + $0x229] ss:$2 sm:$0xff] }
 0x408   :  { %1631 = vst.msk [vmem:[#allocation2 + $0x37a] sm:$0xff] %vm1446_vm2, %v1444_v32  ;;  %v2618_v32 = vld [vmem:[#allocation2 + $0x259] ss:$2 sm:$0xff] }
 0x409   :  { %v2380_v36 = vpop.f32.mrf.mxu2  ;;  %v2546_v29 = vpop.f32.mrf.mxu3 }
 0x40a   :  { %v2420_v50 = vadd.f32 %v2380_v36, %v7005_v8  ;;  %v1313_v8 = vsel %vm1249_vm3, %v6947_v47, %v1184_v18 }
 0x40b   :  { %v1381_v3 = vadd.f32 %v5414_v1, %v1313_v8  ;;  %v5220_v1 = vld [vmem:[%s7783_s5 + $0x20] sm:$0xf] }
 0x40c   :  { %v7194_v33 = vadd.f32 %v2546_v29, %v2420_v50  ;;  %v2778_v29 = vld [vmem:[#allocation2 + $0x16a] ss:$2 sm:$0xff]  ;;  %5221 = vmatpush.msk.msra.mxu2 %vm1749_vm4, %v5220_v1  ;;  %v2788_v1 = vld [vmem:[#allocation2 + $0x2ba] ss:$2 sm:$0xff] }
 0x40d   :  { %5344 = vmatmul.msk.f32.gmra.mxu0 %vm1446_vm2, %v3843_v38  ;;  %v1445_v62 = vmax.f32 %v1381_v3, 0.0  ;;  %v5238_v3 = vld [vmem:[%s7784_s6 + $0x4] sm:$0xf] }
 0x40e   :  { %5191 = vmatmul.msk.f32.gmra.mxu2 %vm1446_vm2, %v2610_v21  ;;  %5209 = vmatmul.msk.f32.gmra.mxu3 %vm1446_vm2, %v2776_v16  ;;  %v2780_v16 = vld [vmem:[#allocation2 + $0x19a] ss:$2 sm:$0xff] }
 0x40f   :  { %1632 = vst.msk [vmem:[#allocation2 + $0x382] sm:$0xff] %vm1446_vm2, %v1445_v62  ;;  %5239 = vmatpush.msk.msra.mxu3 %vm1749_vm4, %v5238_v3  ;;  %v2784_v62 = vld [vmem:[#allocation2 + $0x25a] ss:$2 sm:$0xff] }
 0x411   :  { %v2383_v49 = vpop.f32.mrf.mxu2  ;;  %v2549_v53 = vpop.f32.mrf.mxu3 }
 0x412   :  { %v2421_v40 = vadd.f32 %v2383_v49, %v7014_v28  ;;  %v2614_v28 = vld [vmem:[#allocation2 + $0x199] ss:$2 sm:$0xff] }
 0x414   :  { %v7209_v36 = vadd.f32 %v2549_v53, %v2421_v40 }
 0x416   :  { %5192 = vmatmul.msk.f32.gmra.mxu2 %vm1446_vm2, %v2612_v42  ;;  %5210 = vmatmul.msk.f32.gmra.mxu3 %vm1446_vm2, %v2778_v29 }
 0x419   :  { %v2386_v47 = vpop.f32.mrf.mxu2  ;;  %v2552_v50 = vpop.f32.mrf.mxu3 }
 0x41a   :  { %v2422_v38 = vadd.f32 %v2386_v47, %v7025_v55  ;;  %v2782_v55 = vld [vmem:[#allocation2 + $0x22a] ss:$2 sm:$0xff] }
 0x41c   :  { %v7216_v21 = vadd.f32 %v2552_v50, %v2422_v38  ;;  %v2620_v38 = vld [vmem:[#allocation2 + $0x289] ss:$2 sm:$0xff] }
 0x41e   :  { %5193 = vmatmul.msk.f32.gmra.mxu2 %vm1446_vm2, %v2614_v28  ;;  %5211 = vmatmul.msk.f32.gmra.mxu3 %vm1446_vm2, %v2780_v16  ;;  %v2786_v28 = vld [vmem:[#allocation2 + $0x28a] ss:$2 sm:$0xff] }
 0x421   :  { %v2389_v7 = vpop.f32.mrf.mxu2  ;;  %v2555_v18 = vpop.f32.mrf.mxu3 }
 0x422   :  { %v2423_v60 = vadd.f32 %v2389_v7, %v7036_v37 }
 0x424   :  { %v7221_v8 = vadd.f32 %v2555_v18, %v2423_v60  ;;  %v2622_v60 = vld [vmem:[#allocation2 + $0x2b9] ss:$2 sm:$0xff] }
 0x426   :  { %5194 = vmatmul.msk.f32.gmra.mxu2 %vm1446_vm2, %v2616_v45  ;;  %5212 = vmatmul.msk.f32.gmra.mxu3 %vm1446_vm2, %v2782_v55 }
 0x429   :  { %v2392_v37 = vpop.f32.mrf.mxu2  ;;  %v2558_v49 = vpop.f32.mrf.mxu3 }
 0x42a   :  { %v2424_v53 = vadd.f32 %v2392_v37, %v7055_v51  ;;  %v2624_v37 = vld [vmem:[#allocation2 + $0x2e9] ss:$2 sm:$0xff] }
 0x42c   :  { %v7234_v40 = vadd.f32 %v2558_v49, %v2424_v53  ;;  %v2790_v49 = vld [vmem:[#allocation2 + $0x2ea] ss:$2 sm:$0xff] }
 0x42e   :  { %5195 = vmatmul.msk.f32.gmra.mxu2 %vm1446_vm2, %v2618_v32  ;;  %5213 = vmatmul.msk.f32.gmra.mxu3 %vm1446_vm2, %v2784_v62 }
 0x431   :  { %v2395_v42 = vpop.f32.mrf.mxu2  ;;  %v2561_v29 = vpop.f32.mrf.mxu3 }
 0x432   :  { %v2425_v47 = vadd.f32 %v2395_v42, %v7066_v11  ;;  %v2626_v42 = vld [vmem:[#allocation2 + $0x319] ss:$2 sm:$0xff] }
 0x434   :  { %v7239_v50 = vadd.f32 %v2561_v29, %v2425_v47  ;;  %v2792_v29 = vld [vmem:[#allocation2 + $0x31a] ss:$2 sm:$0xff] }
 0x436   :  { %5196 = vmatmul.msk.f32.gmra.mxu2 %vm1446_vm2, %v2620_v38  ;;  %5214 = vmatmul.msk.f32.gmra.mxu3 %vm1446_vm2, %v2786_v28 }
 0x439   :  { %v2398_v51 = vpop.f32.mrf.mxu2  ;;  %v2564_v16 = vpop.f32.mrf.mxu3 }
 0x43a   :  { %v2426_v7 = vadd.f32 %v2398_v51, %v7077_v6  ;;  %v2628_v51 = vld [vmem:[#allocation2 + $0x349] ss:$2 sm:$0xff] }
 0x43c   :  { %v7244_v18 = vadd.f32 %v2564_v16, %v2426_v7  ;;  %v2794_v16 = vld [vmem:[#allocation2 + $0x34a] ss:$2 sm:$0xff] }
 0x43e   :  { %5197 = vmatmul.msk.f32.gmra.mxu2 %vm1446_vm2, %v2622_v60  ;;  %5215 = vmatmul.msk.f32.gmra.mxu3 %vm1446_vm2, %v2788_v1 }
 0x441   :  { %v2401_v11 = vpop.f32.mrf.mxu2  ;;  %v2567_v45 = vpop.f32.mrf.mxu3 }
 0x442   :  { %v2427_v55 = vadd.f32 %v2401_v11, %v7088_v19  ;;  %v2630_v11 = vld [vmem:[#allocation2 + $0x379] ss:$2 sm:$0xff] }
 0x444   :  { %v7249_v3 = vadd.f32 %v2567_v45, %v2427_v55  ;;  %v2796_v45 = vld [vmem:[#allocation2 + $0x37a] ss:$2 sm:$0xff] }
 0x446   :  { %5198 = vmatmul.msk.f32.gmra.mxu2 %vm1446_vm2, %v2624_v37  ;;  %5216 = vmatmul.msk.f32.gmra.mxu3 %vm1446_vm2, %v2790_v49  ;;  %v3130_v49 = vld [vmem:[#allocation2 + $0x2] ss:$2 sm:$0xff] }
 0x449   :  { %v2404_v6 = vpop.f32.mrf.mxu2  ;;  %v2570_v53 = vpop.f32.mrf.mxu3 }
 0x44a   :  { %v2428_v32 = vadd.f32 %v2404_v6, %v7103_v59 }
 0x44c   :  { %v7254_v62 = vadd.f32 %v2570_v53, %v2428_v32  ;;  %v2932_v53 = vld [vmem:[#allocation2 + $0x4b] ss:$2 sm:$0xff] }
 0x44e   :  { %5199 = vmatmul.msk.f32.gmra.mxu2 %vm1446_vm2, %v2626_v42  ;;  %5217 = vmatmul.msk.f32.gmra.mxu3 %vm1446_vm2, %v2792_v29 }
 0x451   :  { %v2407_v19 = vpop.f32.mrf.mxu2  ;;  %v2573_v47 = vpop.f32.mrf.mxu3 }
 0x452   :  { %v2429_v38 = vadd.f32 %v2407_v19, %v7118_v56  ;;  %v2934_v19 = vld [vmem:[#allocation2 + $0x7b] ss:$2 sm:$0xff] }
 0x454   :  { %v7259_v28 = vadd.f32 %v2573_v47, %v2429_v38  ;;  %v3132_v47 = vld [vmem:[#allocation2 + $0x32] ss:$2 sm:$0xff] }
 0x456   :  { %5200 = vmatmul.msk.f32.gmra.mxu2 %vm1446_vm2, %v2628_v51  ;;  %5218 = vmatmul.msk.f32.gmra.mxu3 %vm1446_vm2, %v2794_v16 }
 0x459   :  { %v2410_v59 = vpop.f32.mrf.mxu2  ;;  %v2576_v7 = vpop.f32.mrf.mxu3 }
 0x45a   :  { %v2430_v60 = vadd.f32 %v2410_v59, %v7133_v10  ;;  %v2936_v59 = vld [vmem:[#allocation2 + $0xab] ss:$2 sm:$0xff] }
 0x45c   :  { %v7264_v1 = vadd.f32 %v2576_v7, %v2430_v60  ;;  %v3134_v7 = vld [vmem:[#allocation2 + $0x62] ss:$2 sm:$0xff] }
 0x45e   :  { %5201 = vmatmul.msk.f32.gmra.mxu2 %vm1446_vm2, %v2630_v11  ;;  %5219 = vmatmul.msk.f32.gmra.mxu3 %vm1446_vm2, %v2796_v45 }
 0x461   :  { %v2413_v56 = vpop.f32.mrf.mxu2  ;;  %v2579_v55 = vpop.f32.mrf.mxu3 }
 0x462   :  { %v2431_v37 = vadd.f32 %v2413_v56, %v7145_v46  ;;  %v2938_v56 = vld [vmem:[#allocation2 + $0xdb] ss:$2 sm:$0xff] }
 0x464   :  { %v7269_v6 = vadd.f32 %v2579_v55, %v2431_v37  ;;  %v3136_v55 = vld [vmem:[#allocation2 + $0x92] ss:$2 sm:$0xff] }
 0x466   :  { %5222 = vmatmul.msk.f32.vlgmr.msra.gmra.mxu2 %vm1446_vm2, %v2932_v53  ;;  %5240 = vmatmul.msk.f32.vlgmr.msra.gmra.mxu3 %vm1446_vm2, %v3130_v49 }
 0x469   :  { %v2701_v10 = vpop.f32.mrf.mxu2  ;;  %v2867_v32 = vpop.f32.mrf.mxu3 }
 0x46a   :  { %v2749_v42 = vadd.f32 %v2701_v10, %v7154_v20  ;;  %v2940_v10 = vld [vmem:[#allocation2 + $0x10b] ss:$2 sm:$0xff] }
 0x46c   :  { %v7274_v29 = vadd.f32 %v2867_v32, %v2749_v42  ;;  %v3138_v32 = vld [vmem:[#allocation2 + $0xc2] ss:$2 sm:$0xff] }
 0x46e   :  { %5223 = vmatmul.msk.f32.gmra.mxu2 %vm1446_vm2, %v2934_v19  ;;  %5241 = vmatmul.msk.f32.gmra.mxu3 %vm1446_vm2, %v3132_v47 }
 0x471   :  { %v2704_v46 = vpop.f32.mrf.mxu2  ;;  %v2870_v38 = vpop.f32.mrf.mxu3 }
 0x472   :  { %v2750_v51 = vadd.f32 %v2704_v46, %v7165_v61  ;;  %v2942_v46 = vld [vmem:[#allocation2 + $0x13b] ss:$2 sm:$0xff] }
 0x474   :  { %v7279_v16 = vadd.f32 %v2870_v38, %v2750_v51  ;;  %v3140_v38 = vld [vmem:[#allocation2 + $0xf2] ss:$2 sm:$0xff] }
 0x476   :  { %5224 = vmatmul.msk.f32.gmra.mxu2 %vm1446_vm2, %v2936_v59  ;;  %5242 = vmatmul.msk.f32.gmra.mxu3 %vm1446_vm2, %v3134_v7 }
 0x479   :  { %v2707_v20 = vpop.f32.mrf.mxu2  ;;  %v2873_v60 = vpop.f32.mrf.mxu3 }
 0x47a   :  { %v2751_v11 = vadd.f32 %v2707_v20, %v7176_v27  ;;  %v2944_v20 = vld [vmem:[#allocation2 + $0x16b] ss:$2 sm:$0xff] }
 0x47c   :  { %v7284_v45 = vadd.f32 %v2873_v60, %v2751_v11  ;;  %v3142_v60 = vld [vmem:[#allocation2 + $0x122] ss:$2 sm:$0xff] }
 0x47e   :  { %5225 = vmatmul.msk.f32.gmra.mxu2 %vm1446_vm2, %v2938_v56  ;;  %5243 = vmatmul.msk.f32.gmra.mxu3 %vm1446_vm2, %v3136_v55 }
 0x481   :  { %v2710_v61 = vpop.f32.mrf.mxu2  ;;  %v2876_v37 = vpop.f32.mrf.mxu3 }
 0x482   :  { %v2752_v49 = vadd.f32 %v2710_v61, %v7185_v58  ;;  %v2946_v61 = vld [vmem:[#allocation2 + $0x19b] ss:$2 sm:$0xff] }
 0x484   :  { %v7289_v53 = vadd.f32 %v2876_v37, %v2752_v49  ;;  %v3144_v37 = vld [vmem:[#allocation2 + $0x152] ss:$2 sm:$0xff] }
 0x486   :  { %5226 = vmatmul.msk.f32.gmra.mxu2 %vm1446_vm2, %v2940_v10  ;;  %5244 = vmatmul.msk.f32.gmra.mxu3 %vm1446_vm2, %v3138_v32  ;;  %v3146_v32 = vld [vmem:[#allocation2 + $0x1e2] ss:$2 sm:$0xff] }
 0x489   :  { %v2713_v27 = vpop.f32.mrf.mxu2  ;;  %v2879_v42 = vpop.f32.mrf.mxu3 }
 0x48a   :  { %v2753_v19 = vadd.f32 %v2713_v27, %v7194_v33 }
 0x48c   :  { %v7294_v47 = vadd.f32 %v2879_v42, %v2753_v19  ;;  %v5291_v42 = vld [vmem:[%s7784_s6 + $0xc] sm:$0xf]  ;;  %v5309_v19 = vld [vmem:[%s7784_s6 + $0x10] sm:$0xf] }
 0x48d   :  { %5292 = vmatpush.msk.msrb.mxu2 %vm1749_vm4, %v5291_v42  ;;  %5310 = vmatpush.msk.msrb.mxu3 %vm1749_vm4, %v5309_v19 }
 0x48e   :  { %5227 = vmatmul.msk.f32.gmra.mxu2 %vm1446_vm2, %v2942_v46  ;;  %5245 = vmatmul.msk.f32.gmra.mxu3 %vm1446_vm2, %v3140_v38 }
 0x491   :  { %v2716_v58 = vpop.f32.mrf.mxu2  ;;  %v2882_v51 = vpop.f32.mrf.mxu3 }
 0x492   :  { %v2754_v59 = vadd.f32 %v2716_v58, %v7209_v36 }
 0x494   :  { %v7299_v7 = vadd.f32 %v2882_v51, %v2754_v59  ;;  %v2950_v51 = vld [vmem:[#allocation2 + $0x25b] ss:$2 sm:$0xff]  ;;  %v3148_v59 = vld [vmem:[#allocation2 + $0x212] ss:$2 sm:$0xff] }
 0x496   :  { %5228 = vmatmul.msk.f32.gmra.mxu2 %vm1446_vm2, %v2944_v20  ;;  %5246 = vmatmul.msk.f32.gmra.mxu3 %vm1446_vm2, %v3142_v60 }
 0x499   :  { %v2719_v33 = vpop.f32.mrf.mxu2  ;;  %v2885_v11 = vpop.f32.mrf.mxu3 }
 0x49a   :  { %v2755_v56 = vadd.f32 %v2719_v33, %v7216_v21  ;;  %v2948_v21 = vld [vmem:[#allocation2 + $0x22b] ss:$2 sm:$0xff] }
 0x49c   :  { %v7304_v55 = vadd.f32 %v2885_v11, %v2755_v56  ;;  %v2952_v56 = vld [vmem:[#allocation2 + $0x28b] ss:$2 sm:$0xff] }
 0x49e   :  { %5229 = vmatmul.msk.f32.gmra.mxu2 %vm1446_vm2, %v2946_v61  ;;  %5247 = vmatmul.msk.f32.gmra.mxu3 %vm1446_vm2, %v3144_v37  ;;  %v3150_v61 = vld [vmem:[#allocation2 + $0x242] ss:$2 sm:$0xff] }
 0x4a1   :  { %v2722_v36 = vpop.f32.mrf.mxu2  ;;  %v2888_v49 = vpop.f32.mrf.mxu3 }
 0x4a2   :  { %v2756_v10 = vadd.f32 %v2722_v36, %v7221_v8 }
 0x4a4   :  { %v7309_v27 = vadd.f32 %v2888_v49, %v2756_v10  ;;  %v2954_v10 = vld [vmem:[#allocation2 + $0x2bb] ss:$2 sm:$0xff] }
 0x4a6   :  { %5230 = vmatmul.msk.f32.gmra.mxu2 %vm1446_vm2, %v2948_v21  ;;  %5248 = vmatmul.msk.f32.gmra.mxu3 %vm1446_vm2, %v3146_v32  ;;  %v3152_v32 = vld [vmem:[#allocation2 + $0x272] ss:$2 sm:$0xff] }
 0x4a9   :  { %v2725_v8 = vpop.f32.mrf.mxu2  ;;  %v2891_v46 = vpop.f32.mrf.mxu3 }
 0x4aa   :  { %v2757_v38 = vadd.f32 %v2725_v8, %v7234_v40  ;;  %v2956_v8 = vld [vmem:[#allocation2 + $0x2eb] ss:$2 sm:$0xff] }
 0x4ac   :  { %v7322_v58 = vadd.f32 %v2891_v46, %v2757_v38  ;;  %v3154_v46 = vld [vmem:[#allocation2 + $0x2a2] ss:$2 sm:$0xff] }
 0x4ae   :  { %5231 = vmatmul.msk.f32.gmra.mxu2 %vm1446_vm2, %v2950_v51  ;;  %5249 = vmatmul.msk.f32.gmra.mxu3 %vm1446_vm2, %v3148_v59 }
 0x4b1   :  { %v2728_v20 = vpop.f32.mrf.mxu2  ;;  %v2894_v60 = vpop.f32.mrf.mxu3 }
 0x4b2   :  { %v2758_v33 = vadd.f32 %v2728_v20, %v7239_v50  ;;  %v2958_v20 = vld [vmem:[#allocation2 + $0x31b] ss:$2 sm:$0xff] }
 0x4b4   :  { %v7327_v11 = vadd.f32 %v2894_v60, %v2758_v33  ;;  %v3156_v60 = vld [vmem:[#allocation2 + $0x2d2] ss:$2 sm:$0xff] }
 0x4b6   :  { %5232 = vmatmul.msk.f32.gmra.mxu2 %vm1446_vm2, %v2952_v56  ;;  %5250 = vmatmul.msk.f32.gmra.mxu3 %vm1446_vm2, %v3150_v61 }
 0x4b9   :  { %v2731_v40 = vpop.f32.mrf.mxu2  ;;  %v2897_v37 = vpop.f32.mrf.mxu3 }
 0x4ba   :  { %v2759_v36 = vadd.f32 %v2731_v40, %v7244_v18  ;;  %v2960_v40 = vld [vmem:[#allocation2 + $0x34b] ss:$2 sm:$0xff] }
 0x4bc   :  { %v7332_v49 = vadd.f32 %v2897_v37, %v2759_v36  ;;  %v3158_v37 = vld [vmem:[#allocation2 + $0x302] ss:$2 sm:$0xff] }
 0x4be   :  { %5233 = vmatmul.msk.f32.gmra.mxu2 %vm1446_vm2, %v2954_v10  ;;  %5251 = vmatmul.msk.f32.gmra.mxu3 %vm1446_vm2, %v3152_v32 }
 0x4c1   :  { %v2734_v50 = vpop.f32.mrf.mxu2  ;;  %v2900_v42 = vpop.f32.mrf.mxu3 }
 0x4c2   :  { %v2760_v21 = vadd.f32 %v2734_v50, %v7249_v3  ;;  %v2962_v50 = vld [vmem:[#allocation2 + $0x37b] ss:$2 sm:$0xff] }
 0x4c4   :  { %v7337_v19 = vadd.f32 %v2900_v42, %v2760_v21  ;;  %v3160_v42 = vld [vmem:[#allocation2 + $0x332] ss:$2 sm:$0xff] }
 0x4c6   :  { %5234 = vmatmul.msk.f32.gmra.mxu2 %vm1446_vm2, %v2956_v8  ;;  %5252 = vmatmul.msk.f32.gmra.mxu3 %vm1446_vm2, %v3154_v46 }
 0x4c9   :  { %v2737_v18 = vpop.f32.mrf.mxu2  ;;  %v2903_v38 = vpop.f32.mrf.mxu3 }
 0x4ca   :  { %v2761_v51 = vadd.f32 %v2737_v18, %v7254_v62  ;;  %v3561_v18 = vld [vmem:[#allocation2 + $0x30] ss:$2 sm:$0xff] }
 0x4cc   :  { %v7342_v59 = vadd.f32 %v2903_v38, %v2761_v51  ;;  %v5415_v38 = vld [vmem:[#allocation2 + $0x32] ss:$2 sm:$0xff] }
 0x4ce   :  { %5235 = vmatmul.msk.f32.gmra.mxu2 %vm1446_vm2, %v2958_v20  ;;  %5253 = vmatmul.msk.f32.gmra.mxu3 %vm1446_vm2, %v3156_v60  ;;  %v3563_v60 = vld [vmem:[#allocation2 + $0x60] ss:$2 sm:$0xff] }
 0x4d1   :  { %v2740_v3 = vpop.f32.mrf.mxu2  ;;  %v2906_v33 = vpop.f32.mrf.mxu3 }
 0x4d2   :  { %v2762_v56 = vadd.f32 %v2740_v3, %v7259_v28  ;;  %v5416_v3 = vld [vmem:[#allocation2 + $0x62] ss:$2 sm:$0xff] }
 0x4d4   :  { %v7347_v61 = vadd.f32 %v2906_v33, %v2762_v56 }
 0x4d6   :  { %5236 = vmatmul.msk.f32.gmra.mxu2 %vm1446_vm2, %v2960_v40  ;;  %5254 = vmatmul.msk.f32.gmra.mxu3 %vm1446_vm2, %v3158_v37  ;;  %v3565_v40 = vld [vmem:[#allocation2 + $0x90] ss:$2 sm:$0xff] }
 0x4d7   :  { %v5417_v37 = vld [vmem:[#allocation2 + $0x92] ss:$2 sm:$0xff] }
 0x4d9   :  { %v2743_v62 = vpop.f32.mrf.mxu2  ;;  %v2909_v36 = vpop.f32.mrf.mxu3 }
 0x4da   :  { %v2763_v10 = vadd.f32 %v2743_v62, %v7264_v1 }
 0x4dc   :  { %v7352_v32 = vadd.f32 %v2909_v36, %v2763_v10  ;;  %v3567_v10 = vld [vmem:[#allocation2 + $0xc0] ss:$2 sm:$0xff] }
 0x4de   :  { %5237 = vmatmul.msk.f32.gmra.mxu2 %vm1446_vm2, %v2962_v50  ;;  %5255 = vmatmul.msk.f32.gmra.mxu3 %vm1446_vm2, %v3160_v42 }
 0x4e1   :  { %v2746_v28 = vpop.f32.mrf.mxu2  ;;  %v2912_v21 = vpop.f32.mrf.mxu3 }
 0x4e2   :  { %v2764_v8 = vadd.f32 %v2746_v28, %v7269_v6  ;;  %v3569_v28 = vld [vmem:[#allocation2 + $0xf0] ss:$2 sm:$0xff] }
 0x4e4   :  { %v7357_v46 = vadd.f32 %v2912_v21, %v2764_v8 }
 0x4e6   :  { %5293 = vmatmul.msk.f32.vlgmr.msrb.gmra.mxu2 %vm1446_vm2, %v3561_v18  ;;  %5311 = vmatmul.msk.f32.vlgmr.msrb.gmra.mxu3 %vm1446_vm2, %v5415_v38  ;;  %v3571_v18 = vld [vmem:[#allocation2 + $0x120] ss:$2 sm:$0xff] }
 0x4e9   :  { %v3033_v1 = vpop.f32.mrf.mxu2  ;;  %v7361_v51 = vpop.f32.mrf.mxu3 }
 0x4ea   :  { %v7364_v20 = vadd.f32 %v3033_v1, %v7274_v29  ;;  %v3573_v1 = vld [vmem:[#allocation2 + $0x150] ss:$2 sm:$0xff] }
 0x4ee   :  { %5294 = vmatmul.msk.f32.gmra.mxu2 %vm1446_vm2, %v3563_v60  ;;  %5312 = vmatmul.msk.f32.gmra.mxu3 %vm1446_vm2, %v5416_v3  ;;  %v3575_v3 = vld [vmem:[#allocation2 + $0x180] ss:$2 sm:$0xff] }
 0x4f1   :  { %v3036_v6 = vpop.f32.mrf.mxu2  ;;  %v7368_v33 = vpop.f32.mrf.mxu3 }
 0x4f2   :  { %v7371_v56 = vadd.f32 %v3036_v6, %v7279_v16 }
 0x4f6   :  { %5295 = vmatmul.msk.f32.gmra.mxu2 %vm1446_vm2, %v3565_v40  ;;  %5313 = vmatmul.msk.f32.gmra.mxu3 %vm1446_vm2, %v5417_v37 }
 0x4f9   :  { %v3039_v29 = vpop.f32.mrf.mxu2  ;;  %v7375_v62 = vpop.f32.mrf.mxu3 }
 0x4fa   :  { %v7378_v36 = vadd.f32 %v3039_v29, %v7284_v45  ;;  %v3579_v29 = vld [vmem:[#allocation2 + $0x240] ss:$2 sm:$0xff] }
 0x4fe   :  { %5296 = vmatmul.msk.f32.gmra.mxu2 %vm1446_vm2, %v3567_v10  ;;  %5314 = vmatmul.msk.f32.gmra.mxu3 %vm1446_vm2, %v6989_v26 }
 0x501   :  { %v3042_v16 = vpop.f32.mrf.mxu2  ;;  %v7383_v50 = vpop.f32.mrf.mxu3 }
 0x502   :  { %v7386_v42 = vadd.f32 %v3042_v16, %v7289_v53 }
 0x506   :  { %5297 = vmatmul.msk.f32.gmra.mxu2 %vm1446_vm2, %v3569_v28  ;;  %5315 = vmatmul.msk.f32.gmra.mxu3 %vm1446_vm2, %v6998_v17  ;;  %v3581_v28 = vld [vmem:[#allocation2 + $0x270] ss:$2 sm:$0xff] }
 0x509   :  { %v3045_v45 = vpop.f32.mrf.mxu2  ;;  %v7391_v21 = vpop.f32.mrf.mxu3 }
 0x50a   :  { %v7394_v8 = vadd.f32 %v3045_v45, %v7294_v47 }
 0x50e   :  { %5298 = vmatmul.msk.f32.gmra.mxu2 %vm1446_vm2, %v3571_v18  ;;  %5316 = vmatmul.msk.f32.gmra.mxu3 %vm1446_vm2, %v7007_v41 }
 0x511   :  { %v3048_v26 = vpop.f32.mrf.mxu2  ;;  %v7399_v53 = vpop.f32.mrf.mxu3 }
 0x512   :  { %v7402_v38 = vadd.f32 %v3048_v26, %v7299_v7  ;;  %v3583_v26 = vld [vmem:[#allocation2 + $0x2a0] ss:$2 sm:$0xff] }
 0x516   :  { %5299 = vmatmul.msk.f32.gmra.mxu2 %vm1446_vm2, %v3573_v1  ;;  %5317 = vmatmul.msk.f32.gmra.mxu3 %vm1446_vm2, %v7016_v57  ;;  %v5363_v57 = vld [vmem:[%s7784_s6 + $0x1c] sm:$0xf] }
 0x517   :  { %5364 = vmatpush.msk.msra.mxu2 %vm1749_vm4, %v5363_v57 }
 0x519   :  { %v3051_v17 = vpop.f32.mrf.mxu2  ;;  %v7407_v47 = vpop.f32.mrf.mxu3 }
 0x51a   :  { %v7410_v60 = vadd.f32 %v3051_v17, %v7304_v55  ;;  %v3577_v55 = vld [vmem:[#allocation2 + $0x210] ss:$2 sm:$0xff] }
 0x51b   :  { %v3585_v17 = vld [vmem:[#allocation2 + $0x2d0] ss:$2 sm:$0xff] }
 0x51e   :  { %5300 = vmatmul.msk.f32.gmra.mxu2 %vm1446_vm2, %v3575_v3  ;;  %5318 = vmatmul.msk.f32.gmra.mxu3 %vm1446_vm2, %v7027_v30  ;;  %v5381_v30 = vld [vmem:[%s7784_s6 + $0x20] sm:$0xf]  ;;  %s5446_s6 = smov 4  }
 0x51f   :  { %5382 = vmatpush.msk.msra.mxu3 %vm1749_vm4, %v5381_v30  ;;  %v3589_v30 = vld [vmem:[#allocation2 + $0x330] ss:$2 sm:$0xff] }
 0x521   :  { %v3054_v41 = vpop.f32.mrf.mxu2  ;;  %v7415_v7 = vpop.f32.mrf.mxu3 }
 0x522   :  { %v7418_v6 = vadd.f32 %v3054_v41, %v7309_v27  ;;  %v3587_v41 = vld [vmem:[#allocation2 + $0x300] ss:$2 sm:$0xff] }
 0x526   :  { %5301 = vmatmul.msk.f32.gmra.mxu2 %vm1446_vm2, %v3577_v55  ;;  %5319 = vmatmul.msk.f32.gmra.mxu3 %vm1446_vm2, %v7041_v5 }
 0x529   :  { %v3057_v27 = vpop.f32.mrf.mxu2  ;;  %v7431_v40 = vpop.f32.mrf.mxu3 }
 0x52a   :  { %v7434_v37 = vadd.f32 %v3057_v27, %v7322_v58 }
 0x52e   :  { %5302 = vmatmul.msk.f32.gmra.mxu2 %vm1446_vm2, %v3579_v29  ;;  %5320 = vmatmul.msk.f32.gmra.mxu3 %vm1446_vm2, %v7057_v9  ;;  %v3591_v29 = vld [vmem:[#allocation2 + $0x360] ss:$2 sm:$0xff] }
 0x531   :  { %v3060_v10 = vpop.f32.mrf.mxu2  ;;  %v7439_v5 = vpop.f32.mrf.mxu3 }
 0x532   :  { %v7442_v16 = vadd.f32 %v3060_v10, %v7327_v11 }
 0x536   :  { %5303 = vmatmul.msk.f32.gmra.mxu2 %vm1446_vm2, %v3581_v28  ;;  %5321 = vmatmul.msk.f32.gmra.mxu3 %vm1446_vm2, %v7068_v4 }
 0x539   :  { %v3063_v58 = vpop.f32.mrf.mxu2  ;;  %v7447_v45 = vpop.f32.mrf.mxu3 }
 0x53a   :  { %v7450_v18 = vadd.f32 %v3063_v58, %v7332_v49  ;;  %v4145_v58 = vld [vmem:[#allocation2 + $0x62] ss:$2 sm:$0xff] }
 0x53e   :  { %5304 = vmatmul.msk.f32.gmra.mxu2 %vm1446_vm2, %v3583_v26  ;;  %5322 = vmatmul.msk.f32.gmra.mxu3 %vm1446_vm2, %v7079_v31  ;;  %v4009_v31 = vld [vmem:[#allocation2 + $0x390] ss:$2 sm:$0xff] }
 0x53f   :  { %v4311_v26 = vld [vmem:[#allocation2 + $0x64] ss:$2 sm:$0xff] }
 0x541   :  { %v3066_v9 = vpop.f32.mrf.mxu2  ;;  %v7455_v11 = vpop.f32.mrf.mxu3 }
 0x542   :  { %v7458_v1 = vadd.f32 %v3066_v9, %v7337_v19  ;;  %v7471_v19 = vpop.f32.mrf.mxu1  ;;  %5362 = vmatmul.msk.f32.gmra.mxu1 %vm1446_vm2, %v4009_v31  ;;  %v4313_v31 = vld [vmem:[#allocation2 + $0x94] ss:$2 sm:$0xff] }
 0x546   :  { %5305 = vmatmul.msk.f32.gmra.mxu2 %vm1446_vm2, %v3585_v17  ;;  %5323 = vmatmul.msk.f32.gmra.mxu3 %vm1446_vm2, %v7090_v0 }
 0x549   :  { %v3069_v4 = vpop.f32.mrf.mxu2  ;;  %v7463_v49 = vpop.f32.mrf.mxu3 }
 0x54a   :  { %v7466_v3 = vadd.f32 %v3069_v4, %v7342_v59  ;;  %v3351_v4 = vadd.f32 %v7114_v48, %v7368_v33  ;;  %v4149_v48 = vld [vmem:[#allocation2 + $0xc2] ss:$2 sm:$0xff] }
 0x54b   :  { %v4315_v33 = vld [vmem:[#allocation2 + $0xc4] ss:$2 sm:$0xff] }
 0x54e   :  { %5306 = vmatmul.msk.f32.gmra.mxu2 %vm1446_vm2, %v3587_v41  ;;  %5324 = vmatmul.msk.f32.gmra.mxu3 %vm1446_vm2, %v7105_v13 }
 0x551   :  { %v3072_v57 = vpop.f32.mrf.mxu2  ;;  %v7474_v55 = vpop.f32.mrf.mxu3 }
 0x552   :  { %v7477_v0 = vadd.f32 %v3072_v57, %v7347_v61 }
 0x556   :  { %5307 = vmatmul.msk.f32.gmra.mxu2 %vm1446_vm2, %v3589_v30  ;;  %5325 = vmatmul.msk.f32.gmra.mxu3 %vm1446_vm2, %v7120_v35  ;;  %v3348_v35 = vadd.f32 %v7094_v15, %v7361_v51  ;;  %v3546_v15 = vadd.f32 %v7116_v24, %v3351_v4 }
 0x559   :  { %v3075_v59 = vpop.f32.mrf.mxu2  ;;  %v7482_v27 = vpop.f32.mrf.mxu3 }
 0x55a   :  { %v7485_v13 = vadd.f32 %v3075_v59, %v7352_v32  ;;  %v3545_v32 = vadd.f32 %v7101_v44, %v3348_v35  ;;  %v7507_v44 = vpop.f32.mrf.mxu0  ;;  %v3354_v59 = vadd.f32 %v7129_v63, %v7375_v62  ;;  %v4151_v63 = vld [vmem:[#allocation2 + $0xf2] ss:$2 sm:$0xff] }
 0x55b   :  { %v4317_v62 = vld [vmem:[#allocation2 + $0xf4] ss:$2 sm:$0xff] }
 0x55c   :  { %v3547_v24 = vadd.f32 %v7131_v54, %v3354_v59 }
 0x55e   :  { %5308 = vmatmul.msk.f32.gmra.mxu2 %vm1446_vm2, %v3591_v29  ;;  %5326 = vmatmul.msk.f32.gmra.mxu3 %vm1446_vm2, %v7135_v25 }
 0x561   :  { %v3078_v61 = vpop.f32.mrf.mxu2  ;;  %v7490_v10 = vpop.f32.mrf.mxu3 }
 0x562   :  { %v7493_v28 = vadd.f32 %v3078_v61, %v7357_v46  ;;  %v4147_v46 = vld [vmem:[#allocation2 + $0x92] ss:$2 sm:$0xff]  ;;  %v7515_v61 = vpop.f32.mrf.mxu1 }
 0x566   :  { %5365 = vmatmul.msk.f32.vlgmr.msra.gmra.mxu2 %vm1446_vm2, %v4145_v58  ;;  %5383 = vmatmul.msk.f32.vlgmr.msra.gmra.mxu3 %vm1446_vm2, %v4311_v26 }
 0x569   :  { %v3662_v9 = vpop.f32.mrf.mxu2  ;;  %v3748_v17 = vpop.f32.mrf.mxu3 }
 0x56a   :  { %v3710_v25 = vadd.f32 %v3662_v9, %v3545_v32  ;;  %v3357_v32 = vadd.f32 %v7143_v22, %v7383_v50  ;;  %v3360_v22 = vadd.f32 %v7158_v12, %v7391_v21  ;;  %v3363_v12 = vadd.f32 %v7171_v14, %v7399_v53  ;;  %v4157_v14 = vld [vmem:[#allocation2 + $0x182] ss:$2 sm:$0xff] }
 0x56b   :  { %v4323_v53 = vld [vmem:[#allocation2 + $0x184] ss:$2 sm:$0xff] }
 0x56c   :  { %v7502_v41 = vadd.f32 %v3748_v17, %v3710_v25  ;;  %v7522_v17 = vpop.f32.mrf.mxu0  ;;  %v3548_v25 = vadd.f32 %v7149_v39, %v3357_v32  ;;  %v3549_v39 = vadd.f32 %v7162_v34, %v3360_v22 }
 0x56e   :  { %5366 = vmatmul.msk.f32.gmra.mxu2 %vm1446_vm2, %v4147_v46  ;;  %5384 = vmatmul.msk.f32.gmra.mxu3 %vm1446_vm2, %v4313_v31  ;;  %v7527_v46 = vpop.f32.mrf.mxu1 }
 0x571   :  { %v3665_v51 = vpop.f32.mrf.mxu2  ;;  %v3751_v57 = vpop.f32.mrf.mxu3 }
 0x572   :  { %v3711_v30 = vadd.f32 %v3665_v51, %v3546_v15  ;;  %v4153_v15 = vld [vmem:[#allocation2 + $0x122] ss:$2 sm:$0xff] }
 0x573   :  { %v4319_v51 = vld [vmem:[#allocation2 + $0x124] ss:$2 sm:$0xff] }
 0x574   :  { %v7511_v29 = vadd.f32 %v3751_v57, %v3711_v30  ;;  %v7535_v57 = vpop.f32.mrf.mxu0 }
 0x576   :  { %5367 = vmatmul.msk.f32.gmra.mxu2 %vm1446_vm2, %v4149_v48  ;;  %5385 = vmatmul.msk.f32.gmra.mxu3 %vm1446_vm2, %v4315_v33  ;;  %v7538_v33 = vpop.f32.mrf.mxu1 }
 0x579   :  { %v3668_v35 = vpop.f32.mrf.mxu2  ;;  %v3754_v58 = vpop.f32.mrf.mxu3 }
 0x57a   :  { %v3712_v26 = vadd.f32 %v3668_v35, %v3547_v24  ;;  %v4155_v24 = vld [vmem:[#allocation2 + $0x152] ss:$2 sm:$0xff] }
 0x57b   :  { %v4321_v35 = vld [vmem:[#allocation2 + $0x154] ss:$2 sm:$0xff] }
 0x57c   :  { %v7520_v9 = vadd.f32 %v3754_v58, %v3712_v26  ;;  %v3550_v58 = vadd.f32 %v7174_v2, %v3363_v12  ;;  %v3380_v32 = vpop.f32.mrf.mxu0 }
 0x57e   :  { %5368 = vmatmul.msk.f32.gmra.mxu2 %vm1446_vm2, %v4151_v63  ;;  %5386 = vmatmul.msk.f32.gmra.mxu3 %vm1446_vm2, %v4317_v62  ;;  %v3366_v62 = vadd.f32 %v7183_v23, %v7407_v47  ;;  %v3369_v23 = vadd.f32 %v7196_v43, %v7415_v7 }
 0x581   :  { %v3671_v4 = vpop.f32.mrf.mxu2  ;;  %v3757_v54 = vpop.f32.mrf.mxu3 }
 0x582   :  { %v3713_v31 = vadd.f32 %v3671_v4, %v3548_v25  ;;  %v3530_v4 = vpop.f32.mrf.mxu1 }
 0x584   :  { %v7531_v50 = vadd.f32 %v3757_v54, %v3713_v31  ;;  %v3551_v54 = vadd.f32 %v7187_v52, %v3366_v62 }
 0x586   :  { %5369 = vmatmul.msk.f32.gmra.mxu2 %vm1446_vm2, %v4153_v15  ;;  %5387 = vmatmul.msk.f32.gmra.mxu3 %vm1446_vm2, %v4319_v51  ;;  %v4159_v15 = vld [vmem:[#allocation2 + $0x1b2] ss:$2 sm:$0xff] }
 0x587   :  { %v4325_v51 = vld [vmem:[#allocation2 + $0x1b4] ss:$2 sm:$0xff] }
 0x589   :  { %v3674_v30 = vpop.f32.mrf.mxu2  ;;  %v3760_v59 = vpop.f32.mrf.mxu3 }
 0x58a   :  { %v3714_v48 = vadd.f32 %v3674_v30, %v3549_v39  ;;  %v3383_v39 = vpop.f32.mrf.mxu0  ;;  %v3533_v30 = vpop.f32.mrf.mxu1 }
 0x58c   :  { %v7542_v21 = vadd.f32 %v3760_v59, %v3714_v48  ;;  %v3552_v59 = vadd.f32 %v7471_v19, %v3369_v23 }
 0x58e   :  { %5370 = vmatmul.msk.f32.gmra.mxu2 %vm1446_vm2, %v4155_v24  ;;  %5388 = vmatmul.msk.f32.gmra.mxu3 %vm1446_vm2, %v4321_v35  ;;  %v3372_v24 = vadd.f32 %v7507_v44, %v7431_v40  ;;  %v4163_v40 = vld [vmem:[#allocation2 + $0x272] ss:$2 sm:$0xff] }
 0x58f   :  { %v4329_v44 = vld [vmem:[#allocation2 + $0x274] ss:$2 sm:$0xff] }
 0x590   :  { %v3553_v7 = vadd.f32 %v7515_v61, %v3372_v24  ;;  %v3381_v24 = vadd.f32 %v3380_v32, %v7455_v11  ;;  %v4335_v11 = vld [vmem:[#allocation2 + $0x304] ss:$2 sm:$0xff] }
 0x591   :  { %v3677_v26 = vpop.f32.mrf.mxu2  ;;  %v3763_v34 = vpop.f32.mrf.mxu3 }
 0x592   :  { %v3715_v63 = vadd.f32 %v3677_v26, %v3550_v58  ;;  %v4161_v58 = vld [vmem:[#allocation2 + $0x242] ss:$2 sm:$0xff]  ;;  %v3386_v43 = vpop.f32.mrf.mxu0  ;;  %v3536_v19 = vpop.f32.mrf.mxu1 }
 0x593   :  { %v4327_v26 = vld [vmem:[#allocation2 + $0x244] ss:$2 sm:$0xff] }
 0x594   :  { %v7549_v25 = vadd.f32 %v3763_v34, %v3715_v63 }
 0x596   :  { %5371 = vmatmul.msk.f32.gmra.mxu2 %vm1446_vm2, %v4157_v14  ;;  %5389 = vmatmul.msk.f32.gmra.mxu3 %vm1446_vm2, %v4323_v53  ;;  %v3375_v14 = vadd.f32 %v7522_v17, %v7439_v5  ;;  %v4165_v5 = vld [vmem:[#allocation2 + $0x2a2] ss:$2 sm:$0xff] }
 0x597   :  { %v4331_v17 = vld [vmem:[#allocation2 + $0x2a4] ss:$2 sm:$0xff] }
 0x599   :  { %v3680_v31 = vpop.f32.mrf.mxu2  ;;  %v3766_v2 = vpop.f32.mrf.mxu3 }
 0x59a   :  { %v3716_v22 = vadd.f32 %v3680_v31, %v3551_v54  ;;  %v3389_v54 = vpop.f32.mrf.mxu0  ;;  %v3554_v31 = vadd.f32 %v7527_v46, %v3375_v14  ;;  %v3384_v14 = vadd.f32 %v3383_v39, %v7463_v49 }
 0x59c   :  { %v7556_v47 = vadd.f32 %v3766_v2, %v3716_v22 }
 0x59e   :  { %5372 = vmatmul.msk.f32.gmra.mxu2 %vm1446_vm2, %v4159_v15  ;;  %5390 = vmatmul.msk.f32.gmra.mxu3 %vm1446_vm2, %v4325_v51  ;;  %v3539_v15 = vpop.f32.mrf.mxu1  ;;  %v3378_v51 = vadd.f32 %v7535_v57, %v7447_v45  ;;  %v4333_v45 = vld [vmem:[#allocation2 + $0x2d4] ss:$2 sm:$0xff] }
 0x5a1   :  { %v3683_v48 = vpop.f32.mrf.mxu2  ;;  %v3769_v52 = vpop.f32.mrf.mxu3 }
 0x5a2   :  { %v3717_v12 = vadd.f32 %v3683_v48, %v3552_v59  ;;  %v3555_v59 = vadd.f32 %v7538_v33, %v3378_v51  ;;  %v3392_v46 = vpop.f32.mrf.mxu0 }
 0x5a4   :  { %v7563_v35 = vadd.f32 %v3769_v52, %v3717_v12 }
 0x5a6   :  { %5373 = vmatmul.msk.f32.gmra.mxu2 %vm1446_vm2, %v4161_v58  ;;  %5391 = vmatmul.msk.f32.gmra.mxu3 %vm1446_vm2, %v4327_v26  ;;  %v4167_v26 = vld [vmem:[#allocation2 + $0x2d2] ss:$2 sm:$0xff]  ;;  %v3542_v57 = vpop.f32.mrf.mxu1 }
 0x5a9   :  { %v3686_v34 = vpop.f32.mrf.mxu2  ;;  %v3772_v63 = vpop.f32.mrf.mxu3 }
 0x5aa   :  { %v3718_v62 = vadd.f32 %v3686_v34, %v3553_v7  ;;  %v3556_v7 = vadd.f32 %v3530_v4, %v3381_v24  ;;  %v3914_v33 = vpop.f32.mrf.mxu0  ;;  %v3387_v4 = vadd.f32 %v3386_v43, %v7474_v55  ;;  %v4339_v55 = vld [vmem:[#allocation2 + $0x364] ss:$2 sm:$0xff] }
 0x5ac   :  { %v7570_v53 = vadd.f32 %v3772_v63, %v3718_v62  ;;  %v3558_v39 = vadd.f32 %v3536_v19, %v3387_v4  ;;  %v4175_v19 = vld [vmem:[#allocation2 + $0x392] ss:$2 sm:$0xff] }
 0x5ae   :  { %5374 = vmatmul.msk.f32.gmra.mxu2 %vm1446_vm2, %v4163_v40  ;;  %5392 = vmatmul.msk.f32.gmra.mxu3 %vm1446_vm2, %v4329_v44  ;;  %v4169_v44 = vld [vmem:[#allocation2 + $0x302] ss:$2 sm:$0xff]  ;;  %v4080_v32 = vpop.f32.mrf.mxu1 }
 0x5b1   :  { %v3689_v2 = vpop.f32.mrf.mxu2  ;;  %v3775_v61 = vpop.f32.mrf.mxu3 }
 0x5b2   :  { %v3719_v22 = vadd.f32 %v3689_v2, %v3554_v31  ;;  %v3557_v31 = vadd.f32 %v3533_v30, %v3384_v14  ;;  %v3917_v49 = vpop.f32.mrf.mxu0  ;;  %v3390_v30 = vadd.f32 %v3389_v54, %v7482_v27 }
 0x5b4   :  { %v7577_v23 = vadd.f32 %v3775_v61, %v3719_v22 }
 0x5b6   :  { %5375 = vmatmul.msk.f32.gmra.mxu2 %vm1446_vm2, %v4165_v5  ;;  %5393 = vmatmul.msk.f32.gmra.mxu3 %vm1446_vm2, %v4331_v17  ;;  %v4171_v5 = vld [vmem:[#allocation2 + $0x332] ss:$2 sm:$0xff] }
 0x5b7   :  { %v4337_v17 = vld [vmem:[#allocation2 + $0x334] ss:$2 sm:$0xff] }
 0x5b9   :  { %v3692_v48 = vpop.f32.mrf.mxu2  ;;  %v3778_v52 = vpop.f32.mrf.mxu3 }
 0x5ba   :  { %v3720_v12 = vadd.f32 %v3692_v48, %v3555_v59  ;;  %v3920_v43 = vpop.f32.mrf.mxu0 }
 0x5bc   :  { %v7583_v58 = vadd.f32 %v3778_v52, %v3720_v12  ;;  %v4083_v52 = vpop.f32.mrf.mxu1 }
 0x5be   :  { %5376 = vmatmul.msk.f32.gmra.mxu2 %vm1446_vm2, %v4167_v26  ;;  %5394 = vmatmul.msk.f32.gmra.mxu3 %vm1446_vm2, %v4333_v45  ;;  %v4173_v26 = vld [vmem:[#allocation2 + $0x362] ss:$2 sm:$0xff]  ;;  %v3559_v45 = vadd.f32 %v3539_v15, %v3390_v30  ;;  %v3962_v15 = vadd.f32 %v3914_v33, %v7502_v41 }
 0x5c1   :  { %v3695_v34 = vpop.f32.mrf.mxu2  ;;  %v3781_v63 = vpop.f32.mrf.mxu3 }
 0x5c2   :  { %v3721_v62 = vadd.f32 %v3695_v34, %v3556_v7 }
 0x5c4   :  { %v7588_v40 = vadd.f32 %v3781_v63, %v3721_v62  ;;  %v4341_v62 = vld [vmem:[#allocation2 + $0x394] ss:$2 sm:$0xff]  ;;  %v4086_v14 = vpop.f32.mrf.mxu1 }
 0x5c6   :  { %5377 = vmatmul.msk.f32.gmra.mxu2 %vm1446_vm2, %v4169_v44  ;;  %5395 = vmatmul.msk.f32.gmra.mxu3 %vm1446_vm2, %v4335_v11  ;;  %v3393_v44 = vadd.f32 %v3392_v46, %v7490_v10 }
 0x5c8   :  { %v3560_v27 = vadd.f32 %v3542_v57, %v3393_v44 }
 0x5c9   :  { %v3698_v2 = vpop.f32.mrf.mxu2  ;;  %v3784_v61 = vpop.f32.mrf.mxu3 }
 0x5ca   :  { %v3722_v22 = vadd.f32 %v3698_v2, %v3557_v31  ;;  %v3923_v2 = vpop.f32.mrf.mxu0 }
 0x5cc   :  { %v7593_v51 = vadd.f32 %v3784_v61, %v3722_v22  ;;  %v4089_v4 = vpop.f32.mrf.mxu1 }
 0x5ce   :  { %5378 = vmatmul.msk.f32.gmra.mxu2 %vm1446_vm2, %v4171_v5  ;;  %5396 = vmatmul.msk.f32.gmra.mxu3 %vm1446_vm2, %v4337_v17  ;;  %v4128_v5 = vadd.f32 %v4080_v32, %v3962_v15 }
 0x5d1   :  { %v3701_v59 = vpop.f32.mrf.mxu2  ;;  %v3787_v48 = vpop.f32.mrf.mxu3 }
 0x5d2   :  { %v3723_v12 = vadd.f32 %v3701_v59, %v3558_v39  ;;  %v3926_v46 = vpop.f32.mrf.mxu0  ;;  %v3963_v59 = vadd.f32 %v3917_v49, %v7511_v29 }
 0x5d4   :  { %v7598_v24 = vadd.f32 %v3787_v48, %v3723_v12  ;;  %v4092_v12 = vpop.f32.mrf.mxu1  ;;  %v4129_v57 = vadd.f32 %v4083_v52, %v3963_v59 }
 0x5d6   :  { %5379 = vmatmul.msk.f32.gmra.mxu2 %vm1446_vm2, %v4173_v26  ;;  %5397 = vmatmul.msk.f32.gmra.mxu3 %vm1446_vm2, %v4339_v55 }
 0x5d9   :  { %v3704_v7 = vpop.f32.mrf.mxu2  ;;  %v3790_v34 = vpop.f32.mrf.mxu3 }
 0x5da   :  { %v3724_v63 = vadd.f32 %v3704_v7, %v3559_v45  ;;  %v3964_v45 = vadd.f32 %v3920_v43, %v7520_v9  ;;  %v3929_v33 = vpop.f32.mrf.mxu0  ;;  %v3966_v9 = vadd.f32 %v3926_v46, %v7542_v21 }
 0x5dc   :  { %v7603_v11 = vadd.f32 %v3790_v34, %v3724_v63  ;;  %v4130_v7 = vadd.f32 %v4086_v14, %v3964_v45  ;;  %v4095_v63 = vpop.f32.mrf.mxu1 }
 0x5de   :  { %5380 = vmatmul.msk.f32.gmra.mxu2 %vm1446_vm2, %v4175_v19  ;;  %5398 = vmatmul.msk.f32.gmra.mxu3 %vm1446_vm2, %v4341_v62  ;;  %v3965_v62 = vadd.f32 %v3923_v2, %v7531_v50 }
 0x5e0   :  { %v4131_v44 = vadd.f32 %v4089_v4, %v3965_v62 }
 0x5e1   :  { %v3707_v54 = vpop.f32.mrf.mxu2  ;;  %v3793_v31 = vpop.f32.mrf.mxu3 }
 0x5e2   :  { %v3725_v61 = vadd.f32 %v3707_v54, %v3560_v27  ;;  %v3932_v49 = vpop.f32.mrf.mxu0 }
 0x5e3   :  { %v3968_v21 = vadd.f32 %v3932_v49, %v7556_v47 }
 0x5e4   :  { %v7608_v22 = vadd.f32 %v3793_v31, %v3725_v61  ;;  %v4098_v31 = vpop.f32.mrf.mxu1  ;;  %v4132_v61 = vadd.f32 %v4092_v12, %v3966_v9 }
 0x5e9   :  { %v4246_v17 = vpop.f32.mrf.mxu2  ;;  %v4412_v39 = vpop.f32.mrf.mxu3 }
 0x5ea   :  { %v4294_v10 = vadd.f32 %v4246_v17, %v4128_v5  ;;  %v3935_v5 = vpop.f32.mrf.mxu0 }
 0x5ec   :  { %v7611_v48 = vadd.f32 %v4412_v39, %v4294_v10  ;;  %v3967_v39 = vadd.f32 %v3929_v33, %v7549_v25  ;;  %v4101_v2 = vpop.f32.mrf.mxu1 }
 0x5ee   :  { %v4133_v10 = vadd.f32 %v4095_v63, %v3967_v39 }
 0x5f1   :  { %v4249_v30 = vpop.f32.mrf.mxu2  ;;  %v4415_v26 = vpop.f32.mrf.mxu3 }
 0x5f2   :  { %v4295_v55 = vadd.f32 %v4249_v30, %v4129_v57  ;;  %v7625_v30 = vpop.f32.mrf.mxu0 }
 0x5f4   :  { %v7614_v41 = vadd.f32 %v4415_v26, %v4295_v55  ;;  %v7630_v12 = vpop.f32.mrf.mxu1  ;;  %v4134_v26 = vadd.f32 %v4098_v31, %v3968_v21 }
 0x5f9   :  { %v4252_v32 = vpop.f32.mrf.mxu2  ;;  %v4418_v34 = vpop.f32.mrf.mxu3 }
 0x5fa   :  { %v4296_v19 = vadd.f32 %v4252_v32, %v4130_v7  ;;  %v7634_v33 = vpop.f32.mrf.mxu0 }
 0x5fc   :  { %v7617_v29 = vadd.f32 %v4418_v34, %v4296_v19  ;;  %v7636_v63 = vpop.f32.mrf.mxu1 }
 0x601   :  { %v4255_v52 = vpop.f32.mrf.mxu2  ;;  %v4421_v27 = vpop.f32.mrf.mxu3 }
 0x602   :  { %v4297_v54 = vadd.f32 %v4255_v52, %v4131_v44  ;;  %v3944_v19 = vpop.f32.mrf.mxu0 }
 0x604   :  { %v7620_v43 = vadd.f32 %v4421_v27, %v4297_v54  ;;  %v4110_v47 = vpop.f32.mrf.mxu1  ;;  %v3972_v54 = vadd.f32 %v3944_v19, %v7583_v58 }
 0x606   :  { %v4138_v9 = vadd.f32 %v4110_v47, %v3972_v54 }
 0x609   :  { %v4258_v14 = vpop.f32.mrf.mxu2  ;;  %v4424_v15 = vpop.f32.mrf.mxu3 }
 0x60a   :  { %v4298_v17 = vadd.f32 %v4258_v14, %v4132_v61  ;;  %v3947_v27 = vpop.f32.mrf.mxu0 }
 0x60b   :  { %v3973_v39 = vadd.f32 %v3947_v27, %v7588_v40 }
 0x60c   :  { %v7623_v50 = vadd.f32 %v4424_v15, %v4298_v17  ;;  %v4113_v31 = vpop.f32.mrf.mxu1 }
 0x611   :  { %v4261_v4 = vpop.f32.mrf.mxu2  ;;  %v4427_v59 = vpop.f32.mrf.mxu3 }
 0x612   :  { %v4299_v57 = vadd.f32 %v4261_v4, %v4133_v10  ;;  %v3950_v17 = vpop.f32.mrf.mxu0 }
 0x614   :  { %v7628_v46 = vadd.f32 %v4427_v59, %v4299_v57  ;;  %v4116_v4 = vpop.f32.mrf.mxu1  ;;  %v4139_v59 = vadd.f32 %v4113_v31, %v3973_v39 }
 0x619   :  { %v4264_v55 = vpop.f32.mrf.mxu2  ;;  %v4430_v45 = vpop.f32.mrf.mxu3 }
 0x61a   :  { %v4300_v7 = vadd.f32 %v4264_v55, %v4134_v26  ;;  %v3974_v55 = vadd.f32 %v3950_v17, %v7593_v51  ;;  %v3969_v51 = vadd.f32 %v3935_v5, %v7563_v35 }
 0x61c   :  { %v7632_v25 = vadd.f32 %v4430_v45, %v4300_v7  ;;  %v3953_v45 = vpop.f32.mrf.mxu0  ;;  %v4140_v7 = vadd.f32 %v4116_v4, %v3974_v55  ;;  %v4119_v40 = vpop.f32.mrf.mxu1  ;;  %v3970_v55 = vadd.f32 %v7625_v30, %v7570_v53  ;;  %v3971_v53 = vadd.f32 %v7634_v33, %v7577_v23 }
 0x61d   :  { %v3975_v27 = vadd.f32 %v3953_v45, %v7598_v24 }
 0x621   :  { %v4267_v32 = vpop.f32.mrf.mxu2  ;;  %v4433_v34 = vpop.f32.mrf.mxu3 }
 0x624   :  { %v3956_v31 = vpop.f32.mrf.mxu0  ;;  %v4122_v4 = vpop.f32.mrf.mxu1 }
 0x625   :  { %v3976_v39 = vadd.f32 %v3956_v31, %v7603_v11  ;;  %v4136_v11 = vadd.f32 %v7630_v12, %v3970_v55  ;;  %v4137_v12 = vadd.f32 %v7636_v63, %v3971_v53 }
 0x629   :  { %v4270_v62 = vpop.f32.mrf.mxu2  ;;  %v7638_v44 = vpop.f32.mrf.mxu3 }
 0x62c   :  { %v3959_v45 = vpop.f32.mrf.mxu0 }
 0x631   :  { %v7640_v49 = vpop.f32.mrf.mxu2  ;;  %v7642_v52 = vpop.f32.mrf.mxu3 }
 0x639   :  { %v4276_v61 = vpop.f32.mrf.mxu2  ;;  %v4442_v14 = vpop.f32.mrf.mxu3 }
 0x63a   :  { %v4304_v15 = vadd.f32 %v4276_v61, %v4138_v9  ;;  %v4141_v61 = vadd.f32 %v4119_v40, %v3975_v27 }
 0x63c   :  { %v4470_v10 = vadd.f32 %v4442_v14, %v4304_v15 }
 0x63e   :  { %4512 = vrot.lane.b32.xlu0 %v4470_v10, %s5446_s6 }
 0x641   :  { %v4279_v57 = vpop.f32.mrf.mxu2  ;;  %v4445_v21 = vpop.f32.mrf.mxu3 }
 0x642   :  { %v4305_v26 = vadd.f32 %v4279_v57, %v4139_v59  ;;  %v4135_v59 = vadd.f32 %v4101_v2, %v3969_v51 }
 0x644   :  { %v4471_v58 = vadd.f32 %v4445_v21, %v4305_v26  ;;  %v4301_v57 = vadd.f32 %v4267_v32, %v4135_v59  ;;  %v4142_v21 = vadd.f32 %v4122_v4, %v3976_v39  ;;  %v4302_v32 = vadd.f32 %v4270_v62, %v4136_v11 }
 0x646   :  { %4514 = vrot.lane.b32.xlu2 %v4471_v58, %s5446_s6  ;;  %v4467_v35 = vadd.f32 %v4433_v34, %v4301_v57  ;;  %v4468_v30 = vadd.f32 %v7638_v44, %v4302_v32  ;;  %v4303_v34 = vadd.f32 %v7640_v49, %v4137_v12 }
 0x648   :  { %v4469_v62 = vadd.f32 %v7642_v52, %v4303_v34 }
 0x649   :  { %v4282_v19 = vpop.f32.mrf.mxu2  ;;  %v4448_v47 = vpop.f32.mrf.mxu3 }
 0x64a   :  { %v4306_v54 = vadd.f32 %v4282_v19, %v4140_v7  ;;  %v3977_v7 = vadd.f32 %v3959_v45, %v7608_v22  ;;  %v4125_v19 = vpop.f32.mrf.mxu1 }
 0x64c   :  { %v4472_v9 = vadd.f32 %v4448_v47, %v4306_v54  ;;  %v4143_v2 = vadd.f32 %v4125_v19, %v3977_v7 }
 0x64e   :  { %4516 = vrot.lane.b32.xlu1 %v4472_v9, %s5446_s6 }
 0x651   :  { %v4285_v14 = vpop.f32.mrf.mxu2  ;;  %v4451_v15 = vpop.f32.mrf.mxu3 }
 0x652   :  { %v4307_v17 = vadd.f32 %v4285_v14, %v4141_v61 }
 0x654   :  { %v4473_v10 = vadd.f32 %v4451_v15, %v4307_v17 }
 0x656   :  { %4518 = vrot.lane.b32.xlu0 %v4473_v10, %s5446_s6 }
 0x659   :  { %v4288_v24 = vpop.f32.mrf.mxu2  ;;  %v4454_v26 = vpop.f32.mrf.mxu3 }
 0x65a   :  { %v4308_v58 = vadd.f32 %v4288_v24, %v4142_v21 }
 0x65c   :  { %v4474_v5 = vadd.f32 %v4454_v26, %v4308_v58 }
 0x65e   :  { %4506 = vrot.lane.b32.xlu0 %v4467_v35, %s5446_s6  ;;  %4520 = vrot.lane.b32.xlu2 %v4474_v5, %s5446_s6 }
 0x661   :  { %v4291_v47 = vpop.f32.mrf.mxu2  ;;  %v4457_v54 = vpop.f32.mrf.mxu3 }
 0x662   :  { %v4309_v40 = vadd.f32 %v4291_v47, %v4143_v2 }
 0x664   :  { %v4475_v22 = vadd.f32 %v4457_v54, %v4309_v40 }
 0x666   :  { %4500 = vrot.lane.b32.xlu0 %v7623_v50, %s5446_s6  ;;  %4508 = vrot.lane.b32.xlu2 %v4468_v30, %s5446_s6 }
 0x667   :  { %4522 = vrot.lane.b32.xlu1 %v4475_v22, %s5446_s6 }
 0x66e   :  { %4494 = vrot.lane.b32.xlu0 %v7614_v41, %s5446_s6  ;;  %4502 = vrot.lane.b32.xlu2 %v7628_v46, %s5446_s6 }
 0x66f   :  { %4510 = vrot.lane.b32.xlu1 %v4469_v62, %s5446_s6 }
 0x676   :  { %4496 = vrot.lane.b32.xlu2 %v7617_v29, %s5446_s6  ;;  %v7688_v29 = vld [vmem:[%s7785_s7] ss:$0 sm:$0xff]  ;;  %s4714_s7 = sshll.u32 %s5447_s22, 4  ;;  %s4715_s7 = int_to_ptr.vmem [resolvable:$true] %s4714_s7 }
 0x677   :  { %4504 = vrot.lane.b32.xlu1 %v7632_v25, %s5446_s6 }
 0x67f   :  { %4498 = vrot.lane.b32.xlu1 %v7620_v43, %s5446_s6 }
 0x687   :  { %4492 = vrot.lane.b32.xlu1 %v7611_v48, %s5446_s6 }
 0x6a0   :  { %v4515_v23 = vpop.permute.xlu2 %4514 }
 0x6a1   :  { %v4551_v61 = vsel %vm1446_vm2, %v7458_v1, %v4515_v23 }
 0x6b0   :  { %v4513_v50 = vpop.permute.xlu0 %4512 }
 0x6b1   :  { %v4550_v15 = vsel %vm1446_vm2, %v7450_v18, %v4513_v50 }
 0x6b2   :  { %v4570_v39 = vadd.f32 %v7688_v29, %v4550_v15 }
 0x6b4   :  { %v4586_v26 = vmax.f32 %v4570_v39, 0.0 }
 0x6b8   :  { %v4521_v41 = vpop.permute.xlu2 %4520 }
 0x6b9   :  { %v4554_v46 = vsel %vm1446_vm2, %v7485_v13, %v4521_v41 }
 0x6ba   :  { %v4574_v49 = vadd.f32 %v7688_v29, %v4554_v46  ;;  %v4645_v46 = vld [vmem:[%s7789_s11 + $0x10] sm:$0xff] }
 0x6bc   :  { %v4590_v14 = vmax.f32 %v4574_v49, 0.0 }
 0x6c0   :  { %v4517_v33 = vpop.permute.xlu1 %4516  ;;  %v4509_v25 = vpop.permute.xlu2 %4508 }
 0x6c1   :  { %v4552_v13 = vsel %vm1446_vm2, %v7466_v3, %v4517_v33  ;;  %v4571_v3 = vadd.f32 %v7688_v29, %v4551_v61  ;;  %v4548_v59 = vsel %vm1446_vm2, %v7434_v37, %v4509_v25  ;;  %v4592_v33 = vld [vmem:[%s7786_s8] sm:$0x3] }
 0x6c2   :  { %v4568_v55 = vadd.f32 %v7688_v29, %v4548_v59  ;;  %v4643_v25 = vld [vmem:[%s7789_s11] sm:$0xff] }
 0x6c3   :  { %v4587_v57 = vmax.f32 %v4571_v3, 0.0 }
 0x6c4   :  { %v4584_v35 = vmax.f32 %v4568_v55, 0.0 }
 0x6c8   :  { %v4519_v63 = vpop.permute.xlu0 %4518  ;;  %v4503_v4 = vpop.permute.xlu2 %4502 }
 0x6c9   :  { %v4553_v43 = vsel %vm1446_vm2, %v7477_v0, %v4519_v63  ;;  %v4572_v0 = vadd.f32 %v7688_v29, %v4552_v13  ;;  %v4545_v37 = vsel %vm1446_vm2, %v7402_v38, %v4503_v4  ;;  %v4646_v63 = vld [vmem:[%s7789_s11 + $0x18] sm:$0xff]  ;;  %v4677_v13 = vld [vmem:[%s7791_s13 + $0x8] sm:$0xff] }
 0x6ca   :  { %v4573_v9 = vadd.f32 %v7688_v29, %v4553_v43  ;;  %v4565_v19 = vadd.f32 %v7688_v29, %v4545_v37  ;;  %v4678_v43 = vld [vmem:[%s7791_s13 + $0x10] sm:$0xff] }
 0x6cb   :  { %v4588_v10 = vmax.f32 %v4572_v0, 0.0 }
 0x6cc   :  { %v4589_v51 = vmax.f32 %v4573_v9, 0.0  ;;  %v4676_v9 = vld [vmem:[%s7791_s13] sm:$0xff] }
 0x6d0   :  { %v4507_v52 = vpop.permute.xlu0 %4506  ;;  %v4497_v2 = vpop.permute.xlu2 %4496 }
 0x6d1   :  { %v4547_v24 = vsel %vm1446_vm2, %v7418_v6, %v4507_v52  ;;  %v4542_v38 = vsel %vm1446_vm2, %v7378_v36, %v4497_v2 }
 0x6d2   :  { %v4562_v30 = vadd.f32 %v7688_v29, %v4542_v38 }
 0x6d4   :  { %v4578_v36 = vmax.f32 %v4562_v30, 0.0 }
 0x6d8   :  { %v4501_v21 = vpop.permute.xlu0 %4500 }
 0x6d9   :  { %v4523_v44 = vpop.permute.xlu1 %4522  ;;  %v4544_v6 = vsel %vm1446_vm2, %v7394_v8, %v4501_v21 }
 0x6da   :  { %v4555_v48 = vsel %vm1446_vm2, %v7493_v28, %v4523_v44  ;;  %v4613_v28 = vld [vmem:[%s7787_s9] sm:$0xff]  ;;  %v4564_v32 = vadd.f32 %v7688_v29, %v4544_v6  ;;  %v4679_v44 = vld [vmem:[%s7791_s13 + $0x18] sm:$0xff]  ;;  %s4716_s13 = sshll.u32 %s7793_s15, 4  ;;  %s4717_s13 = int_to_ptr.hbm [resolvable:$true] %s4716_s13 }
 0x6db   :  { %v4575_v27 = vadd.f32 %v7688_v29, %v4555_v48  ;;  %4637 = vmatpush.msra.mxu1 %v4613_v28  ;;  %v5410_v48 = vld [vmem:[%s7788_s10] ss:$0 sm:$0xff] }
 0x6dc   :  { %v4580_v22 = vmax.f32 %v4564_v32, 0.0  ;;  %v5412_v28 = vld [vmem:[%s7792_s14] ss:$0 sm:$0xff] }
 0x6dd   :  { %v4591_v31 = vmax.f32 %v4575_v27, 0.0  ;;  %4699 = vmatpush.msrb.mxu1 %v4679_v44 }
 0x6df   :  { %4593 = vmatpush.msra.mxu0 %v4591_v31  ;;  %4700 = vmatpush.msrb.mxu1 %v4678_v43  ;;  %v5411_v31 = vld [vmem:[%s7790_s12] ss:$0 sm:$0xff] }
 0x6e0   :  { %v4495_v47 = vpop.permute.xlu0 %4494 }
 0x6e1   :  { %v4511_v17 = vpop.permute.xlu1 %4510  ;;  %4594 = vmatpush.msra.mxu0 %v4590_v14  ;;  %v4541_v53 = vsel %vm1446_vm2, %v7371_v56, %v4495_v47  ;;  %4701 = vmatpush.msrb.mxu1 %v4677_v13 }
 0x6e2   :  { %v4549_v1 = vsel %vm1446_vm2, %v7442_v16, %v4511_v17  ;;  %v4567_v16 = vadd.f32 %v7688_v29, %v4547_v24  ;;  %v4561_v34 = vadd.f32 %v7688_v29, %v4541_v53 }
 0x6e3   :  { %4595 = vmatpush.msra.mxu0 %v4589_v51  ;;  %v4569_v18 = vadd.f32 %v7688_v29, %v4549_v1  ;;  %4702 = vmatpush.msrb.mxu1 %v4676_v9 }
 0x6e4   :  { %v4583_v11 = vmax.f32 %v4567_v16, 0.0  ;;  %v4577_v23 = vmax.f32 %v4561_v34, 0.0 }
 0x6e5   :  { %4596 = vmatpush.msra.mxu0 %v4588_v10  ;;  %v4585_v58 = vmax.f32 %v4569_v18, 0.0 }
 0x6e7   :  { %4597 = vmatpush.msra.mxu0 %v4587_v57 }
 0x6e9   :  { %v4505_v45 = vpop.permute.xlu1 %4504  ;;  %4598 = vmatpush.msra.mxu0 %v4586_v26 }
 0x6ea   :  { %v4546_v7 = vsel %vm1446_vm2, %v7410_v60, %v4505_v45  ;;  %v4581_v60 = vmax.f32 %v4565_v19, 0.0 }
 0x6eb   :  { %v4566_v5 = vadd.f32 %v7688_v29, %v4546_v7  ;;  %4599 = vmatpush.msra.mxu0 %v4585_v58 }
 0x6ed   :  { %4600 = vmatpush.msra.mxu0 %v4584_v35  ;;  %v4582_v54 = vmax.f32 %v4566_v5, 0.0 }
 0x6ef   :  { %4601 = vmatpush.msra.mxu0 %v4583_v11 }
 0x6f1   :  { %v4499_v40 = vpop.permute.xlu1 %4498  ;;  %4602 = vmatpush.msra.mxu0 %v4582_v54 }
 0x6f2   :  { %v4543_v8 = vsel %vm1446_vm2, %v7386_v42, %v4499_v40 }
 0x6f3   :  { %v4563_v12 = vadd.f32 %v7688_v29, %v4543_v8  ;;  %4603 = vmatpush.msra.mxu0 %v4581_v60 }
 0x6f5   :  { %v4579_v62 = vmax.f32 %v4563_v12, 0.0  ;;  %4604 = vmatpush.msra.mxu0 %v4580_v22 }
 0x6f7   :  { %4605 = vmatpush.msra.mxu0 %v4579_v62 }
 0x6f9   :  { %v4493_v50 = vpop.permute.xlu1 %4492  ;;  %4606 = vmatpush.msra.mxu0 %v4578_v36 }
 0x6fa   :  { %v4540_v56 = vsel %vm1446_vm2, %v7364_v20, %v4493_v50 }
 0x6fb   :  { %v4560_v42 = vadd.f32 %v7688_v29, %v4540_v56  ;;  %4607 = vmatpush.msra.mxu0 %v4577_v23  ;;  %v4644_v29 = vld [vmem:[%s7789_s11 + $0x8] sm:$0xff] }
 0x6fd   :  { %v4576_v41 = vmax.f32 %v4560_v42, 0.0 }
 0x6ff   :  { %4608 = vmatpush.msra.mxu0 %v4576_v41 }
 0x700   :  { %4609 = vmatmul.f32.vlgmr.msra.gmra.mxu0 %v4592_v33 }
 0x701   :  { %4667 = vmatpush.msrb.mxu0 %v4646_v63 }
 0x703   :  { %4668 = vmatpush.msrb.mxu0 %v4645_v46 }
 0x705   :  { %4669 = vmatpush.msrb.mxu0 %v4644_v29 }
 0x707   :  { %4670 = vmatpush.msrb.mxu0 %v4643_v25 }
 0x77d   :  { %v4610_v20 = vpop.f32.mrf.mxu0 }
 0x77e   :  { %5399 = vmatmul.msk.f32.vlgmr.msra.gmra.mxu1 %vm4618_vm6, %v4610_v20 }
 0x7fb   :  { %v4639_v49 = vpop.f32.mrf.mxu1 }
 0x7fc   :  { %v4640_v52 = vadd.f32 %v5410_v48, %v4639_v49 }
 0x7fe   :  { %v4642_v27 = vmax.f32 %v4640_v52, 0.0 }
 0x800   :  { %5400 = vmatmul.msk.f32.vlgmr.msrb.gmra.mxu0 %vm4651_vm7, %v4642_v27 }
 0x87d   :  { %v4672_v61 = vpop.f32.mrf.mxu0 }
 0x87e   :  { %v4673_v14 = vadd.f32 %v5411_v31, %v4672_v61 }
 0x880   :  { %v4675_v0 = vmax.f32 %v4673_v14, 0.0 }
 0x882   :  { %5401 = vmatmul.msk.f32.vlgmr.msrb.gmra.mxu1 %vm4651_vm7, %v4675_v0 }
 0x8ff   :  { %v4704_v15 = vpop.f32.mrf.mxu1 }
 0x900   :  { %v4705_v3 = vadd.f32 %v5412_v28, %v4704_v15 }
 0x902   :  { %4708 = vst.msk [vmem:[#allocation3] sm:$0x3] %vm4707_vm8, %v4705_v3 }
 0x903   :  { %4719 = dma.vmem_to_hbm [thread:$0]  %s4715_s7, 32, %s4717_s13, [#allocation4]  }
 0x904   :  { %5442 = dma.done.wait [#allocation4], 32  }
 0x905   :  { %5443 = vsyncadd [#allocation4], 4294967264 }
 0x906   :  { %4724 = vsyncpa [#allocation4], 1 }

</bundles_post_ra>
